<compile_context>
chip_gen: v7x
topology: tpu7x:2x2x1
jax: 0.10.0
libtpu: 0.0.40
codegen_flags: <defaults>
</compile_context>

<pallas_src>
import functools
import math

import jax
import jax.numpy as jnp
from jax import lax
from jax.experimental import pallas as pl
from jax.experimental.pallas import tpu as pltpu


def _default_vmem_limit():
    """Generation-aware scoped-VMEM limit: ~75% of physical, capped at 100 MiB."""
    try:
        cap = getattr(pltpu.get_tpu_info(), "vmem_capacity_bytes", None)
        if cap:
            return int(min(0.75 * cap, 100 * 1024 * 1024))
    except Exception:
        pass
    return 48 * 1024 * 1024


VMEM_LIMIT_BYTES = _default_vmem_limit()
MM_TK_CAP = 1024  # K cap for matmul3d; LN fusion into the matmul requires dim <= this.


def _tile(n, cap, align):
    """Largest tile <= cap that divides n and respects TPU (8,128) alignment (else full n)."""
    if n <= cap:
        return n
    t = (cap // align) * align
    while t >= align:
        if n % t == 0:
            return t
        t -= align
    return n


def _gelu_tanh(y):
    c = math.sqrt(2.0 / math.pi)
    return 0.5 * y * (1.0 + jnp.tanh(c * (y + 0.044715 * y * y * y)))


# ----------------------------------------------------------------------------
# Tiled matmul with optional fused LN+adaLN prologue and gate*y + residual epilogue
# ----------------------------------------------------------------------------

def _mm_kernel(*refs, has_ln, has_gate, has_resid, eps):
    x_ref, w_ref = refs[0], refs[1]
    i = 2
    lnw_ref = lnb_ref = sc_ref = sh_ref = gate_ref = resid_ref = None
    if has_ln:
        lnw_ref, lnb_ref, sc_ref, sh_ref = refs[i:i + 4]
        i += 4
    if has_gate:
        gate_ref = refs[i]; i += 1
    if has_resid:
        resid_ref = refs[i]; i += 1
    o_ref, acc_ref = refs[i], refs[i + 1]

    kstep = pl.program_id(3)

    @pl.when(kstep == 0)
    def _():
        acc_ref[...] = jnp.zeros_like(acc_ref)

    x = x_ref[0]
    if has_ln:
        x = x.astype(jnp.float32)
        mu = jnp.mean(x, -1, keepdims=True)
        var = jnp.mean(x * x, -1, keepdims=True) - mu * mu     # one-pass stats
        x = (x - mu) * lax.rsqrt(var + eps)
        x = x * lnw_ref[...] + lnb_ref[...]
        x = x * (1.0 + sc_ref[0]) + sh_ref[0]
    acc_ref[...] += jnp.dot(x.astype(w_ref.dtype), w_ref[...],
                            preferred_element_type=jnp.float32)

    @pl.when(kstep == pl.num_programs(3) - 1)
    def _():
        y = acc_ref[...]
        if has_gate:
            y = y * gate_ref[0].astype(jnp.float32)             # [1, tn] broadcast
        if has_resid:
            y = y + resid_ref[0].astype(jnp.float32)            # [tm, tn]
        o_ref[0] = y.astype(o_ref.dtype)


def matmul3d(x, w, *, out_dtype, ln=None, gate=None, resid=None,
             tm_cap=512, tn_cap=1024, tk_cap=MM_TK_CAP):
    """x: [B, M, K] @ w: [K, N] -> [B, M, N], bf16 MXU / f32 accumulation.

    ln=(w, b, scale, shift, eps): fuse LayerNorm + adaLN into the prologue
    (requires the contraction dim to be untiled, i.e. K <= tk_cap or K | tk == K).
    gate: [B,1,N] broadcast multiply of the result; resid: [B,M,N] residual add.
    """
    B, M, K = x.shape
    N = w.shape[1]
    tm = _tile(M, tm_cap, 8)
    tn = _tile(N, tn_cap, 128)
    tk = _tile(K, tk_cap, 128)
    if ln is not None:
        assert tk == K, "LN fusion requires an untiled contraction dim"

    in_specs = [
        pl.BlockSpec((1, tm, tk), lambda b, i, j, k: (b, i, k)),
        pl.BlockSpec((tk, tn), lambda b, i, j, k: (k, j)),
    ]
    args = [x, w]
    eps = 0.0
    if ln is not None:
        ln_w, ln_b, scale, shift, eps = ln
        in_specs += [
            pl.BlockSpec((1, K), lambda b, i, j, k: (0, 0)),
            pl.BlockSpec((1, K), lambda b, i, j, k: (0, 0)),
            pl.BlockSpec((1, 1, K), lambda b, i, j, k: (b, 0, 0)),
            pl.BlockSpec((1, 1, K), lambda b, i, j, k: (b, 0, 0)),
        ]
        args += [ln_w.reshape(1, -1).astype(jnp.float32),
                 ln_b.reshape(1, -1).astype(jnp.float32), scale, shift]
    if gate is not None:                                         # [B, 1, N]
        in_specs.append(pl.BlockSpec((1, 1, tn), lambda b, i, j, k: (b, 0, j)))
        args.append(gate)
    if resid is not None:                                        # [B, M, N]
        in_specs.append(pl.BlockSpec((1, tm, tn), lambda b, i, j, k: (b, i, j)))
        args.append(resid)

    kernel = functools.partial(_mm_kernel, has_ln=ln is not None,
                               has_gate=gate is not None,
                               has_resid=resid is not None, eps=eps)
    return pl.pallas_call(
        kernel,
        grid=(B, M // tm, N // tn, K // tk),
        in_specs=in_specs,
        out_specs=pl.BlockSpec((1, tm, tn), lambda b, i, j, k: (b, i, j)),
        out_shape=jax.ShapeDtypeStruct((B, M, N), out_dtype),
        scratch_shapes=[pltpu.VMEM((tm, tn), jnp.float32)],
        compiler_params=pltpu.CompilerParams(
            dimension_semantics=("parallel", "parallel", "parallel", "arbitrary"),
            vmem_limit_bytes=VMEM_LIMIT_BYTES),
    )(*args)


# ----------------------------------------------------------------------------
# Fallback: standalone LayerNorm + adaLN (used only if dim > MM_TK_CAP)
# ----------------------------------------------------------------------------

def _ln_mod_kernel(x_ref, w_ref, b_ref, scale_ref, shift_ref, o_ref, *, eps):
    x = x_ref[0].astype(jnp.float32)
    mu = jnp.mean(x, -1, keepdims=True)
    var = jnp.mean(x * x, -1, keepdims=True) - mu * mu
    xn = (x - mu) * lax.rsqrt(var + eps)
    xn = xn * w_ref[...] + b_ref[...]
    o_ref[0] = (xn * (1.0 + scale_ref[0]) + shift_ref[0]).astype(o_ref.dtype)


def layernorm_mod(x, w, b, scale, shift, *, eps, out_dtype, ts_cap=256):
    B, S, D = x.shape
    ts = _tile(S, ts_cap, 8)
    return pl.pallas_call(
        functools.partial(_ln_mod_kernel, eps=eps),
        grid=(B, S // ts),
        in_specs=[
            pl.BlockSpec((1, ts, D), lambda b, i: (b, i, 0)),
            pl.BlockSpec((1, D), lambda b, i: (0, 0)),
            pl.BlockSpec((1, D), lambda b, i: (0, 0)),
            pl.BlockSpec((1, 1, D), lambda b, i: (b, 0, 0)),
            pl.BlockSpec((1, 1, D), lambda b, i: (b, 0, 0)),
        ],
        out_specs=pl.BlockSpec((1, ts, D), lambda b, i: (b, i, 0)),
        out_shape=jax.ShapeDtypeStruct((B, S, D), out_dtype),
        compiler_params=pltpu.CompilerParams(
            dimension_semantics=("parallel", "parallel"),
            vmem_limit_bytes=VMEM_LIMIT_BYTES),
    )(x, w.reshape(1, -1), b.reshape(1, -1), scale, shift)


# ----------------------------------------------------------------------------
# Flash attention with fused qk-RMSNorm and roll-based RoPE (q-prep hoisted)
# ----------------------------------------------------------------------------

def _rope_perm(rope_split):
    """Permutation mapping 'concatenated-halves' lane j -> original head-dim index."""
    firsts, seconds = [], []
    off = 0
    for c in rope_split:
        firsts.extend(range(off, off + c // 2))
        seconds.extend(range(off + c // 2, off + c))
        off += c
    return firsts + seconds


def _flash_kernel(*refs, scale, Dh, use_rope, eps):
    q_ref, k_ref, v_ref, qn_ref, kn_ref = refs[:5]
    i = 5
    ropeq_ref = ropek_ref = None
    if use_rope:
        ropeq_ref, ropek_ref = refs[i:i + 2]
        i += 2
    o_ref = refs[i]
    m_sc, l_sc, acc_sc, qp_sc = refs[i + 1:i + 5]

    kv_step = pl.program_id(3)

    def apply_rope(x, cs_ref):
        # concatenated-halves layout: rotate-half == self-inverse roll by Dh/2 (XLU)
        cosf = cs_ref[:, :Dh]
        sinf = cs_ref[:, Dh:]
        return x * cosf + pltpu.roll(x, Dh // 2, 1) * sinf

    @pl.when(kv_step == 0)
    def _():
        m_sc[...] = jnp.full(m_sc.shape, -jnp.inf, m_sc.dtype)
        l_sc[...] = jnp.zeros_like(l_sc)
        acc_sc[...] = jnp.zeros_like(acc_sc)
        # q-side RMSNorm (+RoPE) + softmax scale computed ONCE per (b, h, qi)
        qf = q_ref[0].astype(jnp.float32)
        qf = qf * lax.rsqrt(jnp.mean(qf * qf, -1, keepdims=True) + eps) * qn_ref[...]
        if use_rope:
            qf = apply_rope(qf, ropeq_ref)
        qp_sc[...] = (qf * scale).astype(qp_sc.dtype)

    kf = k_ref[0].astype(jnp.float32)
    kf = kf * lax.rsqrt(jnp.mean(kf * kf, -1, keepdims=True) + eps) * kn_ref[...]
    if use_rope:
        kf = apply_rope(kf, ropek_ref)

    s = lax.dot_general(qp_sc[...], kf.astype(qp_sc.dtype),
                        (((1,), (1,)), ((), ())),
                        preferred_element_type=jnp.float32)      # [tq, tkv]

    m_prev = m_sc[...]
    m_new = jnp.maximum(m_prev, jnp.max(s, -1, keepdims=True))
    alpha = jnp.exp(m_prev - m_new)
    p = jnp.exp(s - m_new)
    l_sc[...] = alpha * l_sc[...] + jnp.sum(p, -1, keepdims=True)
    acc_sc[...] = alpha * acc_sc[...] + jnp.dot(
        p.astype(v_ref.dtype), v_ref[0], preferred_element_type=jnp.float32)
    m_sc[...] = m_new

    @pl.when(kv_step == pl.num_programs(3) - 1)
    def _():
        o_ref[0] = (acc_sc[...] / l_sc[...]).astype(o_ref.dtype)


def flash_attention(q_src, kv_src, *, num_heads, head_dim, q_head, k_head, v_head,
                    q_norm_w, k_norm_w, rope_cs=None, out_dtype, eps=1e-6,
                    tq_cap=512, tkv_cap=512):
    """Non-causal SDPA with fused qk-RMSNorm (+RoPE in permuted lane layout).

    q/k/v for head h are addressed via BlockSpec last-dim block indices
    (mul*h + add) straight out of the fused projection outputs — no HBM
    transpose / split.  Output is [B, S, H*Dh] in the (h d) layout.
    rope_cs: packed [S, 2*Dh] = [cos_full | sin_signed] in the permuted layout.
    """
    B, S, _ = q_src.shape
    L = kv_src.shape[1]
    Dh, H = head_dim, num_heads
    tq = _tile(S, tq_cap, 8)
    tkv = _tile(L, tkv_cap, 8)
    qm, qa = q_head
    km, ka = k_head
    vm, va = v_head
    use_rope = rope_cs is not None

    in_specs = [
        pl.BlockSpec((1, tq, Dh), lambda b, h, qi, ki: (b, qi, qm * h + qa)),
        pl.BlockSpec((1, tkv, Dh), lambda b, h, qi, ki: (b, ki, km * h + ka)),
        pl.BlockSpec((1, tkv, Dh), lambda b, h, qi, ki: (b, ki, vm * h + va)),
        pl.BlockSpec((1, Dh), lambda b, h, qi, ki: (0, 0)),
        pl.BlockSpec((1, Dh), lambda b, h, qi, ki: (0, 0)),
    ]
    args = [q_src, kv_src, kv_src,
            q_norm_w.reshape(1, -1).astype(jnp.float32),
            k_norm_w.reshape(1, -1).astype(jnp.float32)]
    if use_rope:
        in_specs += [
            pl.BlockSpec((tq, 2 * Dh), lambda b, h, qi, ki: (qi, 0)),
            pl.BlockSpec((tkv, 2 * Dh), lambda b, h, qi, ki: (ki, 0)),
        ]
        args += [rope_cs, rope_cs]

    kernel = functools.partial(_flash_kernel, scale=1.0 / math.sqrt(Dh),
                               Dh=Dh, use_rope=use_rope, eps=eps)
    return pl.pallas_call(
        kernel,
        grid=(B, H, S // tq, L // tkv),
        in_specs=in_specs,
        out_specs=pl.BlockSpec((1, tq, Dh), lambda b, h, qi, ki: (b, qi, h)),
        out_shape=jax.ShapeDtypeStruct((B, S, H * Dh), out_dtype),
        scratch_shapes=[pltpu.VMEM((tq, 1), jnp.float32),
                        pltpu.VMEM((tq, 1), jnp.float32),
                        pltpu.VMEM((tq, Dh), jnp.float32),
                        pltpu.VMEM((tq, Dh), q_src.dtype)],
        compiler_params=pltpu.CompilerParams(
            dimension_semantics=("parallel", "parallel", "parallel", "arbitrary"),
            vmem_limit_bytes=VMEM_LIMIT_BYTES),
    )(*args)


# ----------------------------------------------------------------------------
# Fully fused MLP: LN + adaLN + fc_in + gelu_tanh + fc_out + gate*y + residual
# (the [B, S, 4*dim] hidden activation never touches HBM)
# ----------------------------------------------------------------------------

def _mlp_kernel(x_ref, lnw_ref, lnb_ref, scale_ref, shift_ref, fi_ref, fo_ref,
                gate_ref, o_ref, xln_sc, acc_sc, *, eps):
    hstep = pl.program_id(2)

    @pl.when(hstep == 0)
    def _():
        x = x_ref[0].astype(jnp.float32)
        mu = jnp.mean(x, -1, keepdims=True)
        var = jnp.mean(x * x, -1, keepdims=True) - mu * mu
        xn = (x - mu) * lax.rsqrt(var + eps)
        xn = xn * lnw_ref[...] + lnb_ref[...]
        xn = xn * (1.0 + scale_ref[0]) + shift_ref[0]
        xln_sc[...] = xn.astype(xln_sc.dtype)
        acc_sc[...] = jnp.zeros_like(acc_sc)

    h = jnp.dot(xln_sc[...], fi_ref[...], preferred_element_type=jnp.float32)
    h = _gelu_tanh(h)
    acc_sc[...] += jnp.dot(h.astype(fo_ref.dtype), fo_ref[...],
                           preferred_element_type=jnp.float32)

    @pl.when(hstep == pl.num_programs(2) - 1)
    def _():
        o_ref[0] = (acc_sc[...] * gate_ref[0].astype(jnp.float32)
                    + x_ref[0].astype(jnp.float32)).astype(o_ref.dtype)


def mlp_fused(x, ln_w, ln_b, scale, shift, fc_in, fc_out, gate, *, eps, out_dtype,
              tm_cap=256, th_cap=512):
    B, M, D = x.shape
    Hid = fc_in.shape[1]
    tm = _tile(M, tm_cap, 8)
    th = _tile(Hid, th_cap, 128)

    def est(tm_, th_):  # double-buffered inputs/outputs + scratch, rough bytes
        return (2 * tm_ * D * x.dtype.itemsize
                + 4 * D * th_ * fc_in.dtype.itemsize
                + 2 * tm_ * D * jnp.dtype(out_dtype).itemsize
                + tm_ * D * 4 + tm_ * D * 2 + 16 * D * 4)

    budget = int(0.8 * VMEM_LIMIT_BYTES)
    for _ in range(6):                       # shrink tiles on small-VMEM parts (v7x)
        if est(tm, th) <= budget:
            break
        if th > 128:
            th = _tile(Hid, max(128, th // 2), 128)
        elif tm > 8:
            tm = _tile(M, max(8, tm // 2), 8)
        else:
            break

    return pl.pallas_call(
        functools.partial(_mlp_kernel, eps=eps),
        grid=(B, M // tm, Hid // th),
        in_specs=[
            pl.BlockSpec((1, tm, D), lambda b, i, h: (b, i, 0)),
            pl.BlockSpec((1, D), lambda b, i, h: (0, 0)),
            pl.BlockSpec((1, D), lambda b, i, h: (0, 0)),
            pl.BlockSpec((1, 1, D), lambda b, i, h: (b, 0, 0)),
            pl.BlockSpec((1, 1, D), lambda b, i, h: (b, 0, 0)),
            pl.BlockSpec((D, th), lambda b, i, h: (0, h)),
            pl.BlockSpec((th, D), lambda b, i, h: (h, 0)),
            pl.BlockSpec((1, 1, D), lambda b, i, h: (b, 0, 0)),
        ],
        out_specs=pl.BlockSpec((1, tm, D), lambda b, i, h: (b, i, 0)),
        out_shape=jax.ShapeDtypeStruct((B, M, D), out_dtype),
        scratch_shapes=[pltpu.VMEM((tm, D), fc_in.dtype),
                        pltpu.VMEM((tm, D), jnp.float32)],
        compiler_params=pltpu.CompilerParams(
            dimension_semantics=("parallel", "parallel", "arbitrary"),
            vmem_limit_bytes=VMEM_LIMIT_BYTES),
    )(x, ln_w.reshape(1, -1).astype(jnp.float32),
      ln_b.reshape(1, -1).astype(jnp.float32), scale, shift, fc_in, fc_out, gate)


# ----------------------------------------------------------------------------
# Block forward
# ----------------------------------------------------------------------------

def step_video_block_forward(params, q, kv, t_expand, *, cos_sin, rope_positions,
                             rope_split, head_dim, norm_eps=1e-5,
                             compute_dtype=jnp.bfloat16):
    B, S, dim = q.shape
    Dh = head_dim
    H = dim // Dh
    F, Ht, W = rope_positions
    assert F * Ht * W == S, "rope_positions mismatches sequence length"
    assert sum(rope_split) == Dh

    cos, sin = cos_sin
    cos = cos.astype(jnp.float32)
    sin = sin.astype(jnp.float32)
    cd = compute_dtype

    # RoPE relayout: permute the per-head q/k columns of wqkv (and the qk-norm weights)
    # into a "first halves | second halves" layout so neox rotate-half becomes a single
    # self-inverse lane roll of Dh/2 inside flash. q.kT is invariant under the common
    # permutation; v is untouched. (Weights could be pre-permuted offline once.)
    perm = jnp.asarray(_rope_perm(rope_split), jnp.int32)
    wqkv_r = params["wqkv"].reshape(dim, H, 3, Dh)
    wqkv = jnp.concatenate(
        [wqkv_r[:, :, 0:1, :][..., perm],
         wqkv_r[:, :, 1:2, :][..., perm],
         wqkv_r[:, :, 2:3, :]], axis=2).reshape(dim, 3 * dim).astype(cd)
    q_norm1 = params["q_norm1"][perm]
    k_norm1 = params["k_norm1"][perm]
    rope_cs = jnp.concatenate([cos, cos, -sin, sin], axis=-1)   # [S, 2*Dh] packed

    wo1 = params["wo1"].astype(cd)
    wq = params["wq"].astype(cd)
    wkv = params["wkv"].astype(cd)
    wo2 = params["wo2"].astype(cd)
    fc_in = params["fc_in"].astype(cd)
    fc_out = params["fc_out"].astype(cd)

    # adaLN modulation parameters (tiny [B, 6, dim] tensor; plain JAX)
    mod = (params["scale_shift_table"][None].astype(jnp.float32)
           + t_expand.reshape(B, 6, dim).astype(jnp.float32))
    shift_msa, scale_msa, gate_msa, shift_mlp, scale_mlp, gate_mlp = [
        mod[:, i:i + 1, :] for i in range(6)]

    # --- self-attention branch ----------------------------------------------
    if dim <= MM_TK_CAP:
        xqkv = matmul3d(q, wqkv, out_dtype=cd,
                        ln=(params["ln1_w"], params["ln1_b"],
                            scale_msa, shift_msa, norm_eps))    # LN fused in prologue
    else:
        x = layernorm_mod(q, params["ln1_w"], params["ln1_b"], scale_msa, shift_msa,
                          eps=norm_eps, out_dtype=cd)
        xqkv = matmul3d(x, wqkv, out_dtype=cd)
    attn = flash_attention(
        xqkv, xqkv, num_heads=H, head_dim=Dh,
        q_head=(3, 0), k_head=(3, 1), v_head=(3, 2),
        q_norm_w=q_norm1, k_norm_w=k_norm1, rope_cs=rope_cs, out_dtype=cd)
    q = matmul3d(attn, wo1, gate=gate_msa, resid=q, out_dtype=q.dtype)

    # --- cross-attention branch ----------------------------------------------
    xq = matmul3d(q, wq, out_dtype=cd)
    xkv = matmul3d(kv, wkv, out_dtype=cd)
    attn = flash_attention(
        xq, xkv, num_heads=H, head_dim=Dh,
        q_head=(1, 0), k_head=(2, 0), v_head=(2, 1),
        q_norm_w=params["q_norm2"], k_norm_w=params["k_norm2"],
        rope_cs=None, out_dtype=cd)
    q = matmul3d(attn, wo2, resid=q, out_dtype=q.dtype)

    # --- MLP branch (single fused kernel) -------------------------------------
    q = mlp_fused(q, params["ln2_w"], params["ln2_b"], scale_mlp, shift_mlp,
                  fc_in, fc_out, gate_mlp, eps=norm_eps, out_dtype=q.dtype)
    return q


# ----------------------------------------------------------------------------
# Pure-JAX f32 reference of the PyTorch module (for numerics self-check)
# ----------------------------------------------------------------------------

def reference_forward(params, q, kv, t_expand, *, cos_sin, rope_split, head_dim,
                      norm_eps=1e-5):
    B, S, dim = q.shape
    Dh = head_dim
    H = dim // Dh
    cos, sin = cos_sin

    mod = params["scale_shift_table"][None] + t_expand.reshape(B, 6, dim)
    shift_msa, scale_msa, gate_msa, shift_mlp, scale_mlp, gate_mlp = [
        mod[:, i] for i in range(6)]

    def layer_norm(x, w, b):
        mu = x.mean(-1, keepdims=True)
        var = ((x - mu) ** 2).mean(-1, keepdims=True)
        return (x - mu) / jnp.sqrt(var + norm_eps) * w + b

    def rms(x, w, eps=1e-6):
        return x * lax.rsqrt((x * x).mean(-1, keepdims=True) + eps) * w

    def rope(x, splits):  # x: [B, S, H, Dh]
        outs, off, coff = [], 0, 0
        for c in splits:
            xc = x[..., off:off + c]
            x1, x2 = xc[..., :c // 2], xc[..., c // 2:]
            ci = cos[:, coff:coff + c // 2][None, :, None, :]
            si = sin[:, coff:coff + c // 2][None, :, None, :]
            outs.append(jnp.concatenate([x1 * ci - x2 * si, x2 * ci + x1 * si], -1))
            off += c
            coff += c // 2
        return jnp.concatenate(outs, -1)

    def sdpa(qh, kh, vh):
        s = jnp.einsum('bqhd,bkhd->bhqk', qh, kh) / math.sqrt(Dh)
        p = jax.nn.softmax(s, axis=-1)
        o = jnp.einsum('bhqk,bkhd->bqhd', p, vh)
        return o.reshape(o.shape[0], o.shape[1], dim)

    # self-attention
    x = layer_norm(q, params["ln1_w"], params["ln1_b"]) * (1.0 + scale_msa[:, None]) \
        + shift_msa[:, None]
    xqkv = (x @ params["wqkv"]).reshape(B, S, H, 3 * Dh)
    qh, kh, vh = xqkv[..., :Dh], xqkv[..., Dh:2 * Dh], xqkv[..., 2 * Dh:]
    qh = rope(rms(qh, params["q_norm1"]), rope_split)
    kh = rope(rms(kh, params["k_norm1"]), rope_split)
    q = sdpa(qh, kh, vh) @ params["wo1"] * gate_msa[:, None] + q
    # cross-attention
    xq = (q @ params["wq"]).reshape(B, S, H, Dh)
    xkv = (kv @ params["wkv"]).reshape(B, kv.shape[1], H, 2 * Dh)
    kh, vh = xkv[..., :Dh], xkv[..., Dh:]
    xq = rms(xq, params["q_norm2"])
    kh = rms(kh, params["k_norm2"])
    q = sdpa(xq, kh, vh) @ params["wo2"] + q
    # MLP
    x = layer_norm(q, params["ln2_w"], params["ln2_b"]) * (1.0 + scale_mlp[:, None]) \
        + shift_mlp[:, None]
    h = _gelu_tanh(x @ params["fc_in"])
    q = (h @ params["fc_out"]) * gate_mlp[:, None] + q
    return q


# ----------------------------------------------------------------------------
# Deterministic parameter init (synthetic, shapes from the module's __init__)
# ----------------------------------------------------------------------------

def init_params(key, dim, head_dim):
    ks = jax.random.split(key, 9)

    def lin(k, fan_in, fan_out):
        return jax.random.normal(k, (fan_in, fan_out), jnp.float32) * 0.02

    return dict(
        scale_shift_table=jax.random.normal(ks[0], (6, dim), jnp.float32) / math.sqrt(dim),
        ln1_w=jnp.ones((dim,), jnp.float32),
        ln1_b=jnp.zeros((dim,), jnp.float32),
        ln2_w=jnp.ones((dim,), jnp.float32),
        ln2_b=jnp.zeros((dim,), jnp.float32),
        # SelfAttention
        wqkv=lin(ks[1], dim, 3 * dim),
        wo1=lin(ks[2], dim, dim),
        q_norm1=jnp.ones((head_dim,), jnp.float32),
        k_norm1=jnp.ones((head_dim,), jnp.float32),
        # CrossAttention
        wq=lin(ks[3], dim, dim),
        wkv=lin(ks[4], dim, 2 * dim),
        wo2=lin(ks[5], dim, dim),
        q_norm2=jnp.ones((head_dim,), jnp.float32),
        k_norm2=jnp.ones((head_dim,), jnp.float32),
        # MLP (ff_bias=False)
        fc_in=lin(ks[6], dim, 4 * dim),
        fc_out=lin(ks[7], 4 * dim, dim),
    )


# ----------------------------------------------------------------------------
# Main
# ----------------------------------------------------------------------------

if __name__ == "__main__":
    # head_dim must equal sum(rope_split) = 64+32+32 = 128 (SelfAttention default).
    dim = 256
    head_dim = 128
    rope_split = (64, 32, 32)
    B, S, L = 2, 16, 16
    rope_positions = (2, 2, 4)  # F * Ht * W == S

    key = jax.random.PRNGKey(0)
    kq, kkv, kt, kc, kp = jax.random.split(key, 5)
    q = jax.random.normal(kq, (B, S, dim), jnp.float32)
    kv = jax.random.normal(kkv, (B, L, dim), jnp.float32)
    t_expand = jax.random.normal(kt, (B, 6 * dim), jnp.float32)

    angles = jax.random.uniform(kc, (S, head_dim // 2), jnp.float32, 0.0, 2.0 * math.pi)
    cos, sin = jnp.cos(angles), jnp.sin(angles)

    params = init_params(kp, dim, head_dim)

    fwd = jax.jit(functools.partial(
        step_video_block_forward,
        rope_positions=rope_positions,
        rope_split=rope_split,
        head_dim=head_dim))

    out = jax.block_until_ready(fwd(params, q, kv, t_expand, cos_sin=(cos, sin)))
    assert out.shape == (B, S, dim), out.shape
    assert bool(jnp.all(jnp.isfinite(out)))

    ref = reference_forward(params, q, kv, t_expand, cos_sin=(cos, sin),
                            rope_split=rope_split, head_dim=head_dim)
    err = float(jnp.max(jnp.abs(out.astype(jnp.float32) - ref)))
    assert err < 6e-2, f"mismatch vs f32 reference: max abs err {err}"
    print("KERNEL_OK")
</pallas_src>

<mosaic_0001>
module attributes {stable_mosaic.version = 11 : i64} {
  func.func @_mm_kernel(%arg0: i32, %arg1: i32, %arg2: i32, %arg3: i32, %arg4: memref<1x16x256xf32, #tpu.memory_space<vmem>>, %arg5: memref<256x768xbf16, #tpu.memory_space<vmem>>, %arg6: memref<1x256xf32, #tpu.memory_space<vmem>>, %arg7: memref<1x256xf32, #tpu.memory_space<vmem>>, %arg8: memref<1x1x256xf32, #tpu.memory_space<vmem>>, %arg9: memref<1x1x256xf32, #tpu.memory_space<vmem>>, %arg10: memref<1x16x768xbf16, #tpu.memory_space<vmem>>, %arg11: memref<16x768xf32, #tpu.memory_space<vmem>>) attributes {dimension_semantics = [#tpu.dimension_semantics<parallel>, #tpu.dimension_semantics<parallel>, #tpu.dimension_semantics<parallel>, #tpu.dimension_semantics<arbitrary>], iteration_bounds = array<i64: 2, 1, 1, 1>, scalar_prefetch = 0 : i64, scratch_operands = 1 : i64, tpu.core_type = #tpu.core_type<tc>, window_params = [{transform_indices = @transform_0, window_bounds = array<i64: 1, 16, 256>}, {transform_indices = @transform_1, window_bounds = array<i64: 256, 768>}, {pipeline_mode = #tpu.pipeline_mode<synchronous>, transform_indices = @transform_2, window_bounds = array<i64: 1, 256>}, {pipeline_mode = #tpu.pipeline_mode<synchronous>, transform_indices = @transform_3, window_bounds = array<i64: 1, 256>}, {transform_indices = @transform_4, window_bounds = array<i64: 1, 1, 256>}, {transform_indices = @transform_5, window_bounds = array<i64: 1, 1, 256>}, {transform_indices = @transform_6, window_bounds = array<i64: 1, 16, 768>}]} {
    %c0_i32 = arith.constant 0 : i32
    %0 = arith.cmpi eq, %arg3, %c0_i32 : i32
    %1 = arith.extui %0 : i1 to i32
    %c0_i32_0 = arith.constant 0 : i32
    %2 = arith.cmpi ne, %1, %c0_i32_0 : i32
    scf.if %2 {
      %cst_27 = arith.constant 0.000000e+00 : f32
      %48 = vector.broadcast %cst_27 : f32 to vector<16x768xf32>
      %c0_28 = arith.constant 0 : index
      %c0_29 = arith.constant 0 : index
      %49 = vector.load %arg11[%c0_28, %c0_29] : memref<16x768xf32, #tpu.memory_space<vmem>>, vector<16x768xf32>
      tpu.vector_store %arg11[%c0_28, %c0_29], %48 {strides = array<i32>} : memref<16x768xf32, #tpu.memory_space<vmem>>, vector<16x768xf32>,
    } else {
    }
    %c0 = arith.constant 0 : index
    %c0_1 = arith.constant 0 : index
    %c0_2 = arith.constant 0 : index
    %3 = vector.load %arg4[%c0, %c0_1, %c0_2] : memref<1x16x256xf32, #tpu.memory_space<vmem>>, vector<1x16x256xf32>
    %4 = vector.shape_cast %3 : vector<1x16x256xf32> to vector<16x256xf32>
    %cst = arith.constant dense<0.000000e+00> : vector<16xf32>
    %5 = vector.multi_reduction <add>, %4, %cst [1] : vector<16x256xf32> to vector<16xf32>
    %6 = vector.shape_cast %5 : vector<16xf32> to vector<16x1xf32>
    %cst_3 = arith.constant 2.560000e+02 : f32
    %7 = vector.broadcast %cst_3 : f32 to vector<16x1xf32>
    %8 = arith.divf %6, %7 : vector<16x1xf32>
    %9 = arith.mulf %4, %4 : vector<16x256xf32>
    %cst_4 = arith.constant dense<0.000000e+00> : vector<16xf32>
    %10 = vector.multi_reduction <add>, %9, %cst_4 [1] : vector<16x256xf32> to vector<16xf32>
    %11 = vector.shape_cast %10 : vector<16xf32> to vector<16x1xf32>
    %cst_5 = arith.constant 2.560000e+02 : f32
    %12 = vector.broadcast %cst_5 : f32 to vector<16x1xf32>
    %13 = arith.divf %11, %12 : vector<16x1xf32>
    %14 = arith.mulf %8, %8 : vector<16x1xf32>
    %15 = arith.subf %13, %14 : vector<16x1xf32>
    %16 = vector.broadcast %8 : vector<16x1xf32> to vector<16x256xf32>
    %17 = arith.subf %4, %16 : vector<16x256xf32>
    %cst_6 = arith.constant 9.99999974E-6 : f32
    %18 = vector.broadcast %cst_6 : f32 to vector<16x1xf32>
    %19 = arith.addf %15, %18 : vector<16x1xf32>
    %20 = math.rsqrt %19 : vector<16x1xf32>
    %21 = vector.broadcast %20 : vector<16x1xf32> to vector<16x256xf32>
    %22 = arith.mulf %17, %21 : vector<16x256xf32>
    %c0_7 = arith.constant 0 : index
    %c0_8 = arith.constant 0 : index
    %23 = vector.load %arg6[%c0_7, %c0_8] : memref<1x256xf32, #tpu.memory_space<vmem>>, vector<1x256xf32>
    %24 = vector.broadcast %23 : vector<1x256xf32> to vector<16x256xf32>
    %25 = arith.mulf %22, %24 : vector<16x256xf32>
    %c0_9 = arith.constant 0 : index
    %c0_10 = arith.constant 0 : index
    %26 = vector.load %arg7[%c0_9, %c0_10] : memref<1x256xf32, #tpu.memory_space<vmem>>, vector<1x256xf32>
    %27 = vector.broadcast %26 : vector<1x256xf32> to vector<16x256xf32>
    %28 = arith.addf %25, %27 : vector<16x256xf32>
    %c0_11 = arith.constant 0 : index
    %c0_12 = arith.constant 0 : index
    %c0_13 = arith.constant 0 : index
    %29 = vector.load %arg8[%c0_11, %c0_12, %c0_13] : memref<1x1x256xf32, #tpu.memory_space<vmem>>, vector<1x1x256xf32>
    %30 = vector.shape_cast %29 : vector<1x1x256xf32> to vector<1x256xf32>
    %cst_14 = arith.constant 1.000000e+00 : f32
    %31 = vector.broadcast %cst_14 : f32 to vector<1x256xf32>
    %32 = arith.addf %31, %30 : vector<1x256xf32>
    %33 = vector.broadcast %32 : vector<1x256xf32> to vector<16x256xf32>
    %34 = arith.mulf %28, %33 : vector<16x256xf32>
    %c0_15 = arith.constant 0 : index
    %c0_16 = arith.constant 0 : index
    %c0_17 = arith.constant 0 : index
    %35 = vector.load %arg9[%c0_15, %c0_16, %c0_17] : memref<1x1x256xf32, #tpu.memory_space<vmem>>, vector<1x1x256xf32>
    %36 = vector.shape_cast %35 : vector<1x1x256xf32> to vector<1x256xf32>
    %37 = vector.broadcast %36 : vector<1x256xf32> to vector<16x256xf32>
    %38 = arith.addf %34, %37 : vector<16x256xf32>
    %c0_18 = arith.constant 0 : index
    %c0_19 = arith.constant 0 : index
    %39 = vector.load %arg11[%c0_18, %c0_19] : memref<16x768xf32, #tpu.memory_space<vmem>>, vector<16x768xf32>
    %40 = arith.truncf %38 : vector<16x256xf32> to vector<16x256xbf16>
    %c0_20 = arith.constant 0 : index
    %c0_21 = arith.constant 0 : index
    %41 = vector.load %arg5[%c0_20, %c0_21] : memref<256x768xbf16, #tpu.memory_space<vmem>>, vector<256x768xbf16>
    %cst_22 = arith.constant dense<0.000000e+00> : vector<16x768xf32>
    %42 = tpu.matmul %40, %41, %cst_22 {dimension_numbers = #tpu.dot_dimension_numbers<[1], [0], [0], [1], [0, 0, 1, 1], [], []>} : vector<16x256xbf16>, vector<256x768xbf16>, vector<16x768xf32> -> vector<16x768xf32>
    %43 = arith.addf %39, %42 : vector<16x768xf32>
    %c0_23 = arith.constant 0 : index
    %c0_24 = arith.constant 0 : index
    %44 = vector.load %arg11[%c0_23, %c0_24] : memref<16x768xf32, #tpu.memory_space<vmem>>, vector<16x768xf32>
    tpu.vector_store %arg11[%c0_23, %c0_24], %43 {strides = array<i32>} : memref<16x768xf32, #tpu.memory_space<vmem>>, vector<16x768xf32>,
    %c0_i32_25 = arith.constant 0 : i32
    %45 = arith.cmpi eq, %arg3, %c0_i32_25 : i32
    %46 = arith.extui %45 : i1 to i32
    %c0_i32_26 = arith.constant 0 : i32
    %47 = arith.cmpi ne, %46, %c0_i32_26 : i32
    scf.if %47 {
      %c0_27 = arith.constant 0 : index
      %c0_28 = arith.constant 0 : index
      %48 = vector.load %arg11[%c0_27, %c0_28] : memref<16x768xf32, #tpu.memory_space<vmem>>, vector<16x768xf32>
      %49 = arith.truncf %48 : vector<16x768xf32> to vector<16x768xbf16>
      %c0_29 = arith.constant 0 : index
      %c0_30 = arith.constant 0 : index
      %c0_31 = arith.constant 0 : index
      %50 = vector.load %arg10[%c0_29, %c0_30, %c0_31] : memref<1x16x768xbf16, #tpu.memory_space<vmem>>, vector<1x16x768xbf16>
      %51 = vector.shape_cast %50 : vector<1x16x768xbf16> to vector<16x768xbf16>
      %52 = vector.shape_cast %49 : vector<16x768xbf16> to vector<1x16x768xbf16>
      tpu.vector_store %arg10[%c0_29, %c0_30, %c0_31], %52 {strides = array<i32>} : memref<1x16x768xbf16, #tpu.memory_space<vmem>>, vector<1x16x768xbf16>,
    } else {
    }
    return
  }
  func.func @transform_0(%arg0: i32, %arg1: i32, %arg2: i32, %arg3: i32) -> (i32, i32, i32) {
    %c0_i32 = arith.constant 0 : i32
    return %arg0, %arg1, %arg3 : i32, i32, i32
  }
  func.func @transform_1(%arg0: i32, %arg1: i32, %arg2: i32, %arg3: i32) -> (i32, i32) {
    %c0_i32 = arith.constant 0 : i32
    return %arg3, %arg2 : i32, i32
  }
  func.func @transform_2(%arg0: i32, %arg1: i32, %arg2: i32, %arg3: i32) -> (i32, i32) {
    %c0_i32 = arith.constant 0 : i32
    %c0_i32_0 = arith.constant 0 : i32
    %c0_i32_1 = arith.constant 0 : i32
    return %c0_i32, %c0_i32_0 : i32, i32
  }
  func.func @transform_3(%arg0: i32, %arg1: i32, %arg2: i32, %arg3: i32) -> (i32, i32) {
    %c0_i32 = arith.constant 0 : i32
    %c0_i32_0 = arith.constant 0 : i32
    %c0_i32_1 = arith.constant 0 : i32
    return %c0_i32, %c0_i32_0 : i32, i32
  }
  func.func @transform_4(%arg0: i32, %arg1: i32, %arg2: i32, %arg3: i32) -> (i32, i32, i32) {
    %c0_i32 = arith.constant 0 : i32
    %c0_i32_0 = arith.constant 0 : i32
    %c0_i32_1 = arith.constant 0 : i32
    return %arg0, %c0_i32, %c0_i32_0 : i32, i32, i32
  }
  func.func @transform_5(%arg0: i32, %arg1: i32, %arg2: i32, %arg3: i32) -> (i32, i32, i32) {
    %c0_i32 = arith.constant 0 : i32
    %c0_i32_0 = arith.constant 0 : i32
    %c0_i32_1 = arith.constant 0 : i32
    return %arg0, %c0_i32, %c0_i32_0 : i32, i32, i32
  }
  func.func @transform_6(%arg0: i32, %arg1: i32, %arg2: i32, %arg3: i32) -> (i32, i32, i32) {
    %c0_i32 = arith.constant 0 : i32
    return %arg0, %arg1, %arg2 : i32, i32, i32
  }
}

module attributes {stable_mosaic.version = 11 : i64} {
  func.func @_flash_kernel(%arg0: i32, %arg1: i32, %arg2: i32, %arg3: i32, %arg4: memref<1x16x128xbf16, #tpu.memory_space<vmem>>, %arg5: memref<1x16x128xbf16, #tpu.memory_space<vmem>>, %arg6: memref<1x16x128xbf16, #tpu.memory_space<vmem>>, %arg7: memref<1x128xf32, #tpu.memory_space<vmem>>, %arg8: memref<1x128xf32, #tpu.memory_space<vmem>>, %arg9: memref<16x256xf32, #tpu.memory_space<vmem>>, %arg10: memref<16x256xf32, #tpu.memory_space<vmem>>, %arg11: memref<1x16x128xbf16, #tpu.memory_space<vmem>>, %arg12: memref<16x1xf32, #tpu.memory_space<vmem>>, %arg13: memref<16x1xf32, #tpu.memory_space<vmem>>, %arg14: memref<16x128xf32, #tpu.memory_space<vmem>>, %arg15: memref<16x128xbf16, #tpu.memory_space<vmem>>) attributes {dimension_semantics = [#tpu.dimension_semantics<parallel>, #tpu.dimension_semantics<parallel>, #tpu.dimension_semantics<parallel>, #tpu.dimension_semantics<arbitrary>], iteration_bounds = array<i64: 2, 2, 1, 1>, scalar_prefetch = 0 : i64, scratch_operands = 4 : i64, tpu.core_type = #tpu.core_type<tc>, window_params = [{transform_indices = @transform_0, window_bounds = array<i64: 1, 16, 128>}, {transform_indices = @transform_1, window_bounds = array<i64: 1, 16, 128>}, {transform_indices = @transform_2, window_bounds = array<i64: 1, 16, 128>}, {pipeline_mode = #tpu.pipeline_mode<synchronous>, transform_indices = @transform_3, window_bounds = array<i64: 1, 128>}, {pipeline_mode = #tpu.pipeline_mode<synchronous>, transform_indices = @transform_4, window_bounds = array<i64: 1, 128>}, {transform_indices = @transform_5, window_bounds = array<i64: 16, 256>}, {transform_indices = @transform_6, window_bounds = array<i64: 16, 256>}, {transform_indices = @transform_7, window_bounds = array<i64: 1, 16, 128>}]} {
    %c0_i32 = arith.constant 0 : i32
    %0 = arith.cmpi eq, %arg3, %c0_i32 : i32
    %1 = arith.extui %0 : i1 to i32
    %c0_i32_0 = arith.constant 0 : i32
    %2 = arith.cmpi ne, %1, %c0_i32_0 : i32
    scf.if %2 {
      %cst_33 = arith.constant 0xFF800000 : f32
      %56 = vector.broadcast %cst_33 : f32 to vector<16x1xf32>
      %c0_34 = arith.constant 0 : index
      %c0_35 = arith.constant 0 : index
      %57 = vector.load %arg12[%c0_34, %c0_35] : memref<16x1xf32, #tpu.memory_space<vmem>>, vector<16x1xf32>
      tpu.vector_store %arg12[%c0_34, %c0_35], %56 {strides = array<i32>} : memref<16x1xf32, #tpu.memory_space<vmem>>, vector<16x1xf32>,
      %cst_36 = arith.constant 0.000000e+00 : f32
      %58 = vector.broadcast %cst_36 : f32 to vector<16x1xf32>
      %c0_37 = arith.constant 0 : index
      %c0_38 = arith.constant 0 : index
      %59 = vector.load %arg13[%c0_37, %c0_38] : memref<16x1xf32, #tpu.memory_space<vmem>>, vector<16x1xf32>
      tpu.vector_store %arg13[%c0_37, %c0_38], %58 {strides = array<i32>} : memref<16x1xf32, #tpu.memory_space<vmem>>, vector<16x1xf32>,
      %cst_39 = arith.constant 0.000000e+00 : f32
      %60 = vector.broadcast %cst_39 : f32 to vector<16x128xf32>
      %c0_40 = arith.constant 0 : index
      %c0_41 = arith.constant 0 : index
      %61 = vector.load %arg14[%c0_40, %c0_41] : memref<16x128xf32, #tpu.memory_space<vmem>>, vector<16x128xf32>
      tpu.vector_store %arg14[%c0_40, %c0_41], %60 {strides = array<i32>} : memref<16x128xf32, #tpu.memory_space<vmem>>, vector<16x128xf32>,
      %c0_42 = arith.constant 0 : index
      %c0_43 = arith.constant 0 : index
      %c0_44 = arith.constant 0 : index
      %62 = vector.load %arg4[%c0_42, %c0_43, %c0_44] : memref<1x16x128xbf16, #tpu.memory_space<vmem>>, vector<1x16x128xbf16>
      %63 = vector.shape_cast %62 : vector<1x16x128xbf16> to vector<16x128xbf16>
      %64 = arith.extf %63 : vector<16x128xbf16> to vector<16x128xf32>
      %65 = arith.mulf %64, %64 : vector<16x128xf32>
      %cst_45 = arith.constant dense<0.000000e+00> : vector<16xf32>
      %66 = vector.multi_reduction <add>, %65, %cst_45 [1] : vector<16x128xf32> to vector<16xf32>
      %67 = vector.shape_cast %66 : vector<16xf32> to vector<16x1xf32>
      %cst_46 = arith.constant 1.280000e+02 : f32
      %68 = vector.broadcast %cst_46 : f32 to vector<16x1xf32>
      %69 = arith.divf %67, %68 : vector<16x1xf32>
      %cst_47 = arith.constant 9.99999997E-7 : f32
      %70 = vector.broadcast %cst_47 : f32 to vector<16x1xf32>
      %71 = arith.addf %69, %70 : vector<16x1xf32>
      %72 = math.rsqrt %71 : vector<16x1xf32>
      %73 = vector.broadcast %72 : vector<16x1xf32> to vector<16x128xf32>
      %74 = arith.mulf %64, %73 : vector<16x128xf32>
      %c0_48 = arith.constant 0 : index
      %c0_49 = arith.constant 0 : index
      %75 = vector.load %arg7[%c0_48, %c0_49] : memref<1x128xf32, #tpu.memory_space<vmem>>, vector<1x128xf32>
      %76 = vector.broadcast %75 : vector<1x128xf32> to vector<16x128xf32>
      %77 = arith.mulf %74, %76 : vector<16x128xf32>
      %c0_50 = arith.constant 0 : index
      %c0_51 = arith.constant 0 : index
      %78 = vector.load %arg9[%c0_50, %c0_51] : memref<16x256xf32, #tpu.memory_space<vmem>>, vector<16x128xf32>
      %c0_52 = arith.constant 0 : index
      %c128_53 = arith.constant 128 : index
      %79 = vector.load %arg9[%c0_52, %c128_53] : memref<16x256xf32, #tpu.memory_space<vmem>>, vector<16x128xf32>
      %80 = arith.mulf %77, %78 : vector<16x128xf32>
      %c64_i32_54 = arith.constant 64 : i32
      %81 = tpu.dynamic_rotate %77 by %c64_i32_54 dim 1 : vector<16x128xf32>, i32 -> vector<16x128xf32>
      %82 = arith.mulf %81, %79 : vector<16x128xf32>
      %83 = arith.addf %80, %82 : vector<16x128xf32>
      %cst_55 = arith.constant 0.0883883461 : f32
      %84 = vector.broadcast %cst_55 : f32 to vector<16x128xf32>
      %85 = arith.mulf %83, %84 : vector<16x128xf32>
      %86 = arith.truncf %85 : vector<16x128xf32> to vector<16x128xbf16>
      %c0_56 = arith.constant 0 : index
      %c0_57 = arith.constant 0 : index
      %87 = vector.load %arg15[%c0_56, %c0_57] : memref<16x128xbf16, #tpu.memory_space<vmem>>, vector<16x128xbf16>
      tpu.vector_store %arg15[%c0_56, %c0_57], %86 {strides = array<i32>} : memref<16x128xbf16, #tpu.memory_space<vmem>>, vector<16x128xbf16>,
    } else {
    }
    %c0 = arith.constant 0 : index
    %c0_1 = arith.constant 0 : index
    %c0_2 = arith.constant 0 : index
    %3 = vector.load %arg5[%c0, %c0_1, %c0_2] : memref<1x16x128xbf16, #tpu.memory_space<vmem>>, vector<1x16x128xbf16>
    %4 = vector.shape_cast %3 : vector<1x16x128xbf16> to vector<16x128xbf16>
    %5 = arith.extf %4 : vector<16x128xbf16> to vector<16x128xf32>
    %6 = arith.mulf %5, %5 : vector<16x128xf32>
    %cst = arith.constant dense<0.000000e+00> : vector<16xf32>
    %7 = vector.multi_reduction <add>, %6, %cst [1] : vector<16x128xf32> to vector<16xf32>
    %8 = vector.shape_cast %7 : vector<16xf32> to vector<16x1xf32>
    %cst_3 = arith.constant 1.280000e+02 : f32
    %9 = vector.broadcast %cst_3 : f32 to vector<16x1xf32>
    %10 = arith.divf %8, %9 : vector<16x1xf32>
    %cst_4 = arith.constant 9.99999997E-7 : f32
    %11 = vector.broadcast %cst_4 : f32 to vector<16x1xf32>
    %12 = arith.addf %10, %11 : vector<16x1xf32>
    %13 = math.rsqrt %12 : vector<16x1xf32>
    %14 = vector.broadcast %13 : vector<16x1xf32> to vector<16x128xf32>
    %15 = arith.mulf %5, %14 : vector<16x128xf32>
    %c0_5 = arith.constant 0 : index
    %c0_6 = arith.constant 0 : index
    %16 = vector.load %arg8[%c0_5, %c0_6] : memref<1x128xf32, #tpu.memory_space<vmem>>, vector<1x128xf32>
    %17 = vector.broadcast %16 : vector<1x128xf32> to vector<16x128xf32>
    %18 = arith.mulf %15, %17 : vector<16x128xf32>
    %c0_7 = arith.constant 0 : index
    %c0_8 = arith.constant 0 : index
    %19 = vector.load %arg10[%c0_7, %c0_8] : memref<16x256xf32, #tpu.memory_space<vmem>>, vector<16x128xf32>
    %c0_9 = arith.constant 0 : index
    %c128 = arith.constant 128 : index
    %20 = vector.load %arg10[%c0_9, %c128] : memref<16x256xf32, #tpu.memory_space<vmem>>, vector<16x128xf32>
    %21 = arith.mulf %18, %19 : vector<16x128xf32>
    %c64_i32 = arith.constant 64 : i32
    %22 = tpu.dynamic_rotate %18 by %c64_i32 dim 1 : vector<16x128xf32>, i32 -> vector<16x128xf32>
    %23 = arith.mulf %22, %20 : vector<16x128xf32>
    %24 = arith.addf %21, %23 : vector<16x128xf32>
    %c0_10 = arith.constant 0 : index
    %c0_11 = arith.constant 0 : index
    %25 = vector.load %arg15[%c0_10, %c0_11] : memref<16x128xbf16, #tpu.memory_space<vmem>>, vector<16x128xbf16>
    %26 = arith.truncf %24 : vector<16x128xf32> to vector<16x128xbf16>
    %cst_12 = arith.constant dense<0.000000e+00> : vector<16x16xf32>
    %27 = tpu.matmul %25, %26, %cst_12 {dimension_numbers = #tpu.dot_dimension_numbers<[1], [1], [0], [0], [0, 0, 1, 0], [], []>} : vector<16x128xbf16>, vector<16x128xbf16>, vector<16x16xf32> -> vector<16x16xf32>
    %c0_13 = arith.constant 0 : index
    %c0_14 = arith.constant 0 : index
    %28 = vector.load %arg12[%c0_13, %c0_14] : memref<16x1xf32, #tpu.memory_space<vmem>>, vector<16x1xf32>
    %cst_15 = arith.constant dense<0xFF800000> : vector<16xf32>
    %29 = vector.multi_reduction <maximumf>, %27, %cst_15 [1] : vector<16x16xf32> to vector<16xf32>
    %30 = vector.shape_cast %29 : vector<16xf32> to vector<16x1xf32>
    %31 = arith.maximumf %28, %30 : vector<16x1xf32>
    %32 = arith.subf %28, %31 : vector<16x1xf32>
    %33 = math.exp %32 : vector<16x1xf32>
    %34 = vector.broadcast %31 : vector<16x1xf32> to vector<16x16xf32>
    %35 = arith.subf %27, %34 : vector<16x16xf32>
    %36 = math.exp %35 : vector<16x16xf32>
    %c0_16 = arith.constant 0 : index
    %c0_17 = arith.constant 0 : index
    %37 = vector.load %arg13[%c0_16, %c0_17] : memref<16x1xf32, #tpu.memory_space<vmem>>, vector<16x1xf32>
    %38 = arith.mulf %33, %37 : vector<16x1xf32>
    %cst_18 = arith.constant dense<0.000000e+00> : vector<16xf32>
    %39 = vector.multi_reduction <add>, %36, %cst_18 [1] : vector<16x16xf32> to vector<16xf32>
    %40 = vector.shape_cast %39 : vector<16xf32> to vector<16x1xf32>
    %41 = arith.addf %38, %40 : vector<16x1xf32>
    %c0_19 = arith.constant 0 : index
    %c0_20 = arith.constant 0 : index
    %42 = vector.load %arg13[%c0_19, %c0_20] : memref<16x1xf32, #tpu.memory_space<vmem>>, vector<16x1xf32>
    tpu.vector_store %arg13[%c0_19, %c0_20], %41 {strides = array<i32>} : memref<16x1xf32, #tpu.memory_space<vmem>>, vector<16x1xf32>,
    %c0_21 = arith.constant 0 : index
    %c0_22 = arith.constant 0 : index
    %43 = vector.load %arg14[%c0_21, %c0_22] : memref<16x128xf32, #tpu.memory_space<vmem>>, vector<16x128xf32>
    %44 = vector.broadcast %33 : vector<16x1xf32> to vector<16x128xf32>
    %45 = arith.mulf %44, %43 : vector<16x128xf32>
    %46 = arith.truncf %36 : vector<16x16xf32> to vector<16x16xbf16>
    %c0_23 = arith.constant 0 : index
    %c0_24 = arith.constant 0 : index
    %c0_25 = arith.constant 0 : index
    %47 = vector.load %arg6[%c0_23, %c0_24, %c0_25] : memref<1x16x128xbf16, #tpu.memory_space<vmem>>, vector<1x16x128xbf16>
    %48 = vector.shape_cast %47 : vector<1x16x128xbf16> to vector<16x128xbf16>
    %cst_26 = arith.constant dense<0.000000e+00> : vector<16x128xf32>
    %49 = tpu.matmul %46, %48, %cst_26 {dimension_numbers = #tpu.dot_dimension_numbers<[1], [0], [0], [1], [0, 0, 1, 1], [], []>} : vector<16x16xbf16>, vector<16x128xbf16>, vector<16x128xf32> -> vector<16x128xf32>
    %50 = arith.addf %45, %49 : vector<16x128xf32>
    %c0_27 = arith.constant 0 : index
    %c0_28 = arith.constant 0 : index
    %51 = vector.load %arg14[%c0_27, %c0_28] : memref<16x128xf32, #tpu.memory_space<vmem>>, vector<16x128xf32>
    tpu.vector_store %arg14[%c0_27, %c0_28], %50 {strides = array<i32>} : memref<16x128xf32, #tpu.memory_space<vmem>>, vector<16x128xf32>,
    %c0_29 = arith.constant 0 : index
    %c0_30 = arith.constant 0 : index
    %52 = vector.load %arg12[%c0_29, %c0_30] : memref<16x1xf32, #tpu.memory_space<vmem>>, vector<16x1xf32>
    tpu.vector_store %arg12[%c0_29, %c0_30], %31 {strides = array<i32>} : memref<16x1xf32, #tpu.memory_space<vmem>>, vector<16x1xf32>,
    %c0_i32_31 = arith.constant 0 : i32
    %53 = arith.cmpi eq, %arg3, %c0_i32_31 : i32
    %54 = arith.extui %53 : i1 to i32
    %c0_i32_32 = arith.constant 0 : i32
    %55 = arith.cmpi ne, %54, %c0_i32_32 : i32
    scf.if %55 {
      %c0_33 = arith.constant 0 : index
      %c0_34 = arith.constant 0 : index
      %56 = vector.load %arg14[%c0_33, %c0_34] : memref<16x128xf32, #tpu.memory_space<vmem>>, vector<16x128xf32>
      %c0_35 = arith.constant 0 : index
      %c0_36 = arith.constant 0 : index
      %57 = vector.load %arg13[%c0_35, %c0_36] : memref<16x1xf32, #tpu.memory_space<vmem>>, vector<16x1xf32>
      %58 = vector.broadcast %57 : vector<16x1xf32> to vector<16x128xf32>
      %59 = arith.divf %56, %58 : vector<16x128xf32>
      %60 = arith.truncf %59 : vector<16x128xf32> to vector<16x128xbf16>
      %c0_37 = arith.constant 0 : index
      %c0_38 = arith.constant 0 : index
      %c0_39 = arith.constant 0 : index
      %61 = vector.load %arg11[%c0_37, %c0_38, %c0_39] : memref<1x16x128xbf16, #tpu.memory_space<vmem>>, vector<1x16x128xbf16>
      %62 = vector.shape_cast %61 : vector<1x16x128xbf16> to vector<16x128xbf16>
      %63 = vector.shape_cast %60 : vector<16x128xbf16> to vector<1x16x128xbf16>
      tpu.vector_store %arg11[%c0_37, %c0_38, %c0_39], %63 {strides = array<i32>} : memref<1x16x128xbf16, #tpu.memory_space<vmem>>, vector<1x16x128xbf16>,
    } else {
    }
    return
  }
  func.func @transform_0(%arg0: i32, %arg1: i32, %arg2: i32, %arg3: i32) -> (i32, i32, i32) {
    %c3_i32 = arith.constant 3 : i32
    %0 = arith.muli %c3_i32, %arg1 : i32
    %c0_i32 = arith.constant 0 : i32
    %1 = arith.addi %0, %c0_i32 : i32
    %c0_i32_0 = arith.constant 0 : i32
    return %arg0, %arg2, %1 : i32, i32, i32
  }
  func.func @transform_1(%arg0: i32, %arg1: i32, %arg2: i32, %arg3: i32) -> (i32, i32, i32) {
    %c3_i32 = arith.constant 3 : i32
    %0 = arith.muli %c3_i32, %arg1 : i32
    %c1_i32 = arith.constant 1 : i32
    %1 = arith.addi %0, %c1_i32 : i32
    %c0_i32 = arith.constant 0 : i32
    return %arg0, %arg3, %1 : i32, i32, i32
  }
  func.func @transform_2(%arg0: i32, %arg1: i32, %arg2: i32, %arg3: i32) -> (i32, i32, i32) {
    %c3_i32 = arith.constant 3 : i32
    %0 = arith.muli %c3_i32, %arg1 : i32
    %c2_i32 = arith.constant 2 : i32
    %1 = arith.addi %0, %c2_i32 : i32
    %c0_i32 = arith.constant 0 : i32
    return %arg0, %arg3, %1 : i32, i32, i32
  }
  func.func @transform_3(%arg0: i32, %arg1: i32, %arg2: i32, %arg3: i32) -> (i32, i32) {
    %c0_i32 = arith.constant 0 : i32
    %c0_i32_0 = arith.constant 0 : i32
    %c0_i32_1 = arith.constant 0 : i32
    return %c0_i32, %c0_i32_0 : i32, i32
  }
  func.func @transform_4(%arg0: i32, %arg1: i32, %arg2: i32, %arg3: i32) -> (i32, i32) {
    %c0_i32 = arith.constant 0 : i32
    %c0_i32_0 = arith.constant 0 : i32
    %c0_i32_1 = arith.constant 0 : i32
    return %c0_i32, %c0_i32_0 : i32, i32
  }
  func.func @transform_5(%arg0: i32, %arg1: i32, %arg2: i32, %arg3: i32) -> (i32, i32) {
    %c0_i32 = arith.constant 0 : i32
    %c0_i32_0 = arith.constant 0 : i32
    return %arg2, %c0_i32 : i32, i32
  }
  func.func @transform_6(%arg0: i32, %arg1: i32, %arg2: i32, %arg3: i32) -> (i32, i32) {
    %c0_i32 = arith.constant 0 : i32
    %c0_i32_0 = arith.constant 0 : i32
    return %arg3, %c0_i32 : i32, i32
  }
  func.func @transform_7(%arg0: i32, %arg1: i32, %arg2: i32, %arg3: i32) -> (i32, i32, i32) {
    %c0_i32 = arith.constant 0 : i32
    return %arg0, %arg2, %arg1 : i32, i32, i32
  }
}

module attributes {stable_mosaic.version = 11 : i64} {
  func.func @_mm_kernel(%arg0: i32, %arg1: i32, %arg2: i32, %arg3: i32, %arg4: memref<1x16x256xbf16, #tpu.memory_space<vmem>>, %arg5: memref<256x256xbf16, #tpu.memory_space<vmem>>, %arg6: memref<1x1x256xf32, #tpu.memory_space<vmem>>, %arg7: memref<1x16x256xf32, #tpu.memory_space<vmem>>, %arg8: memref<1x16x256xf32, #tpu.memory_space<vmem>>, %arg9: memref<16x256xf32, #tpu.memory_space<vmem>>) attributes {dimension_semantics = [#tpu.dimension_semantics<parallel>, #tpu.dimension_semantics<parallel>, #tpu.dimension_semantics<parallel>, #tpu.dimension_semantics<arbitrary>], iteration_bounds = array<i64: 2, 1, 1, 1>, scalar_prefetch = 0 : i64, scratch_operands = 1 : i64, tpu.core_type = #tpu.core_type<tc>, window_params = [{transform_indices = @transform_0, window_bounds = array<i64: 1, 16, 256>}, {transform_indices = @transform_1, window_bounds = array<i64: 256, 256>}, {transform_indices = @transform_2, window_bounds = array<i64: 1, 1, 256>}, {transform_indices = @transform_3, window_bounds = array<i64: 1, 16, 256>}, {transform_indices = @transform_4, window_bounds = array<i64: 1, 16, 256>}]} {
    %c0_i32 = arith.constant 0 : i32
    %0 = arith.cmpi eq, %arg3, %c0_i32 : i32
    %1 = arith.extui %0 : i1 to i32
    %c0_i32_0 = arith.constant 0 : i32
    %2 = arith.cmpi ne, %1, %c0_i32_0 : i32
    scf.if %2 {
      %cst_11 = arith.constant 0.000000e+00 : f32
      %13 = vector.broadcast %cst_11 : f32 to vector<16x256xf32>
      %c0_12 = arith.constant 0 : index
      %c0_13 = arith.constant 0 : index
      %14 = vector.load %arg9[%c0_12, %c0_13] : memref<16x256xf32, #tpu.memory_space<vmem>>, vector<16x256xf32>
      tpu.vector_store %arg9[%c0_12, %c0_13], %13 {strides = array<i32>} : memref<16x256xf32, #tpu.memory_space<vmem>>, vector<16x256xf32>,
    } else {
    }
    %c0 = arith.constant 0 : index
    %c0_1 = arith.constant 0 : index
    %c0_2 = arith.constant 0 : index
    %3 = vector.load %arg4[%c0, %c0_1, %c0_2] : memref<1x16x256xbf16, #tpu.memory_space<vmem>>, vector<1x16x256xbf16>
    %4 = vector.shape_cast %3 : vector<1x16x256xbf16> to vector<16x256xbf16>
    %c0_3 = arith.constant 0 : index
    %c0_4 = arith.constant 0 : index
    %5 = vector.load %arg9[%c0_3, %c0_4] : memref<16x256xf32, #tpu.memory_space<vmem>>, vector<16x256xf32>
    %c0_5 = arith.constant 0 : index
    %c0_6 = arith.constant 0 : index
    %6 = vector.load %arg5[%c0_5, %c0_6] : memref<256x256xbf16, #tpu.memory_space<vmem>>, vector<256x256xbf16>
    %cst = arith.constant dense<0.000000e+00> : vector<16x256xf32>
    %7 = tpu.matmul %4, %6, %cst {dimension_numbers = #tpu.dot_dimension_numbers<[1], [0], [0], [1], [0, 0, 1, 1], [], []>} : vector<16x256xbf16>, vector<256x256xbf16>, vector<16x256xf32> -> vector<16x256xf32>
    %8 = arith.addf %5, %7 : vector<16x256xf32>
    %c0_7 = arith.constant 0 : index
    %c0_8 = arith.constant 0 : index
    %9 = vector.load %arg9[%c0_7, %c0_8] : memref<16x256xf32, #tpu.memory_space<vmem>>, vector<16x256xf32>
    tpu.vector_store %arg9[%c0_7, %c0_8], %8 {strides = array<i32>} : memref<16x256xf32, #tpu.memory_space<vmem>>, vector<16x256xf32>,
    %c0_i32_9 = arith.constant 0 : i32
    %10 = arith.cmpi eq, %arg3, %c0_i32_9 : i32
    %11 = arith.extui %10 : i1 to i32
    %c0_i32_10 = arith.constant 0 : i32
    %12 = arith.cmpi ne, %11, %c0_i32_10 : i32
    scf.if %12 {
      %c0_11 = arith.constant 0 : index
      %c0_12 = arith.constant 0 : index
      %13 = vector.load %arg9[%c0_11, %c0_12] : memref<16x256xf32, #tpu.memory_space<vmem>>, vector<16x256xf32>
      %c0_13 = arith.constant 0 : index
      %c0_14 = arith.constant 0 : index
      %c0_15 = arith.constant 0 : index
      %14 = vector.load %arg6[%c0_13, %c0_14, %c0_15] : memref<1x1x256xf32, #tpu.memory_space<vmem>>, vector<1x1x256xf32>
      %15 = vector.shape_cast %14 : vector<1x1x256xf32> to vector<1x256xf32>
      %16 = vector.broadcast %15 : vector<1x256xf32> to vector<16x256xf32>
      %17 = arith.mulf %13, %16 : vector<16x256xf32>
      %c0_16 = arith.constant 0 : index
      %c0_17 = arith.constant 0 : index
      %c0_18 = arith.constant 0 : index
      %18 = vector.load %arg7[%c0_16, %c0_17, %c0_18] : memref<1x16x256xf32, #tpu.memory_space<vmem>>, vector<1x16x256xf32>
      %19 = vector.shape_cast %18 : vector<1x16x256xf32> to vector<16x256xf32>
      %20 = arith.addf %17, %19 : vector<16x256xf32>
      %c0_19 = arith.constant 0 : index
      %c0_20 = arith.constant 0 : index
      %c0_21 = arith.constant 0 : index
      %21 = vector.load %arg8[%c0_19, %c0_20, %c0_21] : memref<1x16x256xf32, #tpu.memory_space<vmem>>, vector<1x16x256xf32>
      %22 = vector.shape_cast %21 : vector<1x16x256xf32> to vector<16x256xf32>
      %23 = vector.shape_cast %20 : vector<16x256xf32> to vector<1x16x256xf32>
      tpu.vector_store %arg8[%c0_19, %c0_20, %c0_21], %23 {strides = array<i32>} : memref<1x16x256xf32, #tpu.memory_space<vmem>>, vector<1x16x256xf32>,
    } else {
    }
    return
  }
  func.func @transform_0(%arg0: i32, %arg1: i32, %arg2: i32, %arg3: i32) -> (i32, i32, i32) {
    %c0_i32 = arith.constant 0 : i32
    return %arg0, %arg1, %arg3 : i32, i32, i32
  }
  func.func @transform_1(%arg0: i32, %arg1: i32, %arg2: i32, %arg3: i32) -> (i32, i32) {
    %c0_i32 = arith.constant 0 : i32
    return %arg3, %arg2 : i32, i32
  }
  func.func @transform_2(%arg0: i32, %arg1: i32, %arg2: i32, %arg3: i32) -> (i32, i32, i32) {
    %c0_i32 = arith.constant 0 : i32
    %c0_i32_0 = arith.constant 0 : i32
    return %arg0, %c0_i32, %arg2 : i32, i32, i32
  }
  func.func @transform_3(%arg0: i32, %arg1: i32, %arg2: i32, %arg3: i32) -> (i32, i32, i32) {
    %c0_i32 = arith.constant 0 : i32
    return %arg0, %arg1, %arg2 : i32, i32, i32
  }
  func.func @transform_4(%arg0: i32, %arg1: i32, %arg2: i32, %arg3: i32) -> (i32, i32, i32) {
    %c0_i32 = arith.constant 0 : i32
    return %arg0, %arg1, %arg2 : i32, i32, i32
  }
}

module attributes {stable_mosaic.version = 11 : i64} {
  func.func @_mm_kernel(%arg0: i32, %arg1: i32, %arg2: i32, %arg3: i32, %arg4: memref<1x16x256xf32, #tpu.memory_space<vmem>>, %arg5: memref<256x256xbf16, #tpu.memory_space<vmem>>, %arg6: memref<1x16x256xbf16, #tpu.memory_space<vmem>>, %arg7: memref<16x256xf32, #tpu.memory_space<vmem>>) attributes {dimension_semantics = [#tpu.dimension_semantics<parallel>, #tpu.dimension_semantics<parallel>, #tpu.dimension_semantics<parallel>, #tpu.dimension_semantics<arbitrary>], iteration_bounds = array<i64: 2, 1, 1, 1>, scalar_prefetch = 0 : i64, scratch_operands = 1 : i64, tpu.core_type = #tpu.core_type<tc>, window_params = [{transform_indices = @transform_0, window_bounds = array<i64: 1, 16, 256>}, {transform_indices = @transform_1, window_bounds = array<i64: 256, 256>}, {transform_indices = @transform_2, window_bounds = array<i64: 1, 16, 256>}]} {
    %c0_i32 = arith.constant 0 : i32
    %0 = arith.cmpi eq, %arg3, %c0_i32 : i32
    %1 = arith.extui %0 : i1 to i32
    %c0_i32_0 = arith.constant 0 : i32
    %2 = arith.cmpi ne, %1, %c0_i32_0 : i32
    scf.if %2 {
      %cst_11 = arith.constant 0.000000e+00 : f32
      %14 = vector.broadcast %cst_11 : f32 to vector<16x256xf32>
      %c0_12 = arith.constant 0 : index
      %c0_13 = arith.constant 0 : index
      %15 = vector.load %arg7[%c0_12, %c0_13] : memref<16x256xf32, #tpu.memory_space<vmem>>, vector<16x256xf32>
      tpu.vector_store %arg7[%c0_12, %c0_13], %14 {strides = array<i32>} : memref<16x256xf32, #tpu.memory_space<vmem>>, vector<16x256xf32>,
    } else {
    }
    %c0 = arith.constant 0 : index
    %c0_1 = arith.constant 0 : index
    %c0_2 = arith.constant 0 : index
    %3 = vector.load %arg4[%c0, %c0_1, %c0_2] : memref<1x16x256xf32, #tpu.memory_space<vmem>>, vector<1x16x256xf32>
    %4 = vector.shape_cast %3 : vector<1x16x256xf32> to vector<16x256xf32>
    %c0_3 = arith.constant 0 : index
    %c0_4 = arith.constant 0 : index
    %5 = vector.load %arg7[%c0_3, %c0_4] : memref<16x256xf32, #tpu.memory_space<vmem>>, vector<16x256xf32>
    %6 = arith.truncf %4 : vector<16x256xf32> to vector<16x256xbf16>
    %c0_5 = arith.constant 0 : index
    %c0_6 = arith.constant 0 : index
    %7 = vector.load %arg5[%c0_5, %c0_6] : memref<256x256xbf16, #tpu.memory_space<vmem>>, vector<256x256xbf16>
    %cst = arith.constant dense<0.000000e+00> : vector<16x256xf32>
    %8 = tpu.matmul %6, %7, %cst {dimension_numbers = #tpu.dot_dimension_numbers<[1], [0], [0], [1], [0, 0, 1, 1], [], []>} : vector<16x256xbf16>, vector<256x256xbf16>, vector<16x256xf32> -> vector<16x256xf32>
    %9 = arith.addf %5, %8 : vector<16x256xf32>
    %c0_7 = arith.constant 0 : index
    %c0_8 = arith.constant 0 : index
    %10 = vector.load %arg7[%c0_7, %c0_8] : memref<16x256xf32, #tpu.memory_space<vmem>>, vector<16x256xf32>
    tpu.vector_store %arg7[%c0_7, %c0_8], %9 {strides = array<i32>} : memref<16x256xf32, #tpu.memory_space<vmem>>, vector<16x256xf32>,
    %c0_i32_9 = arith.constant 0 : i32
    %11 = arith.cmpi eq, %arg3, %c0_i32_9 : i32
    %12 = arith.extui %11 : i1 to i32
    %c0_i32_10 = arith.constant 0 : i32
    %13 = arith.cmpi ne, %12, %c0_i32_10 : i32
    scf.if %13 {
      %c0_11 = arith.constant 0 : index
      %c0_12 = arith.constant 0 : index
      %14 = vector.load %arg7[%c0_11, %c0_12] : memref<16x256xf32, #tpu.memory_space<vmem>>, vector<16x256xf32>
      %15 = arith.truncf %14 : vector<16x256xf32> to vector<16x256xbf16>
      %c0_13 = arith.constant 0 : index
      %c0_14 = arith.constant 0 : index
      %c0_15 = arith.constant 0 : index
      %16 = vector.load %arg6[%c0_13, %c0_14, %c0_15] : memref<1x16x256xbf16, #tpu.memory_space<vmem>>, vector<1x16x256xbf16>
      %17 = vector.shape_cast %16 : vector<1x16x256xbf16> to vector<16x256xbf16>
      %18 = vector.shape_cast %15 : vector<16x256xbf16> to vector<1x16x256xbf16>
      tpu.vector_store %arg6[%c0_13, %c0_14, %c0_15], %18 {strides = array<i32>} : memref<1x16x256xbf16, #tpu.memory_space<vmem>>, vector<1x16x256xbf16>,
    } else {
    }
    return
  }
  func.func @transform_0(%arg0: i32, %arg1: i32, %arg2: i32, %arg3: i32) -> (i32, i32, i32) {
    %c0_i32 = arith.constant 0 : i32
    return %arg0, %arg1, %arg3 : i32, i32, i32
  }
  func.func @transform_1(%arg0: i32, %arg1: i32, %arg2: i32, %arg3: i32) -> (i32, i32) {
    %c0_i32 = arith.constant 0 : i32
    return %arg3, %arg2 : i32, i32
  }
  func.func @transform_2(%arg0: i32, %arg1: i32, %arg2: i32, %arg3: i32) -> (i32, i32, i32) {
    %c0_i32 = arith.constant 0 : i32
    return %arg0, %arg1, %arg2 : i32, i32, i32
  }
}

module attributes {stable_mosaic.version = 11 : i64} {
  func.func @_mm_kernel(%arg0: i32, %arg1: i32, %arg2: i32, %arg3: i32, %arg4: memref<1x16x256xf32, #tpu.memory_space<vmem>>, %arg5: memref<256x512xbf16, #tpu.memory_space<vmem>>, %arg6: memref<1x16x512xbf16, #tpu.memory_space<vmem>>, %arg7: memref<16x512xf32, #tpu.memory_space<vmem>>) attributes {dimension_semantics = [#tpu.dimension_semantics<parallel>, #tpu.dimension_semantics<parallel>, #tpu.dimension_semantics<parallel>, #tpu.dimension_semantics<arbitrary>], iteration_bounds = array<i64: 2, 1, 1, 1>, scalar_prefetch = 0 : i64, scratch_operands = 1 : i64, tpu.core_type = #tpu.core_type<tc>, window_params = [{transform_indices = @transform_0, window_bounds = array<i64: 1, 16, 256>}, {transform_indices = @transform_1, window_bounds = array<i64: 256, 512>}, {transform_indices = @transform_2, window_bounds = array<i64: 1, 16, 512>}]} {
    %c0_i32 = arith.constant 0 : i32
    %0 = arith.cmpi eq, %arg3, %c0_i32 : i32
    %1 = arith.extui %0 : i1 to i32
    %c0_i32_0 = arith.constant 0 : i32
    %2 = arith.cmpi ne, %1, %c0_i32_0 : i32
    scf.if %2 {
      %cst_11 = arith.constant 0.000000e+00 : f32
      %14 = vector.broadcast %cst_11 : f32 to vector<16x512xf32>
      %c0_12 = arith.constant 0 : index
      %c0_13 = arith.constant 0 : index
      %15 = vector.load %arg7[%c0_12, %c0_13] : memref<16x512xf32, #tpu.memory_space<vmem>>, vector<16x512xf32>
      tpu.vector_store %arg7[%c0_12, %c0_13], %14 {strides = array<i32>} : memref<16x512xf32, #tpu.memory_space<vmem>>, vector<16x512xf32>,
    } else {
    }
    %c0 = arith.constant 0 : index
    %c0_1 = arith.constant 0 : index
    %c0_2 = arith.constant 0 : index
    %3 = vector.load %arg4[%c0, %c0_1, %c0_2] : memref<1x16x256xf32, #tpu.memory_space<vmem>>, vector<1x16x256xf32>
    %4 = vector.shape_cast %3 : vector<1x16x256xf32> to vector<16x256xf32>
    %c0_3 = arith.constant 0 : index
    %c0_4 = arith.constant 0 : index
    %5 = vector.load %arg7[%c0_3, %c0_4] : memref<16x512xf32, #tpu.memory_space<vmem>>, vector<16x512xf32>
    %6 = arith.truncf %4 : vector<16x256xf32> to vector<16x256xbf16>
    %c0_5 = arith.constant 0 : index
    %c0_6 = arith.constant 0 : index
    %7 = vector.load %arg5[%c0_5, %c0_6] : memref<256x512xbf16, #tpu.memory_space<vmem>>, vector<256x512xbf16>
    %cst = arith.constant dense<0.000000e+00> : vector<16x512xf32>
    %8 = tpu.matmul %6, %7, %cst {dimension_numbers = #tpu.dot_dimension_numbers<[1], [0], [0], [1], [0, 0, 1, 1], [], []>} : vector<16x256xbf16>, vector<256x512xbf16>, vector<16x512xf32> -> vector<16x512xf32>
    %9 = arith.addf %5, %8 : vector<16x512xf32>
    %c0_7 = arith.constant 0 : index
    %c0_8 = arith.constant 0 : index
    %10 = vector.load %arg7[%c0_7, %c0_8] : memref<16x512xf32, #tpu.memory_space<vmem>>, vector<16x512xf32>
    tpu.vector_store %arg7[%c0_7, %c0_8], %9 {strides = array<i32>} : memref<16x512xf32, #tpu.memory_space<vmem>>, vector<16x512xf32>,
    %c0_i32_9 = arith.constant 0 : i32
    %11 = arith.cmpi eq, %arg3, %c0_i32_9 : i32
    %12 = arith.extui %11 : i1 to i32
    %c0_i32_10 = arith.constant 0 : i32
    %13 = arith.cmpi ne, %12, %c0_i32_10 : i32
    scf.if %13 {
      %c0_11 = arith.constant 0 : index
      %c0_12 = arith.constant 0 : index
      %14 = vector.load %arg7[%c0_11, %c0_12] : memref<16x512xf32, #tpu.memory_space<vmem>>, vector<16x512xf32>
      %15 = arith.truncf %14 : vector<16x512xf32> to vector<16x512xbf16>
      %c0_13 = arith.constant 0 : index
      %c0_14 = arith.constant 0 : index
      %c0_15 = arith.constant 0 : index
      %16 = vector.load %arg6[%c0_13, %c0_14, %c0_15] : memref<1x16x512xbf16, #tpu.memory_space<vmem>>, vector<1x16x512xbf16>
      %17 = vector.shape_cast %16 : vector<1x16x512xbf16> to vector<16x512xbf16>
      %18 = vector.shape_cast %15 : vector<16x512xbf16> to vector<1x16x512xbf16>
      tpu.vector_store %arg6[%c0_13, %c0_14, %c0_15], %18 {strides = array<i32>} : memref<1x16x512xbf16, #tpu.memory_space<vmem>>, vector<1x16x512xbf16>,
    } else {
    }
    return
  }
  func.func @transform_0(%arg0: i32, %arg1: i32, %arg2: i32, %arg3: i32) -> (i32, i32, i32) {
    %c0_i32 = arith.constant 0 : i32
    return %arg0, %arg1, %arg3 : i32, i32, i32
  }
  func.func @transform_1(%arg0: i32, %arg1: i32, %arg2: i32, %arg3: i32) -> (i32, i32) {
    %c0_i32 = arith.constant 0 : i32
    return %arg3, %arg2 : i32, i32
  }
  func.func @transform_2(%arg0: i32, %arg1: i32, %arg2: i32, %arg3: i32) -> (i32, i32, i32) {
    %c0_i32 = arith.constant 0 : i32
    return %arg0, %arg1, %arg2 : i32, i32, i32
  }
}

module attributes {stable_mosaic.version = 11 : i64} {
  func.func @_flash_kernel(%arg0: i32, %arg1: i32, %arg2: i32, %arg3: i32, %arg4: memref<1x16x128xbf16, #tpu.memory_space<vmem>>, %arg5: memref<1x16x128xbf16, #tpu.memory_space<vmem>>, %arg6: memref<1x16x128xbf16, #tpu.memory_space<vmem>>, %arg7: memref<1x128xf32, #tpu.memory_space<vmem>>, %arg8: memref<1x128xf32, #tpu.memory_space<vmem>>, %arg9: memref<1x16x128xbf16, #tpu.memory_space<vmem>>, %arg10: memref<16x1xf32, #tpu.memory_space<vmem>>, %arg11: memref<16x1xf32, #tpu.memory_space<vmem>>, %arg12: memref<16x128xf32, #tpu.memory_space<vmem>>, %arg13: memref<16x128xbf16, #tpu.memory_space<vmem>>) attributes {dimension_semantics = [#tpu.dimension_semantics<parallel>, #tpu.dimension_semantics<parallel>, #tpu.dimension_semantics<parallel>, #tpu.dimension_semantics<arbitrary>], iteration_bounds = array<i64: 2, 2, 1, 1>, scalar_prefetch = 0 : i64, scratch_operands = 4 : i64, tpu.core_type = #tpu.core_type<tc>, window_params = [{transform_indices = @transform_0, window_bounds = array<i64: 1, 16, 128>}, {transform_indices = @transform_1, window_bounds = array<i64: 1, 16, 128>}, {transform_indices = @transform_2, window_bounds = array<i64: 1, 16, 128>}, {pipeline_mode = #tpu.pipeline_mode<synchronous>, transform_indices = @transform_3, window_bounds = array<i64: 1, 128>}, {pipeline_mode = #tpu.pipeline_mode<synchronous>, transform_indices = @transform_4, window_bounds = array<i64: 1, 128>}, {transform_indices = @transform_5, window_bounds = array<i64: 1, 16, 128>}]} {
    %c0_i32 = arith.constant 0 : i32
    %0 = arith.cmpi eq, %arg3, %c0_i32 : i32
    %1 = arith.extui %0 : i1 to i32
    %c0_i32_0 = arith.constant 0 : i32
    %2 = arith.cmpi ne, %1, %c0_i32_0 : i32
    scf.if %2 {
      %cst_30 = arith.constant 0xFF800000 : f32
      %50 = vector.broadcast %cst_30 : f32 to vector<16x1xf32>
      %c0_31 = arith.constant 0 : index
      %c0_32 = arith.constant 0 : index
      %51 = vector.load %arg10[%c0_31, %c0_32] : memref<16x1xf32, #tpu.memory_space<vmem>>, vector<16x1xf32>
      tpu.vector_store %arg10[%c0_31, %c0_32], %50 {strides = array<i32>} : memref<16x1xf32, #tpu.memory_space<vmem>>, vector<16x1xf32>,
      %cst_33 = arith.constant 0.000000e+00 : f32
      %52 = vector.broadcast %cst_33 : f32 to vector<16x1xf32>
      %c0_34 = arith.constant 0 : index
      %c0_35 = arith.constant 0 : index
      %53 = vector.load %arg11[%c0_34, %c0_35] : memref<16x1xf32, #tpu.memory_space<vmem>>, vector<16x1xf32>
      tpu.vector_store %arg11[%c0_34, %c0_35], %52 {strides = array<i32>} : memref<16x1xf32, #tpu.memory_space<vmem>>, vector<16x1xf32>,
      %cst_36 = arith.constant 0.000000e+00 : f32
      %54 = vector.broadcast %cst_36 : f32 to vector<16x128xf32>
      %c0_37 = arith.constant 0 : index
      %c0_38 = arith.constant 0 : index
      %55 = vector.load %arg12[%c0_37, %c0_38] : memref<16x128xf32, #tpu.memory_space<vmem>>, vector<16x128xf32>
      tpu.vector_store %arg12[%c0_37, %c0_38], %54 {strides = array<i32>} : memref<16x128xf32, #tpu.memory_space<vmem>>, vector<16x128xf32>,
      %c0_39 = arith.constant 0 : index
      %c0_40 = arith.constant 0 : index
      %c0_41 = arith.constant 0 : index
      %56 = vector.load %arg4[%c0_39, %c0_40, %c0_41] : memref<1x16x128xbf16, #tpu.memory_space<vmem>>, vector<1x16x128xbf16>
      %57 = vector.shape_cast %56 : vector<1x16x128xbf16> to vector<16x128xbf16>
      %58 = arith.extf %57 : vector<16x128xbf16> to vector<16x128xf32>
      %59 = arith.mulf %58, %58 : vector<16x128xf32>
      %cst_42 = arith.constant dense<0.000000e+00> : vector<16xf32>
      %60 = vector.multi_reduction <add>, %59, %cst_42 [1] : vector<16x128xf32> to vector<16xf32>
      %61 = vector.shape_cast %60 : vector<16xf32> to vector<16x1xf32>
      %cst_43 = arith.constant 1.280000e+02 : f32
      %62 = vector.broadcast %cst_43 : f32 to vector<16x1xf32>
      %63 = arith.divf %61, %62 : vector<16x1xf32>
      %cst_44 = arith.constant 9.99999997E-7 : f32
      %64 = vector.broadcast %cst_44 : f32 to vector<16x1xf32>
      %65 = arith.addf %63, %64 : vector<16x1xf32>
      %66 = math.rsqrt %65 : vector<16x1xf32>
      %67 = vector.broadcast %66 : vector<16x1xf32> to vector<16x128xf32>
      %68 = arith.mulf %58, %67 : vector<16x128xf32>
      %c0_45 = arith.constant 0 : index
      %c0_46 = arith.constant 0 : index
      %69 = vector.load %arg7[%c0_45, %c0_46] : memref<1x128xf32, #tpu.memory_space<vmem>>, vector<1x128xf32>
      %70 = vector.broadcast %69 : vector<1x128xf32> to vector<16x128xf32>
      %71 = arith.mulf %68, %70 : vector<16x128xf32>
      %cst_47 = arith.constant 0.0883883461 : f32
      %72 = vector.broadcast %cst_47 : f32 to vector<16x128xf32>
      %73 = arith.mulf %71, %72 : vector<16x128xf32>
      %74 = arith.truncf %73 : vector<16x128xf32> to vector<16x128xbf16>
      %c0_48 = arith.constant 0 : index
      %c0_49 = arith.constant 0 : index
      %75 = vector.load %arg13[%c0_48, %c0_49] : memref<16x128xbf16, #tpu.memory_space<vmem>>, vector<16x128xbf16>
      tpu.vector_store %arg13[%c0_48, %c0_49], %74 {strides = array<i32>} : memref<16x128xbf16, #tpu.memory_space<vmem>>, vector<16x128xbf16>,
    } else {
    }
    %c0 = arith.constant 0 : index
    %c0_1 = arith.constant 0 : index
    %c0_2 = arith.constant 0 : index
    %3 = vector.load %arg5[%c0, %c0_1, %c0_2] : memref<1x16x128xbf16, #tpu.memory_space<vmem>>, vector<1x16x128xbf16>
    %4 = vector.shape_cast %3 : vector<1x16x128xbf16> to vector<16x128xbf16>
    %5 = arith.extf %4 : vector<16x128xbf16> to vector<16x128xf32>
    %6 = arith.mulf %5, %5 : vector<16x128xf32>
    %cst = arith.constant dense<0.000000e+00> : vector<16xf32>
    %7 = vector.multi_reduction <add>, %6, %cst [1] : vector<16x128xf32> to vector<16xf32>
    %8 = vector.shape_cast %7 : vector<16xf32> to vector<16x1xf32>
    %cst_3 = arith.constant 1.280000e+02 : f32
    %9 = vector.broadcast %cst_3 : f32 to vector<16x1xf32>
    %10 = arith.divf %8, %9 : vector<16x1xf32>
    %cst_4 = arith.constant 9.99999997E-7 : f32
    %11 = vector.broadcast %cst_4 : f32 to vector<16x1xf32>
    %12 = arith.addf %10, %11 : vector<16x1xf32>
    %13 = math.rsqrt %12 : vector<16x1xf32>
    %14 = vector.broadcast %13 : vector<16x1xf32> to vector<16x128xf32>
    %15 = arith.mulf %5, %14 : vector<16x128xf32>
    %c0_5 = arith.constant 0 : index
    %c0_6 = arith.constant 0 : index
    %16 = vector.load %arg8[%c0_5, %c0_6] : memref<1x128xf32, #tpu.memory_space<vmem>>, vector<1x128xf32>
    %17 = vector.broadcast %16 : vector<1x128xf32> to vector<16x128xf32>
    %18 = arith.mulf %15, %17 : vector<16x128xf32>
    %c0_7 = arith.constant 0 : index
    %c0_8 = arith.constant 0 : index
    %19 = vector.load %arg13[%c0_7, %c0_8] : memref<16x128xbf16, #tpu.memory_space<vmem>>, vector<16x128xbf16>
    %20 = arith.truncf %18 : vector<16x128xf32> to vector<16x128xbf16>
    %cst_9 = arith.constant dense<0.000000e+00> : vector<16x16xf32>
    %21 = tpu.matmul %19, %20, %cst_9 {dimension_numbers = #tpu.dot_dimension_numbers<[1], [1], [0], [0], [0, 0, 1, 0], [], []>} : vector<16x128xbf16>, vector<16x128xbf16>, vector<16x16xf32> -> vector<16x16xf32>
    %c0_10 = arith.constant 0 : index
    %c0_11 = arith.constant 0 : index
    %22 = vector.load %arg10[%c0_10, %c0_11] : memref<16x1xf32, #tpu.memory_space<vmem>>, vector<16x1xf32>
    %cst_12 = arith.constant dense<0xFF800000> : vector<16xf32>
    %23 = vector.multi_reduction <maximumf>, %21, %cst_12 [1] : vector<16x16xf32> to vector<16xf32>
    %24 = vector.shape_cast %23 : vector<16xf32> to vector<16x1xf32>
    %25 = arith.maximumf %22, %24 : vector<16x1xf32>
    %26 = arith.subf %22, %25 : vector<16x1xf32>
    %27 = math.exp %26 : vector<16x1xf32>
    %28 = vector.broadcast %25 : vector<16x1xf32> to vector<16x16xf32>
    %29 = arith.subf %21, %28 : vector<16x16xf32>
    %30 = math.exp %29 : vector<16x16xf32>
    %c0_13 = arith.constant 0 : index
    %c0_14 = arith.constant 0 : index
    %31 = vector.load %arg11[%c0_13, %c0_14] : memref<16x1xf32, #tpu.memory_space<vmem>>, vector<16x1xf32>
    %32 = arith.mulf %27, %31 : vector<16x1xf32>
    %cst_15 = arith.constant dense<0.000000e+00> : vector<16xf32>
    %33 = vector.multi_reduction <add>, %30, %cst_15 [1] : vector<16x16xf32> to vector<16xf32>
    %34 = vector.shape_cast %33 : vector<16xf32> to vector<16x1xf32>
    %35 = arith.addf %32, %34 : vector<16x1xf32>
    %c0_16 = arith.constant 0 : index
    %c0_17 = arith.constant 0 : index
    %36 = vector.load %arg11[%c0_16, %c0_17] : memref<16x1xf32, #tpu.memory_space<vmem>>, vector<16x1xf32>
    tpu.vector_store %arg11[%c0_16, %c0_17], %35 {strides = array<i32>} : memref<16x1xf32, #tpu.memory_space<vmem>>, vector<16x1xf32>,
    %c0_18 = arith.constant 0 : index
    %c0_19 = arith.constant 0 : index
    %37 = vector.load %arg12[%c0_18, %c0_19] : memref<16x128xf32, #tpu.memory_space<vmem>>, vector<16x128xf32>
    %38 = vector.broadcast %27 : vector<16x1xf32> to vector<16x128xf32>
    %39 = arith.mulf %38, %37 : vector<16x128xf32>
    %40 = arith.truncf %30 : vector<16x16xf32> to vector<16x16xbf16>
    %c0_20 = arith.constant 0 : index
    %c0_21 = arith.constant 0 : index
    %c0_22 = arith.constant 0 : index
    %41 = vector.load %arg6[%c0_20, %c0_21, %c0_22] : memref<1x16x128xbf16, #tpu.memory_space<vmem>>, vector<1x16x128xbf16>
    %42 = vector.shape_cast %41 : vector<1x16x128xbf16> to vector<16x128xbf16>
    %cst_23 = arith.constant dense<0.000000e+00> : vector<16x128xf32>
    %43 = tpu.matmul %40, %42, %cst_23 {dimension_numbers = #tpu.dot_dimension_numbers<[1], [0], [0], [1], [0, 0, 1, 1], [], []>} : vector<16x16xbf16>, vector<16x128xbf16>, vector<16x128xf32> -> vector<16x128xf32>
    %44 = arith.addf %39, %43 : vector<16x128xf32>
    %c0_24 = arith.constant 0 : index
    %c0_25 = arith.constant 0 : index
    %45 = vector.load %arg12[%c0_24, %c0_25] : memref<16x128xf32, #tpu.memory_space<vmem>>, vector<16x128xf32>
    tpu.vector_store %arg12[%c0_24, %c0_25], %44 {strides = array<i32>} : memref<16x128xf32, #tpu.memory_space<vmem>>, vector<16x128xf32>,
    %c0_26 = arith.constant 0 : index
    %c0_27 = arith.constant 0 : index
    %46 = vector.load %arg10[%c0_26, %c0_27] : memref<16x1xf32, #tpu.memory_space<vmem>>, vector<16x1xf32>
    tpu.vector_store %arg10[%c0_26, %c0_27], %25 {strides = array<i32>} : memref<16x1xf32, #tpu.memory_space<vmem>>, vector<16x1xf32>,
    %c0_i32_28 = arith.constant 0 : i32
    %47 = arith.cmpi eq, %arg3, %c0_i32_28 : i32
    %48 = arith.extui %47 : i1 to i32
    %c0_i32_29 = arith.constant 0 : i32
    %49 = arith.cmpi ne, %48, %c0_i32_29 : i32
    scf.if %49 {
      %c0_30 = arith.constant 0 : index
      %c0_31 = arith.constant 0 : index
      %50 = vector.load %arg12[%c0_30, %c0_31] : memref<16x128xf32, #tpu.memory_space<vmem>>, vector<16x128xf32>
      %c0_32 = arith.constant 0 : index
      %c0_33 = arith.constant 0 : index
      %51 = vector.load %arg11[%c0_32, %c0_33] : memref<16x1xf32, #tpu.memory_space<vmem>>, vector<16x1xf32>
      %52 = vector.broadcast %51 : vector<16x1xf32> to vector<16x128xf32>
      %53 = arith.divf %50, %52 : vector<16x128xf32>
      %54 = arith.truncf %53 : vector<16x128xf32> to vector<16x128xbf16>
      %c0_34 = arith.constant 0 : index
      %c0_35 = arith.constant 0 : index
      %c0_36 = arith.constant 0 : index
      %55 = vector.load %arg9[%c0_34, %c0_35, %c0_36] : memref<1x16x128xbf16, #tpu.memory_space<vmem>>, vector<1x16x128xbf16>
      %56 = vector.shape_cast %55 : vector<1x16x128xbf16> to vector<16x128xbf16>
      %57 = vector.shape_cast %54 : vector<16x128xbf16> to vector<1x16x128xbf16>
      tpu.vector_store %arg9[%c0_34, %c0_35, %c0_36], %57 {strides = array<i32>} : memref<1x16x128xbf16, #tpu.memory_space<vmem>>, vector<1x16x128xbf16>,
    } else {
    }
    return
  }
  func.func @transform_0(%arg0: i32, %arg1: i32, %arg2: i32, %arg3: i32) -> (i32, i32, i32) {
    %c1_i32 = arith.constant 1 : i32
    %0 = arith.muli %c1_i32, %arg1 : i32
    %c0_i32 = arith.constant 0 : i32
    %1 = arith.addi %0, %c0_i32 : i32
    %c0_i32_0 = arith.constant 0 : i32
    return %arg0, %arg2, %1 : i32, i32, i32
  }
  func.func @transform_1(%arg0: i32, %arg1: i32, %arg2: i32, %arg3: i32) -> (i32, i32, i32) {
    %c2_i32 = arith.constant 2 : i32
    %0 = arith.muli %c2_i32, %arg1 : i32
    %c0_i32 = arith.constant 0 : i32
    %1 = arith.addi %0, %c0_i32 : i32
    %c0_i32_0 = arith.constant 0 : i32
    return %arg0, %arg3, %1 : i32, i32, i32
  }
  func.func @transform_2(%arg0: i32, %arg1: i32, %arg2: i32, %arg3: i32) -> (i32, i32, i32) {
    %c2_i32 = arith.constant 2 : i32
    %0 = arith.muli %c2_i32, %arg1 : i32
    %c1_i32 = arith.constant 1 : i32
    %1 = arith.addi %0, %c1_i32 : i32
    %c0_i32 = arith.constant 0 : i32
    return %arg0, %arg3, %1 : i32, i32, i32
  }
  func.func @transform_3(%arg0: i32, %arg1: i32, %arg2: i32, %arg3: i32) -> (i32, i32) {
    %c0_i32 = arith.constant 0 : i32
    %c0_i32_0 = arith.constant 0 : i32
    %c0_i32_1 = arith.constant 0 : i32
    return %c0_i32, %c0_i32_0 : i32, i32
  }
  func.func @transform_4(%arg0: i32, %arg1: i32, %arg2: i32, %arg3: i32) -> (i32, i32) {
    %c0_i32 = arith.constant 0 : i32
    %c0_i32_0 = arith.constant 0 : i32
    %c0_i32_1 = arith.constant 0 : i32
    return %c0_i32, %c0_i32_0 : i32, i32
  }
  func.func @transform_5(%arg0: i32, %arg1: i32, %arg2: i32, %arg3: i32) -> (i32, i32, i32) {
    %c0_i32 = arith.constant 0 : i32
    return %arg0, %arg2, %arg1 : i32, i32, i32
  }
}

module attributes {stable_mosaic.version = 11 : i64} {
  func.func @_mm_kernel(%arg0: i32, %arg1: i32, %arg2: i32, %arg3: i32, %arg4: memref<1x16x256xbf16, #tpu.memory_space<vmem>>, %arg5: memref<256x256xbf16, #tpu.memory_space<vmem>>, %arg6: memref<1x16x256xf32, #tpu.memory_space<vmem>>, %arg7: memref<1x16x256xf32, #tpu.memory_space<vmem>>, %arg8: memref<16x256xf32, #tpu.memory_space<vmem>>) attributes {dimension_semantics = [#tpu.dimension_semantics<parallel>, #tpu.dimension_semantics<parallel>, #tpu.dimension_semantics<parallel>, #tpu.dimension_semantics<arbitrary>], iteration_bounds = array<i64: 2, 1, 1, 1>, scalar_prefetch = 0 : i64, scratch_operands = 1 : i64, tpu.core_type = #tpu.core_type<tc>, window_params = [{transform_indices = @transform_0, window_bounds = array<i64: 1, 16, 256>}, {transform_indices = @transform_1, window_bounds = array<i64: 256, 256>}, {transform_indices = @transform_2, window_bounds = array<i64: 1, 16, 256>}, {transform_indices = @transform_3, window_bounds = array<i64: 1, 16, 256>}]} {
    %c0_i32 = arith.constant 0 : i32
    %0 = arith.cmpi eq, %arg3, %c0_i32 : i32
    %1 = arith.extui %0 : i1 to i32
    %c0_i32_0 = arith.constant 0 : i32
    %2 = arith.cmpi ne, %1, %c0_i32_0 : i32
    scf.if %2 {
      %cst_11 = arith.constant 0.000000e+00 : f32
      %13 = vector.broadcast %cst_11 : f32 to vector<16x256xf32>
      %c0_12 = arith.constant 0 : index
      %c0_13 = arith.constant 0 : index
      %14 = vector.load %arg8[%c0_12, %c0_13] : memref<16x256xf32, #tpu.memory_space<vmem>>, vector<16x256xf32>
      tpu.vector_store %arg8[%c0_12, %c0_13], %13 {strides = array<i32>} : memref<16x256xf32, #tpu.memory_space<vmem>>, vector<16x256xf32>,
    } else {
    }
    %c0 = arith.constant 0 : index
    %c0_1 = arith.constant 0 : index
    %c0_2 = arith.constant 0 : index
    %3 = vector.load %arg4[%c0, %c0_1, %c0_2] : memref<1x16x256xbf16, #tpu.memory_space<vmem>>, vector<1x16x256xbf16>
    %4 = vector.shape_cast %3 : vector<1x16x256xbf16> to vector<16x256xbf16>
    %c0_3 = arith.constant 0 : index
    %c0_4 = arith.constant 0 : index
    %5 = vector.load %arg8[%c0_3, %c0_4] : memref<16x256xf32, #tpu.memory_space<vmem>>, vector<16x256xf32>
    %c0_5 = arith.constant 0 : index
    %c0_6 = arith.constant 0 : index
    %6 = vector.load %arg5[%c0_5, %c0_6] : memref<256x256xbf16, #tpu.memory_space<vmem>>, vector<256x256xbf16>
    %cst = arith.constant dense<0.000000e+00> : vector<16x256xf32>
    %7 = tpu.matmul %4, %6, %cst {dimension_numbers = #tpu.dot_dimension_numbers<[1], [0], [0], [1], [0, 0, 1, 1], [], []>} : vector<16x256xbf16>, vector<256x256xbf16>, vector<16x256xf32> -> vector<16x256xf32>
    %8 = arith.addf %5, %7 : vector<16x256xf32>
    %c0_7 = arith.constant 0 : index
    %c0_8 = arith.constant 0 : index
    %9 = vector.load %arg8[%c0_7, %c0_8] : memref<16x256xf32, #tpu.memory_space<vmem>>, vector<16x256xf32>
    tpu.vector_store %arg8[%c0_7, %c0_8], %8 {strides = array<i32>} : memref<16x256xf32, #tpu.memory_space<vmem>>, vector<16x256xf32>,
    %c0_i32_9 = arith.constant 0 : i32
    %10 = arith.cmpi eq, %arg3, %c0_i32_9 : i32
    %11 = arith.extui %10 : i1 to i32
    %c0_i32_10 = arith.constant 0 : i32
    %12 = arith.cmpi ne, %11, %c0_i32_10 : i32
    scf.if %12 {
      %c0_11 = arith.constant 0 : index
      %c0_12 = arith.constant 0 : index
      %13 = vector.load %arg8[%c0_11, %c0_12] : memref<16x256xf32, #tpu.memory_space<vmem>>, vector<16x256xf32>
      %c0_13 = arith.constant 0 : index
      %c0_14 = arith.constant 0 : index
      %c0_15 = arith.constant 0 : index
      %14 = vector.load %arg6[%c0_13, %c0_14, %c0_15] : memref<1x16x256xf32, #tpu.memory_space<vmem>>, vector<1x16x256xf32>
      %15 = vector.shape_cast %14 : vector<1x16x256xf32> to vector<16x256xf32>
      %16 = arith.addf %13, %15 : vector<16x256xf32>
      %c0_16 = arith.constant 0 : index
      %c0_17 = arith.constant 0 : index
      %c0_18 = arith.constant 0 : index
      %17 = vector.load %arg7[%c0_16, %c0_17, %c0_18] : memref<1x16x256xf32, #tpu.memory_space<vmem>>, vector<1x16x256xf32>
      %18 = vector.shape_cast %17 : vector<1x16x256xf32> to vector<16x256xf32>
      %19 = vector.shape_cast %16 : vector<16x256xf32> to vector<1x16x256xf32>
      tpu.vector_store %arg7[%c0_16, %c0_17, %c0_18], %19 {strides = array<i32>} : memref<1x16x256xf32, #tpu.memory_space<vmem>>, vector<1x16x256xf32>,
    } else {
    }
    return
  }
  func.func @transform_0(%arg0: i32, %arg1: i32, %arg2: i32, %arg3: i32) -> (i32, i32, i32) {
    %c0_i32 = arith.constant 0 : i32
    return %arg0, %arg1, %arg3 : i32, i32, i32
  }
  func.func @transform_1(%arg0: i32, %arg1: i32, %arg2: i32, %arg3: i32) -> (i32, i32) {
    %c0_i32 = arith.constant 0 : i32
    return %arg3, %arg2 : i32, i32
  }
  func.func @transform_2(%arg0: i32, %arg1: i32, %arg2: i32, %arg3: i32) -> (i32, i32, i32) {
    %c0_i32 = arith.constant 0 : i32
    return %arg0, %arg1, %arg2 : i32, i32, i32
  }
  func.func @transform_3(%arg0: i32, %arg1: i32, %arg2: i32, %arg3: i32) -> (i32, i32, i32) {
    %c0_i32 = arith.constant 0 : i32
    return %arg0, %arg1, %arg2 : i32, i32, i32
  }
}

module attributes {stable_mosaic.version = 11 : i64} {
  func.func @_mlp_kernel(%arg0: i32, %arg1: i32, %arg2: i32, %arg3: memref<1x16x256xf32, #tpu.memory_space<vmem>>, %arg4: memref<1x256xf32, #tpu.memory_space<vmem>>, %arg5: memref<1x256xf32, #tpu.memory_space<vmem>>, %arg6: memref<1x1x256xf32, #tpu.memory_space<vmem>>, %arg7: memref<1x1x256xf32, #tpu.memory_space<vmem>>, %arg8: memref<256x512xbf16, #tpu.memory_space<vmem>>, %arg9: memref<512x256xbf16, #tpu.memory_space<vmem>>, %arg10: memref<1x1x256xf32, #tpu.memory_space<vmem>>, %arg11: memref<1x16x256xf32, #tpu.memory_space<vmem>>, %arg12: memref<16x256xbf16, #tpu.memory_space<vmem>>, %arg13: memref<16x256xf32, #tpu.memory_space<vmem>>) attributes {dimension_semantics = [#tpu.dimension_semantics<parallel>, #tpu.dimension_semantics<parallel>, #tpu.dimension_semantics<arbitrary>], iteration_bounds = array<i64: 2, 1, 2>, scalar_prefetch = 0 : i64, scratch_operands = 2 : i64, tpu.core_type = #tpu.core_type<tc>, window_params = [{transform_indices = @transform_0, window_bounds = array<i64: 1, 16, 256>}, {pipeline_mode = #tpu.pipeline_mode<synchronous>, transform_indices = @transform_1, window_bounds = array<i64: 1, 256>}, {pipeline_mode = #tpu.pipeline_mode<synchronous>, transform_indices = @transform_2, window_bounds = array<i64: 1, 256>}, {transform_indices = @transform_3, window_bounds = array<i64: 1, 1, 256>}, {transform_indices = @transform_4, window_bounds = array<i64: 1, 1, 256>}, {transform_indices = @transform_5, window_bounds = array<i64: 256, 512>}, {transform_indices = @transform_6, window_bounds = array<i64: 512, 256>}, {transform_indices = @transform_7, window_bounds = array<i64: 1, 1, 256>}, {transform_indices = @transform_8, window_bounds = array<i64: 1, 16, 256>}]} {
    %c0_i32 = arith.constant 0 : i32
    %0 = arith.cmpi eq, %arg2, %c0_i32 : i32
    %1 = arith.extui %0 : i1 to i32
    %c0_i32_0 = arith.constant 0 : i32
    %2 = arith.cmpi ne, %1, %c0_i32_0 : i32
    scf.if %2 {
      %c0_16 = arith.constant 0 : index
      %c0_17 = arith.constant 0 : index
      %c0_18 = arith.constant 0 : index
      %28 = vector.load %arg3[%c0_16, %c0_17, %c0_18] : memref<1x16x256xf32, #tpu.memory_space<vmem>>, vector<1x16x256xf32>
      %29 = vector.shape_cast %28 : vector<1x16x256xf32> to vector<16x256xf32>
      %cst_19 = arith.constant dense<0.000000e+00> : vector<16xf32>
      %30 = vector.multi_reduction <add>, %29, %cst_19 [1] : vector<16x256xf32> to vector<16xf32>
      %31 = vector.shape_cast %30 : vector<16xf32> to vector<16x1xf32>
      %cst_20 = arith.constant 2.560000e+02 : f32
      %32 = vector.broadcast %cst_20 : f32 to vector<16x1xf32>
      %33 = arith.divf %31, %32 : vector<16x1xf32>
      %34 = arith.mulf %29, %29 : vector<16x256xf32>
      %cst_21 = arith.constant dense<0.000000e+00> : vector<16xf32>
      %35 = vector.multi_reduction <add>, %34, %cst_21 [1] : vector<16x256xf32> to vector<16xf32>
      %36 = vector.shape_cast %35 : vector<16xf32> to vector<16x1xf32>
      %cst_22 = arith.constant 2.560000e+02 : f32
      %37 = vector.broadcast %cst_22 : f32 to vector<16x1xf32>
      %38 = arith.divf %36, %37 : vector<16x1xf32>
      %39 = arith.mulf %33, %33 : vector<16x1xf32>
      %40 = arith.subf %38, %39 : vector<16x1xf32>
      %41 = vector.broadcast %33 : vector<16x1xf32> to vector<16x256xf32>
      %42 = arith.subf %29, %41 : vector<16x256xf32>
      %cst_23 = arith.constant 9.99999974E-6 : f32
      %43 = vector.broadcast %cst_23 : f32 to vector<16x1xf32>
      %44 = arith.addf %40, %43 : vector<16x1xf32>
      %45 = math.rsqrt %44 : vector<16x1xf32>
      %46 = vector.broadcast %45 : vector<16x1xf32> to vector<16x256xf32>
      %47 = arith.mulf %42, %46 : vector<16x256xf32>
      %c0_24 = arith.constant 0 : index
      %c0_25 = arith.constant 0 : index
      %48 = vector.load %arg4[%c0_24, %c0_25] : memref<1x256xf32, #tpu.memory_space<vmem>>, vector<1x256xf32>
      %49 = vector.broadcast %48 : vector<1x256xf32> to vector<16x256xf32>
      %50 = arith.mulf %47, %49 : vector<16x256xf32>
      %c0_26 = arith.constant 0 : index
      %c0_27 = arith.constant 0 : index
      %51 = vector.load %arg5[%c0_26, %c0_27] : memref<1x256xf32, #tpu.memory_space<vmem>>, vector<1x256xf32>
      %52 = vector.broadcast %51 : vector<1x256xf32> to vector<16x256xf32>
      %53 = arith.addf %50, %52 : vector<16x256xf32>
      %c0_28 = arith.constant 0 : index
      %c0_29 = arith.constant 0 : index
      %c0_30 = arith.constant 0 : index
      %54 = vector.load %arg6[%c0_28, %c0_29, %c0_30] : memref<1x1x256xf32, #tpu.memory_space<vmem>>, vector<1x1x256xf32>
      %55 = vector.shape_cast %54 : vector<1x1x256xf32> to vector<1x256xf32>
      %cst_31 = arith.constant 1.000000e+00 : f32
      %56 = vector.broadcast %cst_31 : f32 to vector<1x256xf32>
      %57 = arith.addf %56, %55 : vector<1x256xf32>
      %58 = vector.broadcast %57 : vector<1x256xf32> to vector<16x256xf32>
      %59 = arith.mulf %53, %58 : vector<16x256xf32>
      %c0_32 = arith.constant 0 : index
      %c0_33 = arith.constant 0 : index
      %c0_34 = arith.constant 0 : index
      %60 = vector.load %arg7[%c0_32, %c0_33, %c0_34] : memref<1x1x256xf32, #tpu.memory_space<vmem>>, vector<1x1x256xf32>
      %61 = vector.shape_cast %60 : vector<1x1x256xf32> to vector<1x256xf32>
      %62 = vector.broadcast %61 : vector<1x256xf32> to vector<16x256xf32>
      %63 = arith.addf %59, %62 : vector<16x256xf32>
      %64 = arith.truncf %63 : vector<16x256xf32> to vector<16x256xbf16>
      %c0_35 = arith.constant 0 : index
      %c0_36 = arith.constant 0 : index
      %65 = vector.load %arg12[%c0_35, %c0_36] : memref<16x256xbf16, #tpu.memory_space<vmem>>, vector<16x256xbf16>
      tpu.vector_store %arg12[%c0_35, %c0_36], %64 {strides = array<i32>} : memref<16x256xbf16, #tpu.memory_space<vmem>>, vector<16x256xbf16>,
      %cst_37 = arith.constant 0.000000e+00 : f32
      %66 = vector.broadcast %cst_37 : f32 to vector<16x256xf32>
      %c0_38 = arith.constant 0 : index
      %c0_39 = arith.constant 0 : index
      %67 = vector.load %arg13[%c0_38, %c0_39] : memref<16x256xf32, #tpu.memory_space<vmem>>, vector<16x256xf32>
      tpu.vector_store %arg13[%c0_38, %c0_39], %66 {strides = array<i32>} : memref<16x256xf32, #tpu.memory_space<vmem>>, vector<16x256xf32>,
    } else {
    }
    %c0 = arith.constant 0 : index
    %c0_1 = arith.constant 0 : index
    %3 = vector.load %arg12[%c0, %c0_1] : memref<16x256xbf16, #tpu.memory_space<vmem>>, vector<16x256xbf16>
    %c0_2 = arith.constant 0 : index
    %c0_3 = arith.constant 0 : index
    %4 = vector.load %arg8[%c0_2, %c0_3] : memref<256x512xbf16, #tpu.memory_space<vmem>>, vector<256x512xbf16>
    %cst = arith.constant dense<0.000000e+00> : vector<16x512xf32>
    %5 = tpu.matmul %3, %4, %cst {dimension_numbers = #tpu.dot_dimension_numbers<[1], [0], [0], [1], [0, 0, 1, 1], [], []>} : vector<16x256xbf16>, vector<256x512xbf16>, vector<16x512xf32> -> vector<16x512xf32>
    %cst_4 = arith.constant 5.000000e-01 : f32
    %6 = vector.broadcast %cst_4 : f32 to vector<16x512xf32>
    %7 = arith.mulf %6, %5 : vector<16x512xf32>
    %cst_5 = arith.constant 4.471500e-02 : f32
    %8 = vector.broadcast %cst_5 : f32 to vector<16x512xf32>
    %9 = arith.mulf %8, %5 : vector<16x512xf32>
    %10 = arith.mulf %9, %5 : vector<16x512xf32>
    %11 = arith.mulf %10, %5 : vector<16x512xf32>
    %12 = arith.addf %5, %11 : vector<16x512xf32>
    %cst_6 = arith.constant 0.797884583 : f32
    %13 = vector.broadcast %cst_6 : f32 to vector<16x512xf32>
    %14 = arith.mulf %13, %12 : vector<16x512xf32>
    %15 = math.tanh %14 : vector<16x512xf32>
    %cst_7 = arith.constant 1.000000e+00 : f32
    %16 = vector.broadcast %cst_7 : f32 to vector<16x512xf32>
    %17 = arith.addf %16, %15 : vector<16x512xf32>
    %18 = arith.mulf %7, %17 : vector<16x512xf32>
    %c0_8 = arith.constant 0 : index
    %c0_9 = arith.constant 0 : index
    %19 = vector.load %arg13[%c0_8, %c0_9] : memref<16x256xf32, #tpu.memory_space<vmem>>, vector<16x256xf32>
    %20 = arith.truncf %18 : vector<16x512xf32> to vector<16x512xbf16>
    %c0_10 = arith.constant 0 : index
    %c0_11 = arith.constant 0 : index
    %21 = vector.load %arg9[%c0_10, %c0_11] : memref<512x256xbf16, #tpu.memory_space<vmem>>, vector<512x256xbf16>
    %cst_12 = arith.constant dense<0.000000e+00> : vector<16x256xf32>
    %22 = tpu.matmul %20, %21, %cst_12 {dimension_numbers = #tpu.dot_dimension_numbers<[1], [0], [0], [1], [0, 0, 1, 1], [], []>} : vector<16x512xbf16>, vector<512x256xbf16>, vector<16x256xf32> -> vector<16x256xf32>
    %23 = arith.addf %19, %22 : vector<16x256xf32>
    %c0_13 = arith.constant 0 : index
    %c0_14 = arith.constant 0 : index
    %24 = vector.load %arg13[%c0_13, %c0_14] : memref<16x256xf32, #tpu.memory_space<vmem>>, vector<16x256xf32>
    tpu.vector_store %arg13[%c0_13, %c0_14], %23 {strides = array<i32>} : memref<16x256xf32, #tpu.memory_space<vmem>>, vector<16x256xf32>,
    %c1_i32 = arith.constant 1 : i32
    %25 = arith.cmpi eq, %arg2, %c1_i32 : i32
    %26 = arith.extui %25 : i1 to i32
    %c0_i32_15 = arith.constant 0 : i32
    %27 = arith.cmpi ne, %26, %c0_i32_15 : i32
    scf.if %27 {
      %c0_16 = arith.constant 0 : index
      %c0_17 = arith.constant 0 : index
      %28 = vector.load %arg13[%c0_16, %c0_17] : memref<16x256xf32, #tpu.memory_space<vmem>>, vector<16x256xf32>
      %c0_18 = arith.constant 0 : index
      %c0_19 = arith.constant 0 : index
      %c0_20 = arith.constant 0 : index
      %29 = vector.load %arg10[%c0_18, %c0_19, %c0_20] : memref<1x1x256xf32, #tpu.memory_space<vmem>>, vector<1x1x256xf32>
      %30 = vector.shape_cast %29 : vector<1x1x256xf32> to vector<1x256xf32>
      %31 = vector.broadcast %30 : vector<1x256xf32> to vector<16x256xf32>
      %32 = arith.mulf %28, %31 : vector<16x256xf32>
      %c0_21 = arith.constant 0 : index
      %c0_22 = arith.constant 0 : index
      %c0_23 = arith.constant 0 : index
      %33 = vector.load %arg3[%c0_21, %c0_22, %c0_23] : memref<1x16x256xf32, #tpu.memory_space<vmem>>, vector<1x16x256xf32>
      %34 = vector.shape_cast %33 : vector<1x16x256xf32> to vector<16x256xf32>
      %35 = arith.addf %32, %34 : vector<16x256xf32>
      %c0_24 = arith.constant 0 : index
      %c0_25 = arith.constant 0 : index
      %c0_26 = arith.constant 0 : index
      %36 = vector.load %arg11[%c0_24, %c0_25, %c0_26] : memref<1x16x256xf32, #tpu.memory_space<vmem>>, vector<1x16x256xf32>
      %37 = vector.shape_cast %36 : vector<1x16x256xf32> to vector<16x256xf32>
      %38 = vector.shape_cast %35 : vector<16x256xf32> to vector<1x16x256xf32>
      tpu.vector_store %arg11[%c0_24, %c0_25, %c0_26], %38 {strides = array<i32>} : memref<1x16x256xf32, #tpu.memory_space<vmem>>, vector<1x16x256xf32>,
    } else {
    }
    return
  }
  func.func @transform_0(%arg0: i32, %arg1: i32, %arg2: i32) -> (i32, i32, i32) {
    %c0_i32 = arith.constant 0 : i32
    %c0_i32_0 = arith.constant 0 : i32
    return %arg0, %arg1, %c0_i32 : i32, i32, i32
  }
  func.func @transform_1(%arg0: i32, %arg1: i32, %arg2: i32) -> (i32, i32) {
    %c0_i32 = arith.constant 0 : i32
    %c0_i32_0 = arith.constant 0 : i32
    %c0_i32_1 = arith.constant 0 : i32
    return %c0_i32, %c0_i32_0 : i32, i32
  }
  func.func @transform_2(%arg0: i32, %arg1: i32, %arg2: i32) -> (i32, i32) {
    %c0_i32 = arith.constant 0 : i32
    %c0_i32_0 = arith.constant 0 : i32
    %c0_i32_1 = arith.constant 0 : i32
    return %c0_i32, %c0_i32_0 : i32, i32
  }
  func.func @transform_3(%arg0: i32, %arg1: i32, %arg2: i32) -> (i32, i32, i32) {
    %c0_i32 = arith.constant 0 : i32
    %c0_i32_0 = arith.constant 0 : i32
    %c0_i32_1 = arith.constant 0 : i32
    return %arg0, %c0_i32, %c0_i32_0 : i32, i32, i32
  }
  func.func @transform_4(%arg0: i32, %arg1: i32, %arg2: i32) -> (i32, i32, i32) {
    %c0_i32 = arith.constant 0 : i32
    %c0_i32_0 = arith.constant 0 : i32
    %c0_i32_1 = arith.constant 0 : i32
    return %arg0, %c0_i32, %c0_i32_0 : i32, i32, i32
  }
  func.func @transform_5(%arg0: i32, %arg1: i32, %arg2: i32) -> (i32, i32) {
    %c0_i32 = arith.constant 0 : i32
    %c0_i32_0 = arith.constant 0 : i32
    return %c0_i32, %arg2 : i32, i32
  }
  func.func @transform_6(%arg0: i32, %arg1: i32, %arg2: i32) -> (i32, i32) {
    %c0_i32 = arith.constant 0 : i32
    %c0_i32_0 = arith.constant 0 : i32
    return %arg2, %c0_i32 : i32, i32
  }
  func.func @transform_7(%arg0: i32, %arg1: i32, %arg2: i32) -> (i32, i32, i32) {
    %c0_i32 = arith.constant 0 : i32
    %c0_i32_0 = arith.constant 0 : i32
    %c0_i32_1 = arith.constant 0 : i32
    return %arg0, %c0_i32, %c0_i32_0 : i32, i32, i32
  }
  func.func @transform_8(%arg0: i32, %arg1: i32, %arg2: i32) -> (i32, i32, i32) {
    %c0_i32 = arith.constant 0 : i32
    %c0_i32_0 = arith.constant 0 : i32
    return %arg0, %arg1, %c0_i32 : i32, i32, i32
  }
}

</mosaic_0001>

<bundles_post_ra>
// kernel: neg.1
= control target key start
LH: loop header
LB: loop body
LE: loop exit
PB: predicated region body
PF: predicated region fallthrough
CT: control target
= control target key end

     0   :  { %s40_s0 = inlined_call_operand.vmem [shape: f32[16,64], index: 0, kind: input, shape index: {}]   ;;  %s41_s1 = inlined_call_operand.vmem [shape: f32[16,64], index: 1, kind: output, shape index: {}]  }
   0x1   :  { %v2_v0 = vld [vmem:[%s40_s0] sm:$0xff]  ;;  %v16_v1 = vld [vmem:[%s40_s0 + $0x8] sm:$0xff] }
   0x2   :  { %v5_v2 = vxor.u32 2147483648, %v2_v0  ;;  %v12_v3 = vxor.u32 2147483648, %v16_v1 }
   0x4   :  { %7 = vst [vmem:[%s41_s1] sm:$0xff] %v5_v2  ;;  %17 = vst [vmem:[%s41_s1 + $0x8] sm:$0xff] %v12_v3 }

// kernel: step_video_block_forward.8
= control target key start
LH: loop header
LB: loop body
LE: loop exit
PB: predicated region body
PF: predicated region fallthrough
CT: control target
= control target key end

     0   :  { %s1851_s21 = smov 0   ;;  %s1853_s22 = smov 0   ;;  %s2218_s0 = inlined_call_operand.vmem [shape: f32[2,16,256], index: 0, kind: input, shape index: {}]   ;;  %s2219_s1 = inlined_call_operand.vmem [shape: bf16[256,768], index: 1, kind: input, shape index: {}]   ;;  %s2220_s2 = inlined_call_operand.vmem [shape: f32[1,256], index: 2, kind: input, shape index: {}]   ;;  %s2221_s3 = inlined_call_operand.vmem [shape: f32[1,256], index: 3, kind: input, shape index: {}]   ;;  %s2222_s4 = inlined_call_operand.vmem [shape: f32[2,1,256], index: 4, kind: input, shape index: {}]   ;;  %s2223_s5 = inlined_call_operand.vmem [shape: f32[2,1,256], index: 5, kind: input, shape index: {}]   ;;  %s2224_s6 = inlined_call_operand.vmem [shape: bf16[2,16,768], index: 6, kind: output, shape index: {}]  }
   0x1   :  { %s1855_s23 = smov 0  }
   0x2 LB: > { %s42_s24 = sadd.s32 1, %s1810_s22  ;;  %p1502_p0 = scmp.ge.s32.totalorder %s1814_s23, 1  ;;  %s1814_s23 = sphi %s1855_s23, %s16_s23   ;;  %s1810_s22 = sphi %s1853_s22, %s2226_s22   ;;  %s1806_s21 = sphi %s1851_s21, %s2225_s21  }
   0x3   : > { %p44_p1 = scmp.ge.s32.totalorder %s42_s24, 2  ;;  %p294_p2 = scmp.lt.s32.totalorder %s1814_s23, 3 }
   0x5   : > { %s2228_s24 = smov (%p44_p1, %s42_s24), 0  ;;  %p295_p3 = pnand %p1502_p0, %p294_p2 }
   0x6   : > { %p362_p4 = scmp.lt.s32.totalorder (!%p295_p3), %s1806_s21, 1  ;;  %v1644_v0 = vld [vmem:[%s2219_s1 + $0x4] ss:$24 sps:$4 sm:$0xff] (!%p295_p3)   ;;  %v1646_v1 = vld [vmem:[%s2219_s1] ss:$24 sps:$4 sm:$0xff] (!%p295_p3)  }
   0x7   : > { %298 = sbr.rel (%p295_p3) target bundleno = 480 (0x1e0), region = 44  ;;  %1124 = vmatprep.subr.bf16.mxu0 (!%p295_p3), %v1644_v0  ;;  %v1647_v2 = vld [vmem:[%s2219_s1 + $0xc] ss:$24 sps:$4 sm:$0xff] (!%p295_p3)   ;;  %v1649_v3 = vld [vmem:[%s2219_s1 + $0x8] ss:$24 sps:$4 sm:$0xff] (!%p295_p3)  }
   0x8   : > { %1125 = vmatpush1.bf16.msra.mxu0 (!%p295_p3), %v1646_v1  ;;  %v1650_v4 = vld [vmem:[%s2219_s1 + $0x34] ss:$24 sps:$4 sm:$0xff] (!%p295_p3)   ;;  %v1652_v5 = vld [vmem:[%s2219_s1 + $0x30] ss:$24 sps:$4 sm:$0xff] (!%p295_p3)   ;;  %1167 = vmatprep.subr.bf16.mxu1 (!%p295_p3), %v1647_v2  ;;  %v1656_v16 = vld [vmem:[%s2219_s1 + $0x64] ss:$24 sps:$4 sm:$0xff] (!%p295_p3)  }
   0x9   : > { %v1653_v6 = vld [vmem:[%s2219_s1 + $0x3c] ss:$24 sps:$4 sm:$0xff] (!%p295_p3)   ;;  %1168 = vmatpush1.bf16.msra.mxu1 (!%p295_p3), %v1649_v3  ;;  %1126 = vmatprep.subr.bf16.mxu0 (!%p295_p3), %v1650_v4  ;;  %v1655_v7 = vld [vmem:[%s2219_s1 + $0x38] ss:$24 sps:$4 sm:$0xff] (!%p295_p3)   ;;  %v1659_v19 = vld [vmem:[%s2219_s1 + $0x6c] ss:$24 sps:$4 sm:$0xff] (!%p295_p3)  }
   0xa   : > { %1169 = vmatprep.subr.bf16.mxu1 (!%p295_p3), %v1653_v6  ;;  %v1658_v17 = vld [vmem:[%s2219_s1 + $0x60] ss:$24 sps:$4 sm:$0xff] (!%p295_p3)   ;;  %v1662_v23 = vld [vmem:[%s2219_s1 + $0x94] ss:$24 sps:$4 sm:$0xff] (!%p295_p3)   ;;  %v1664_v25 = vld [vmem:[%s2219_s1 + $0x90] ss:$24 sps:$4 sm:$0xff] (!%p295_p3)  }
   0xb   : > { %v1661_v22 = vld [vmem:[%s2219_s1 + $0x68] ss:$24 sps:$4 sm:$0xff] (!%p295_p3)   ;;  %v1665_v26 = vld [vmem:[%s2219_s1 + $0x9c] ss:$24 sps:$4 sm:$0xff] (!%p295_p3)   ;;  %v1667_v28 = vld [vmem:[%s2219_s1 + $0x98] ss:$24 sps:$4 sm:$0xff] (!%p295_p3)  }
   0xc   : > { %1127 = vmatpush1.bf16.msra.mxu0 (!%p295_p3), %v1652_v5  ;;  %v1668_v27 = vld [vmem:[%s2219_s1 + $0xc4] ss:$24 sps:$4 sm:$0xff] (!%p295_p3)   ;;  %v1670_v30 = vld [vmem:[%s2219_s1 + $0xc0] ss:$24 sps:$4 sm:$0xff] (!%p295_p3)   ;;  %v1674_v31 = vld [vmem:[%s2219_s1 + $0xf4] ss:$24 sps:$4 sm:$0xff] (!%p295_p3)  }
   0xd   : > { %1170 = vmatpush1.bf16.msra.mxu1 (!%p295_p3), %v1655_v7  ;;  %1128 = vmatprep.subr.bf16.mxu0 (!%p295_p3), %v1656_v16  ;;  %v1671_v29 = vld [vmem:[%s2219_s1 + $0xcc] ss:$24 sps:$4 sm:$0xff] (!%p295_p3)   ;;  %v1673_v32 = vld [vmem:[%s2219_s1 + $0xc8] ss:$24 sps:$4 sm:$0xff] (!%p295_p3)   ;;  %v1677_v33 = vld [vmem:[%s2219_s1 + $0xfc] ss:$24 sps:$4 sm:$0xff] (!%p295_p3)  }
   0xe   : > { %s2230_s21 = smov (!%p362_p4, %s1806_s21), 1  ;;  %1171 = vmatprep.subr.bf16.mxu1 %v1659_v19  ;;  %v1676_v34 = vld [vmem:[%s2219_s1 + $0xf0] ss:$24 sps:$4 sm:$0xff]   ;;  %v1680_v35 = vld [vmem:[%s2219_s1 + $0x124] ss:$24 sps:$4 sm:$0xff]  }
   0xf   : > { %s1612_s13 = sshll.u32 %s2230_s21, 5  ;;  %v1679_v36 = vld [vmem:[%s2219_s1 + $0xf8] ss:$24 sps:$4 sm:$0xff]   ;;  %v1683_v38 = vld [vmem:[%s2219_s1 + $0x12c] ss:$24 sps:$4 sm:$0xff]   ;;  %s1505_s15 = sshll.u32 %s2230_s21, 1 }
  0x10   : > { %s373_s18 = scalar_lea.vmem %s2218_s0, %s1612_s13  ;;  %1129 = vmatpush1.bf16.msra.mxu0 %v1658_v17  ;;  %v1682_v37 = vld [vmem:[%s2219_s1 + $0x120] ss:$24 sps:$4 sm:$0xff]   ;;  %v1686_v40 = vld [vmem:[%s2219_s1 + $0x154] ss:$24 sps:$4 sm:$0xff]   ;;  %v1688_v41 = vld [vmem:[%s2219_s1 + $0x150] ss:$24 sps:$4 sm:$0xff]   ;;  %s395_s29 = scalar_lea.vmem %s2223_s5, %s1505_s15 }
  0x11   : > { %v1899_v8 = vld [vmem:[%s373_s18] sm:$0xff]  ;;  %v1901_v9 = vld [vmem:[%s373_s18 + $0x8] sm:$0xff]  ;;  %v1903_v10 = vld [vmem:[%s373_s18 + $0x10] sm:$0xff]  ;;  %1130 = vmatprep.subr.bf16.mxu0 %v1662_v23  ;;  %1172 = vmatpush1.bf16.msra.mxu1 %v1661_v22  ;;  %s1619_s8 = smul.u32 48, %s2230_s21 }
  0x12   : > { %v432_v11 = vadd.f32 %v1901_v9, %v1899_v8  ;;  %v441_v12 = vmul.f32 %v1899_v8, %v1899_v8  ;;  %v442_v13 = vmul.f32 %v1901_v9, %v1901_v9  ;;  %v1911_v14 = vld [vmem:[%s373_s18 + $0x18] sm:$0xff]  ;;  %v443_v15 = vmul.f32 %v1903_v10, %v1903_v10  ;;  %1173 = vmatprep.subr.bf16.mxu1 %v1665_v26  ;;  %v1685_v39 = vld [vmem:[%s2219_s1 + $0x128] ss:$24 sps:$4 sm:$0xff]   ;;  %v1695_v46 = vld [vmem:[%s2219_s1 + $0x18c] ss:$24 sps:$4 sm:$0xff]   ;;  %s391_s18 = scalar_lea.vmem %s2222_s4, %s1505_s15 }
  0x13   : > { %v444_v18 = vmul.f32 %v1911_v14, %v1911_v14  ;;  %v435_v21 = vadd.f32 %v1911_v14, %v1903_v10  ;;  %v1689_v42 = vld [vmem:[%s2219_s1 + $0x15c] ss:$24 sps:$4 sm:$0xff]   ;;  %v1691_v44 = vld [vmem:[%s2219_s1 + $0x158] ss:$24 sps:$4 sm:$0xff]   ;;  %v1697_v48 = vld [vmem:[%s2219_s1 + $0x188] ss:$24 sps:$4 sm:$0xff]   ;;  %v471_v26 = vlaneseq  ;;  %s409_s11 = scalar_lea.vmem %s2224_s6, %s1619_s8 }
  0x14   : > { %433 = vadd.xlane.f32.xlu0 %v432_v11  ;;  %v445_v20 = vadd.f32 %v442_v13, %v441_v12  ;;  %1131 = vmatpush1.bf16.msra.mxu0 %v1664_v25  ;;  %v1692_v43 = vld [vmem:[%s2219_s1 + $0x184] ss:$24 sps:$4 sm:$0xff]   ;;  %v1694_v45 = vld [vmem:[%s2219_s1 + $0x180] ss:$24 sps:$4 sm:$0xff]   ;;  %v1698_v47 = vld [vmem:[%s2219_s1 + $0x1b4] ss:$24 sps:$4 sm:$0xff]  }
  0x15   : > { %v448_v24 = vadd.f32 %v444_v18, %v443_v15  ;;  %1132 = vmatprep.subr.bf16.mxu0 %v1668_v27  ;;  %1174 = vmatpush1.bf16.msra.mxu1 %v1667_v28  ;;  %v1700_v49 = vld [vmem:[%s2219_s1 + $0x1b0] ss:$24 sps:$4 sm:$0xff]   ;;  %v1701_v50 = vld [vmem:[%s2219_s1 + $0x1bc] ss:$24 sps:$4 sm:$0xff]   ;;  %v1706_v53 = vld [vmem:[%s2219_s1 + $0x1e0] ss:$24 sps:$4 sm:$0xff]  }
  0x16   : > { %446 = vadd.xlane.f32.xlu1 %v445_v20  ;;  %1175 = vmatprep.subr.bf16.mxu1 %v1671_v29  ;;  %v1704_v51 = vld [vmem:[%s2219_s1 + $0x1e4] ss:$24 sps:$4 sm:$0xff]   ;;  %v1703_v52 = vld [vmem:[%s2219_s1 + $0x1b8] ss:$24 sps:$4 sm:$0xff]   ;;  %v1710_v55 = vld [vmem:[%s2219_s1 + $0x214] ss:$24 sps:$4 sm:$0xff]  }
  0x17   : > { %v1707_v54 = vld [vmem:[%s2219_s1 + $0x1ec] ss:$24 sps:$4 sm:$0xff]   ;;  %v1709_v56 = vld [vmem:[%s2219_s1 + $0x1e8] ss:$24 sps:$4 sm:$0xff]   ;;  %v1713_v57 = vld [vmem:[%s2219_s1 + $0x21c] ss:$24 sps:$4 sm:$0xff]  }
  0x18   : > { %436 = vadd.xlane.f32.xlu0 %v435_v21  ;;  %1133 = vmatpush1.bf16.msra.mxu0 %v1670_v30  ;;  %v1712_v58 = vld [vmem:[%s2219_s1 + $0x210] ss:$24 sps:$4 sm:$0xff]   ;;  %v1716_v59 = vld [vmem:[%s2219_s1 + $0x244] ss:$24 sps:$4 sm:$0xff]   ;;  %v1718_v62 = vld [vmem:[%s2219_s1 + $0x240] ss:$24 sps:$4 sm:$0xff]  }
  0x19   : > { %1134 = vmatprep.subr.bf16.mxu0 %v1674_v31  ;;  %1176 = vmatpush1.bf16.msra.mxu1 %v1673_v32  ;;  %v1715_v60 = vld [vmem:[%s2219_s1 + $0x218] ss:$24 sps:$4 sm:$0xff]   ;;  %v1719_v61 = vld [vmem:[%s2219_s1 + $0x24c] ss:$24 sps:$4 sm:$0xff]   ;;  %v1721_v0 = vld [vmem:[%s2219_s1 + $0x248] ss:$24 sps:$4 sm:$0xff]  }
  0x1a   : > { %449 = vadd.xlane.f32.xlu1 %v448_v24  ;;  %1177 = vmatprep.subr.bf16.mxu1 %v1677_v33  ;;  %v1722_v63 = vld [vmem:[%s2219_s1 + $0x274] ss:$24 sps:$4 sm:$0xff]   ;;  %v1724_v1 = vld [vmem:[%s2219_s1 + $0x270] ss:$24 sps:$4 sm:$0xff]   ;;  %v1728_v3 = vld [vmem:[%s2219_s1 + $0x2a4] ss:$24 sps:$4 sm:$0xff]  }
  0x1b   : > { %v1725_v2 = vld [vmem:[%s2219_s1 + $0x27c] ss:$24 sps:$4 sm:$0xff]   ;;  %v1727_v4 = vld [vmem:[%s2219_s1 + $0x278] ss:$24 sps:$4 sm:$0xff]   ;;  %v1731_v5 = vld [vmem:[%s2219_s1 + $0x2ac] ss:$24 sps:$4 sm:$0xff]  }
  0x1c   : > { %1135 = vmatpush1.bf16.msra.mxu0 %v1676_v34  ;;  %v1730_v6 = vld [vmem:[%s2219_s1 + $0x2a0] ss:$24 sps:$4 sm:$0xff]   ;;  %v1734_v7 = vld [vmem:[%s2219_s1 + $0x2d4] ss:$24 sps:$4 sm:$0xff]   ;;  %v1736_v13 = vld [vmem:[%s2219_s1 + $0x2d0] ss:$24 sps:$4 sm:$0xff]  }
  0x1d   : > { %1136 = vmatprep.subr.bf16.mxu0 %v1680_v35  ;;  %1178 = vmatpush1.bf16.msra.mxu1 %v1679_v36  ;;  %v1733_v11 = vld [vmem:[%s2219_s1 + $0x2a8] ss:$24 sps:$4 sm:$0xff]   ;;  %v1737_v12 = vld [vmem:[%s2219_s1 + $0x2dc] ss:$24 sps:$4 sm:$0xff]   ;;  %v1739_v16 = vld [vmem:[%s2219_s1 + $0x2d8] ss:$24 sps:$4 sm:$0xff]  }
  0x1e   : > { %1179 = vmatprep.subr.bf16.mxu1 %v1683_v38  ;;  %v1742_v15 = vld [vmem:[%s2219_s1 + $0x14] ss:$24 sps:$4 sm:$0xff]   ;;  %v472_v31 = vshrl.u32 %v471_v26, 7  ;;  %v469_v35 = vld [vmem:[%s2220_s2] sm:$0x3] }
  0x1f   : > { %v501_v36 = vld [vmem:[%s391_s18] sm:$0x3] }
  0x20   : > { %1137 = vmatpush1.bf16.msra.mxu0 %v1682_v37  ;;  %v477_v33 = vsub.s32 1, %v472_v31  ;;  %v473_v34 = vsub.s32 0, %v472_v31  ;;  %v1761_v26 = vld [vmem:[%s2219_s1 + $0x160] ss:$24 sps:$4 sm:$0xff]   ;;  %v1772_v31 = vld [vmem:[%s2219_s1 + $0x1f4] ss:$24 sps:$4 sm:$0xff]  }
  0x21   : > { %1138 = vmatprep.subr.bf16.mxu0 %v1686_v40  ;;  %1180 = vmatpush1.bf16.msra.mxu1 %v1685_v39  ;;  %v485_v40 = vld [vmem:[%s2221_s3] sm:$0x3] }
  0x22   : > { %1181 = vmatprep.subr.bf16.mxu1 %v1689_v42  ;;  %v478_v39 = vrot.slane %v469_v35, %v477_v33 }
  0x24   : > { %1139 = vmatpush1.bf16.msra.mxu0 %v1688_v41  ;;  %v474_v41 = vrot.slane %v469_v35, %v473_v34  ;;  %v1778_v35 = vld [vmem:[%s2219_s1 + $0x254] ss:$24 sps:$4 sm:$0xff]  }
  0x25   : > { %1140 = vmatprep.subr.bf16.mxu0 %v1692_v43  ;;  %1182 = vmatpush1.bf16.msra.mxu1 %v1691_v44  ;;  %v502_v44 = vadd.f32 1.0, %v501_v36  ;;  %v1776_v36 = vld [vmem:[%s2219_s1 + $0x250] ss:$24 sps:$4 sm:$0xff]  }
  0x26   : > { %1183 = vmatprep.subr.bf16.mxu1 %v1695_v46  ;;  %v494_v46 = vrot.slane %v485_v40, %v477_v33 }
  0x28   : > { %1141 = vmatpush1.bf16.msra.mxu0 %v1694_v45 }
  0x29   : > { %1142 = vmatprep.subr.bf16.mxu0 %v1698_v47  ;;  %1184 = vmatpush1.bf16.msra.mxu1 %v1697_v48  ;;  %v490_v47 = vrot.slane %v485_v40, %v473_v34  ;;  %v1782_v40 = vld [vmem:[%s2219_s1 + $0x2b0] ss:$24 sps:$4 sm:$0xff]  }
  0x2a   : > { %1185 = vmatprep.subr.bf16.mxu1 %v1701_v50 }
  0x2c   : > { %1143 = vmatpush1.bf16.msra.mxu0 %v1700_v49 }
  0x2d   : > { %1144 = vmatprep.subr.bf16.mxu0 %v1704_v51  ;;  %1186 = vmatpush1.bf16.msra.mxu1 %v1703_v52  ;;  %v511_v51 = vrot.slane %v502_v44, %v477_v33  ;;  %v507_v52 = vrot.slane %v502_v44, %v473_v34 }
  0x2e   : > { %1187 = vmatprep.subr.bf16.mxu1 %v1707_v54 }
  0x30   : > { %1145 = vmatpush1.bf16.msra.mxu0 %v1706_v53 }
  0x31   : > { %1146 = vmatprep.subr.bf16.mxu0 %v1710_v55  ;;  %1188 = vmatpush1.bf16.msra.mxu1 %v1709_v56  ;;  %v518_v56 = vld [vmem:[%s395_s29] sm:$0x3] }
  0x32   : > { %1189 = vmatprep.subr.bf16.mxu1 %v1713_v57 }
  0x34   : > { %1147 = vmatpush1.bf16.msra.mxu0 %v1712_v58 }
  0x35   : > { %1148 = vmatprep.subr.bf16.mxu0 %v1716_v59  ;;  %1190 = vmatpush1.bf16.msra.mxu1 %v1715_v60  ;;  %v527_v60 = vrot.slane %v518_v56, %v477_v33  ;;  %v1775_v33 = vld [vmem:[%s2219_s1 + $0x224] ss:$24 sps:$4 sm:$0xff]  }
  0x36   : > { %1191 = vmatprep.subr.bf16.mxu1 %v1719_v61  ;;  %v523_v61 = vrot.slane %v518_v56, %v473_v34  ;;  %v1773_v34 = vld [vmem:[%s2219_s1 + $0x220] ss:$24 sps:$4 sm:$0xff]  }
  0x38   : > { %1149 = vmatpush1.bf16.msra.mxu0 %v1718_v62 }
  0x39   : > { %1150 = vmatprep.subr.bf16.mxu0 %v1722_v63  ;;  %1192 = vmatpush1.bf16.msra.mxu1 %v1721_v0 }
  0x3a   : > { %1193 = vmatprep.subr.bf16.mxu1 %v1725_v2 }
  0x3c   : > { %1151 = vmatpush1.bf16.msra.mxu0 %v1724_v1 }
  0x3d   : > { %1152 = vmatprep.subr.bf16.mxu0 %v1728_v3  ;;  %1194 = vmatpush1.bf16.msra.mxu1 %v1727_v4 }
  0x3e   : > { %1195 = vmatprep.subr.bf16.mxu1 %v1731_v5 }
  0x40   : > { %1153 = vmatpush1.bf16.msra.mxu0 %v1730_v6 }
  0x41   : > { %1154 = vmatprep.subr.bf16.mxu0 %v1734_v7  ;;  %1196 = vmatpush1.bf16.msra.mxu1 %v1733_v11  ;;  %v1740_v7 = vld [vmem:[%s2219_s1 + $0x10] ss:$24 sps:$4 sm:$0xff]  }
  0x42   : > { %1197 = vmatprep.subr.bf16.mxu1 %v1737_v12  ;;  %v1745_v12 = vld [vmem:[%s2219_s1 + $0x44] ss:$24 sps:$4 sm:$0xff]  }
  0x44   : > { %1155 = vmatpush1.bf16.msra.mxu0 %v1736_v13  ;;  %v1743_v13 = vld [vmem:[%s2219_s1 + $0x40] ss:$24 sps:$4 sm:$0xff]  }
  0x45   : > { %1210 = vmatprep.subr.bf16.mxu0 %v1742_v15  ;;  %1198 = vmatpush1.bf16.msra.mxu1 %v1739_v16  ;;  %v1748_v15 = vld [vmem:[%s2219_s1 + $0x74] ss:$24 sps:$4 sm:$0xff]   ;;  %v1746_v16 = vld [vmem:[%s2219_s1 + $0x70] ss:$24 sps:$4 sm:$0xff]  }
  0xa1   : > { %v434_v17 = vpop.xlane.xlu0 %433 }
  0xa2   : > { %v439_v18 = vmul.f32 0.00390625, %v434_v17  ;;  %v1751_v17 = vld [vmem:[%s2219_s1 + $0xa4] ss:$24 sps:$4 sm:$0xff]  }
  0xa3   : > { %v447_v19 = vpop.xlane.xlu1 %446 }
  0xa4   : > { %v451_v20 = vmul.f32 0.00390625, %v447_v19  ;;  %v453_v21 = vmul.f32 %v439_v18, %v439_v18  ;;  %v457_v37 = vsub.f32 %v1899_v8, %v439_v18  ;;  %v458_v38 = vsub.f32 %v1901_v9, %v439_v18  ;;  %v1749_v18 = vld [vmem:[%s2219_s1 + $0xa0] ss:$24 sps:$4 sm:$0xff]   ;;  %v1754_v19 = vld [vmem:[%s2219_s1 + $0xd4] ss:$24 sps:$4 sm:$0xff]  }
  0xa5   : > { %v437_v22 = vpop.xlane.xlu0 %436 }
  0xa6   : > { %v455_v23 = vsub.f32 %v451_v20, %v453_v21  ;;  %v440_v24 = vmul.f32 0.00390625, %v437_v22  ;;  %v1752_v20 = vld [vmem:[%s2219_s1 + $0xd0] ss:$24 sps:$4 sm:$0xff]   ;;  %v1757_v21 = vld [vmem:[%s2219_s1 + $0x104] ss:$24 sps:$4 sm:$0xff]  }
  0xa7   : > { %v450_v25 = vpop.xlane.xlu1 %449  ;;  %v1755_v22 = vld [vmem:[%s2219_s1 + $0x100] ss:$24 sps:$4 sm:$0xff]  }
  0xa8   : > { %v461_v27 = vadd.f32 1e-05, %v455_v23  ;;  %v452_v28 = vmul.f32 0.00390625, %v450_v25  ;;  %v454_v29 = vmul.f32 %v440_v24, %v440_v24  ;;  %v459_v9 = vsub.f32 %v1903_v10, %v440_v24  ;;  %v1760_v23 = vld [vmem:[%s2219_s1 + $0x134] ss:$24 sps:$4 sm:$0xff]  }
  0xa9   : > { %v460_v49 = vsub.f32 %v1911_v14, %v440_v24  ;;  %v1758_v24 = vld [vmem:[%s2219_s1 + $0x130] ss:$24 sps:$4 sm:$0xff]   ;;  %v1763_v25 = vld [vmem:[%s2219_s1 + $0x164] ss:$24 sps:$4 sm:$0xff]  }
  0xaa   : > { %1788 = vrsqrt.f32 %v461_v27  ;;  %v456_v30 = vsub.f32 %v452_v28, %v454_v29  ;;  %v1766_v27 = vld [vmem:[%s2219_s1 + $0x194] ss:$24 sps:$4 sm:$0xff]   ;;  %v1764_v28 = vld [vmem:[%s2219_s1 + $0x190] ss:$24 sps:$4 sm:$0xff]   ;;  %v1769_v29 = vld [vmem:[%s2219_s1 + $0x1c4] ss:$24 sps:$4 sm:$0xff]  }
  0xac   : > { %v462_v32 = vadd.f32 1e-05, %v456_v30  ;;  %v1767_v30 = vld [vmem:[%s2219_s1 + $0x1c0] ss:$24 sps:$4 sm:$0xff]  }
  0xae   : > { %1790 = vrsqrt.f32 %v462_v32  ;;  %v1770_v32 = vld [vmem:[%s2219_s1 + $0x1f0] ss:$24 sps:$4 sm:$0xff]  }
  0xb4   : > { %v1789_v42 = vpop.eup %1788 }
  0xb5   : > { %v466_v43 = vmul.f32 %v1789_v42, %v458_v38  ;;  %v465_v45 = vmul.f32 %v1789_v42, %v457_v37  ;;  %v1781_v37 = vld [vmem:[%s2219_s1 + $0x284] ss:$24 sps:$4 sm:$0xff]   ;;  %v1779_v38 = vld [vmem:[%s2219_s1 + $0x280] ss:$24 sps:$4 sm:$0xff]  }
  0xb6   : > { %v1785_v42 = vld [vmem:[%s2219_s1 + $0x2e0] ss:$24 sps:$4 sm:$0xff]  }
  0xb7   : > { %v482_v48 = vmul.f32 %v478_v39, %v466_v43  ;;  %v481_v8 = vmul.f32 %v474_v41, %v465_v45 }
  0xb8   : > { %v1791_v50 = vpop.eup %1790 }
  0xb9   : > { %v467_v53 = vmul.f32 %v1791_v50, %v459_v9  ;;  %v468_v54 = vmul.f32 %v1791_v50, %v460_v49  ;;  %v498_v55 = vadd.f32 %v494_v46, %v482_v48  ;;  %v497_v57 = vadd.f32 %v490_v47, %v481_v8 }
  0xbb   : > { %v484_v58 = vmul.f32 %v478_v39, %v468_v54  ;;  %v483_v59 = vmul.f32 %v474_v41, %v467_v53  ;;  %v515_v63 = vmul.f32 %v511_v51, %v498_v55  ;;  %v514_v1 = vmul.f32 %v507_v52, %v497_v57  ;;  %v1784_v39 = vld [vmem:[%s2219_s1 + $0x2b4] ss:$24 sps:$4 sm:$0xff]   ;;  %v1787_v41 = vld [vmem:[%s2219_s1 + $0x2e4] ss:$24 sps:$4 sm:$0xff]  }
  0xbd   : > { %v500_v62 = vadd.f32 %v494_v46, %v484_v58  ;;  %v499_v0 = vadd.f32 %v490_v47, %v483_v59  ;;  %v531_v3 = vadd.f32 %v527_v60, %v515_v63  ;;  %v530_v4 = vadd.f32 %v523_v61, %v514_v1 }
  0xbf   : > { %v517_v2 = vmul.f32 %v511_v51, %v500_v62  ;;  %v516_v10 = vmul.f32 %v507_v52, %v499_v0 }
  0xc1   : > { %v533_v14 = vadd.f32 %v527_v60, %v517_v2  ;;  %v532_v5 = vadd.f32 %v523_v61, %v516_v10 }
  0xc3   : > { %v547_v6 = vpack.c.bf16 %v533_v14, %v531_v3  ;;  %v2110_v11 = vpack.c.bf16 %v532_v5, %v530_v4 }
  0xc5   : > { %1156 = vmatprep.mubr.bf16.mxu0 %v547_v6  ;;  %1199 = vmatprep.mubr.bf16.mxu1 %v547_v6 }
  0xc6   : > { %1157 = vmatmul.mubr.bf16.vlgmr.msra.gmra.mrb[0].mxu0 %v2110_v11  ;;  %1200 = vmatmul.mubr.bf16.vlgmr.msra.gmra.mrb[0].mxu1 %v2110_v11 }
  0xc7   : > { %1211 = vmatpush1.bf16.msra.mxu0 %v1740_v7  ;;  %1242 = vmatprep.mubr.bf16.mxu0 %v547_v6 }
  0xc8   : > { %1212 = vmatprep.subr.bf16.mxu0 %v1745_v12 }
  0xcb   : > { %1213 = vmatpush1.bf16.msra.mxu0 %v1743_v13 }
  0xcc   : > { %1214 = vmatprep.subr.bf16.mxu0 %v1748_v15 }
  0xcf   : > { %1215 = vmatpush1.bf16.msra.mxu0 %v1746_v16 }
  0xd0   : > { %1216 = vmatprep.subr.bf16.mxu0 %v1751_v17 }
  0xd3   : > { %1217 = vmatpush1.bf16.msra.mxu0 %v1749_v18 }
  0xd4   : > { %1218 = vmatprep.subr.bf16.mxu0 %v1754_v19 }
  0xd7   : > { %1219 = vmatpush1.bf16.msra.mxu0 %v1752_v20 }
  0xd8   : > { %1220 = vmatprep.subr.bf16.mxu0 %v1757_v21 }
  0xdb   : > { %1221 = vmatpush1.bf16.msra.mxu0 %v1755_v22 }
  0xdc   : > { %1222 = vmatprep.subr.bf16.mxu0 %v1760_v23 }
  0xdf   : > { %1223 = vmatpush1.bf16.msra.mxu0 %v1758_v24 }
  0xe0   : > { %1224 = vmatprep.subr.bf16.mxu0 %v1763_v25 }
  0xe3   : > { %1225 = vmatpush1.bf16.msra.mxu0 %v1761_v26 }
  0xe4   : > { %1226 = vmatprep.subr.bf16.mxu0 %v1766_v27 }
  0xe7   : > { %1227 = vmatpush1.bf16.msra.mxu0 %v1764_v28 }
  0xe8   : > { %1228 = vmatprep.subr.bf16.mxu0 %v1769_v29 }
  0xeb   : > { %1229 = vmatpush1.bf16.msra.mxu0 %v1767_v30 }
  0xec   : > { %1230 = vmatprep.subr.bf16.mxu0 %v1772_v31 }
  0xef   : > { %1231 = vmatpush1.bf16.msra.mxu0 %v1770_v32 }
  0xf0   : > { %1232 = vmatprep.subr.bf16.mxu0 %v1775_v33 }
  0xf3   : > { %1233 = vmatpush1.bf16.msra.mxu0 %v1773_v34 }
  0xf4   : > { %1234 = vmatprep.subr.bf16.mxu0 %v1778_v35 }
  0xf7   : > { %1235 = vmatpush1.bf16.msra.mxu0 %v1776_v36 }
  0xf8   : > { %1236 = vmatprep.subr.bf16.mxu0 %v1781_v37 }
  0xfb   : > { %1237 = vmatpush1.bf16.msra.mxu0 %v1779_v38 }
  0xfc   : > { %1238 = vmatprep.subr.bf16.mxu0 %v1784_v39 }
  0xff   : > { %1239 = vmatpush1.bf16.msra.mxu0 %v1782_v40 }
 0x100   : > { %1240 = vmatprep.subr.bf16.mxu0 %v1787_v41 }
 0x103   : > { %1241 = vmatpush1.bf16.msra.mxu0 %v1785_v42 }
 0x106   : > { %1243 = vmatmul.mubr.bf16.vlgmr.msra.gmra.mrb[4].mxu0 %v2110_v11 }
 0x199   : > { %v1158_v43 = vpop.f32.mrb[0].mxu0  ;;  %v1201_v44 = vpop.f32.mrb[0].mxu1 }
 0x19a   : > { %v1160_v45 = vpop.f32.mrb[1].mxu0  ;;  %v1203_v46 = vpop.f32.mrb[1].mxu1 }
 0x19b   : > { %v1613_v47 = vpack.c.bf16 %v1160_v45, %v1158_v43  ;;  %v1614_v48 = vpack.c.bf16 %v1203_v46, %v1201_v44  ;;  %v1162_v8 = vpop.f32.mrb[2].mxu0  ;;  %v1205_v9 = vpop.f32.mrb[2].mxu1 }
 0x19c   : > { %v1164_v49 = vpop.f32.mrb[3].mxu0  ;;  %v1207_v50 = vpop.f32.mrb[3].mxu1 }
 0x19d   : > { %1328 = vst [vmem:[%s409_s11] sm:$0xff] %v1613_v47  ;;  %1329 = vst [vmem:[%s409_s11 + $0x8] sm:$0xff] %v1614_v48  ;;  %v1616_v51 = vpack.c.bf16 %v1164_v49, %v1162_v8  ;;  %v1617_v52 = vpack.c.bf16 %v1207_v50, %v1205_v9 }
 0x19f   : > { %1331 = vst [vmem:[%s409_s11 + $0x18] sm:$0xff] %v1616_v51  ;;  %1332 = vst [vmem:[%s409_s11 + $0x20] sm:$0xff] %v1617_v52 }
 0x1d9   : > { %v1244_v53 = vpop.f32.mrb[4].mxu0 }
 0x1da   : > { %v1246_v54 = vpop.f32.mrb[5].mxu0 }
 0x1db   : > { %v1615_v55 = vpack.c.bf16 %v1246_v54, %v1244_v53  ;;  %v1248_v56 = vpop.f32.mrb[6].mxu0 }
 0x1dc   : > { %v1250_v57 = vpop.f32.mrb[7].mxu0 }
 0x1dd   : > { %1330 = vst [vmem:[%s409_s11 + $0x10] sm:$0xff] %v1615_v55  ;;  %v1618_v58 = vpack.c.bf16 %v1250_v57, %v1248_v56 }
 0x1df   : > { %1333 = vst [vmem:[%s409_s11 + $0x28] sm:$0xff] %v1618_v58 }
 0x1e0 PF: > { %s16_s23 = sadd.s32 1, %s1814_s23   ;;  %s2225_s21 = smov %s1810_s22 }
 0x1e1   : > { %p13_p5 = scmp.ge.s32.totalorder %s16_s23, 4   ;;  %s2226_s22 = smov %s2228_s24 }
 0x1e3   :  { %15 = sbr.rel (!%p13_p5) target bundleno = 2 (0x2), region = 91 }

// kernel: step_video_block_forward.9
= control target key start
LH: loop header
LB: loop body
LE: loop exit
PB: predicated region body
PF: predicated region fallthrough
CT: control target
= control target key end

     0   :  { %s1696_s0 = inlined_call_operand.vmem [shape: bf16[2,16,768], index: 0, kind: input, shape index: {}, may-alias: {0,1,2}]   ;;  %s1697_s1 = inlined_call_operand.vmem [shape: bf16[2,16,768], index: 1, kind: input, shape index: {}, may-alias: {0,1,2}]   ;;  %s1698_s2 = inlined_call_operand.vmem [shape: bf16[2,16,768], index: 2, kind: input, shape index: {}, may-alias: {0,1,2}]   ;;  %s1699_s3 = inlined_call_operand.vmem [shape: f32[1,128], index: 3, kind: input, shape index: {}]   ;;  %s1700_s4 = inlined_call_operand.vmem [shape: f32[1,128], index: 4, kind: input, shape index: {}]   ;;  %s1701_s5 = inlined_call_operand.vmem [shape: f32[16,256], index: 5, kind: input, shape index: {}, may-alias: {5,6}]   ;;  %s1702_s6 = inlined_call_operand.vmem [shape: f32[16,256], index: 6, kind: input, shape index: {}, may-alias: {5,6}]   ;;  %s1703_s7 = inlined_call_operand.vmem [shape: bf16[2,16,256], index: 7, kind: output, shape index: {}]  }
   0x1   :  { %1709 = sst [smem:[#allocation17_spill]] %s1699_s3 }
   0x2   :  { %1710 = sst [smem:[#allocation18_spill]] %s1700_s4 }
   0x3   :  { %1711 = sst [smem:[#allocation19_spill]] %s1701_s5 }
   0x4   :  { %1712 = sst [smem:[#allocation20_spill]] %s1702_s6 }
   0x5   :  { %1713 = sst [smem:[#allocation21_spill]] %s1703_s7 }
   0x6   :  { %s1437_s24 = smov 0   ;;  %s1439_s25 = smov 0  }
   0x7   :  { %s1441_s26 = smov 0   ;;  %s1443_s27 = smov 0  }
   0x8   :  { %s1445_s28 = smov 0   ;;  %s1447_s29 = smov 0  }
   0x9   :  { %s1449_s30 = smov 0   ;;  %s1451_s8 = smov 0  }
   0xa   :  { %s1453_s9 = smov 0   ;;  %s1455_s10 = smov 0  }
   0xb   :  { %s1457_s11 = smov 0   ;;  %s1459_s12 = smov 0  }
   0xc   :  { %s1461_s13 = smov 0  }
   0xd LB: > { %1714 = sst [smem:[#allocation10_spill]] %s1374_s9  ;;  %s39_s15 = sadd.s32 1, %s1382_s11  ;;  %s1390_s13 = sphi %s1461_s13, %s17_s13   ;;  %s1386_s12 = sphi %s1459_s12, %s1750_s12   ;;  %s1382_s11 = sphi %s1457_s11, %s1749_s11   ;;  %s1378_s10 = sphi %s1455_s10, %s1748_s10   ;;  %s1374_s9 = sphi %s1453_s9, %s1737_s9   ;;  %s1370_s8 = sphi %s1451_s8, %s1747_s8   ;;  %s1366_s30 = sphi %s1449_s30, %s1746_s30   ;;  %s1362_s29 = sphi %s1447_s29, %s1745_s29   ;;  %s1358_s28 = sphi %s1445_s28, %s1744_s28   ;;  %s1354_s27 = sphi %s1443_s27, %s1743_s27   ;;  %s1350_s26 = sphi %s1441_s26, %s1742_s26   ;;  %s1346_s25 = sphi %s1439_s25, %s1741_s25   ;;  %s1342_s24 = sphi %s1437_s24, %s1740_s24  }
   0xe   : > { %1715 = sst [smem:[#allocation11_spill]] %s1378_s10  ;;  %p41_p0 = scmp.ge.s32.totalorder %s39_s15, 2 }
   0xf   : > { %1716 = sst [smem:[#allocation12_spill]] %s1382_s11  ;;  %s43_s16 = sadd.s32 1, %s1386_s12 }
  0x10   : > { %s1506_s17 = smul.u32 3, %s1382_s11  ;;  %s56_s18 = sadd.s32 1, %s1370_s8 }
  0x11   : > { %s1752_s15 = smov (%p41_p0, %s39_s15), 0  ;;  %s1754_s16 = smov (!%p41_p0, %s43_s16), %s1386_s12 }
  0x12   : > { %1717 = sst [smem:[#allocation13_spill]] %s1752_s15  ;;  %s48_s19 = smul.u32 3, %s1752_s15 }
  0x13   : > { %p63_p1 = scmp.ne.s32.totalorder %s1370_s8, %s1366_s30  ;;  %p45_p2 = scmp.ge.s32.totalorder %s1754_s16, 2 }
  0x14   : > { %p64_p3 = scmp.eq.s32.totalorder %s1390_s13, 0  ;;  %s52_s20 = ssub.s32 %s1506_s17, %s48_s19 }
  0x15   : > { %s80_s21 = sadd.s32 1, %s1506_s17  ;;  %s1756_s16 = smov (%p45_p2, %s1754_s16), 0 }
  0x16   : > { %1718 = sst [smem:[#allocation14_spill]] %s1756_s16  ;;  %p1522_p4 = por %p64_p3, %p63_p1 }
  0x17   : > { %s82_s23 = sadd.s32 1, %s48_s19  ;;  %s49_s14 = ssub.s32 %s1386_s12, %s1756_s16 }
  0x18   : > { %s86_s7 = ssub.s32 %s80_s21, %s82_s23  ;;  %s53_s9 = sor.u32 %s52_s20, %s49_s14 }
  0x19   : > { %s87_s10 = sor.u32 %s86_s7, %s49_s14  ;;  %p54_p5 = scmp.eq.s32.totalorder %s53_s9, 0 }
  0x1a   : > { %p88_p6 = scmp.eq.s32.totalorder %s87_s10, 0  ;;  %s90_s5 = sadd.s32 1, %s1362_s29 }
  0x1b   : > { %p97_p7 = scmp.ne.s32.totalorder %s1362_s29, %s1358_s28  ;;  %s114_s7 = sadd.s32 2, %s1506_s17 }
  0x1c   : > { %s1532_s6 = scalar_select %p54_p5, %s1370_s8, %s56_s18  }
  0x1d   : > { %s1535_s3 = scalar_select %p88_p6, %s1362_s29, %s90_s5  }
  0x1e   : > { %1720 = sst [smem:[#allocation15_spill]] %s1532_s6  ;;  %p1539_p8 = por %p97_p7, %p64_p3 }
  0x1f   : > { %1721 = sst [smem:[#allocation16_spill]] %s1535_s3  ;;  %s116_s9 = sadd.s32 2, %s48_s19 }
  0x20   : > { %s124_s10 = sadd.s32 1, %s1354_s27  ;;  %s120_s20 = ssub.s32 %s114_s7, %s116_s9 }
  0x21   : > { %p131_p9 = scmp.ne.s32.totalorder %s1354_s27, %s1350_s26  ;;  %s121_s23 = sor.u32 %s120_s20, %s49_s14 }
  0x22   : > { %s244_s16 = ssub.s32 %s1382_s11, %s1752_s15  ;;  %p122_p10 = scmp.eq.s32.totalorder %s121_s23, 0 }
  0x23   : > { %p1551_p11 = por %p131_p9, %p64_p3  ;;  %s245_s5 = sor.u32 %s244_s16, %s49_s14 }
  0x24   : > { %s248_s6 = sadd.s32 1, %s1346_s25  ;;  %p246_p12 = scmp.eq.s32.totalorder %s245_s5, 0 }
  0x25   : > { %s1557_s3 = scalar_select %p122_p10, %s1354_s27, %s124_s10  }
  0x26   : > { %p258_p13 = scmp.ne.s32.totalorder %s1346_s25, %s1342_s24  ;;  %s1724_s4 = sadd.s32 4294967295, %s1390_s13  }
  0x27   : > { %p259_p0 = scmp.eq.s32.totalorder %s1724_s4, 3  ;;  %p1097_p2 = scmp.ge.s32.totalorder %s1390_s13, 4 }
  0x28   : > { %s1564_s19 = scalar_select %p246_p12, %s1346_s25, %s248_s6  }
  0x29   : > { %p1566_p1 = por %p259_p0, %p258_p13  ;;  %307 = sbr.rel (%p1097_p2) target bundleno = 72 (0x48), region = 32 }
  0x30   : > { %310 = sbr.rel (!%p1522_p4) target bundleno = 56 (0x38), region = 36  ;;  %s312_s14 = sand.u32 (%p1522_p4), 1, %s1370_s8  }
  0x31   : > { %s1155_s16 = smul.u32 (%p1522_p4), 12, %s1386_s12  ;;  %s1098_s9 = sshll.u32 (%p1522_p4), %s312_s14, 3 }
  0x32   : > { %s314_s5 = scalar_lea.vmem (%p1522_p4), [#allocation6], %s1098_s9 }
  0x33   : > { %s320_s10 = sadd.s32 (%p1522_p4), %s1155_s16, %s1506_s17 }
  0x34   : > { %s1099_s4 = sshll.u32 (%p1522_p4), %s320_s10, 2 }
  0x35   : > { %s322_s23 = scalar_lea.vmem (%p1522_p4), %s1696_s0, %s1099_s4 }
  0x36   : > { %v338_v0 = vld [vmem:[%s322_s23] sm:$0xf] (%p1522_p4)  ;;  %v340_v1 = vld [vmem:[%s322_s23 + $0x18] sm:$0xf] (%p1522_p4) }
  0x37   : > { %339 = vst [vmem:[%s314_s5] sm:$0xf] %v338_v0  ;;  %341 = vst [vmem:[%s314_s5 + $0x4] sm:$0xf] %v340_v1 }
  0x38 PF: > { %368 = sbr.rel (!%p1539_p8) target bundleno = 64 (0x40), region = 77  ;;  %s370_s22 = sand.u32 (%p1539_p8), 1, %s1362_s29  }
  0x39   : > { %s961_s14 = smul.u32 (%p1539_p8), 12, %s1386_s12  ;;  %s1100_s16 = sshll.u32 (%p1539_p8), %s370_s22, 3 }
  0x3a   : > { %s372_s9 = scalar_lea.vmem (%p1539_p8), [#allocation7], %s1100_s16 }
  0x3b   : > { %s962_s10 = sadd.s32 (%p1539_p8), %s961_s14, %s1506_s17 }
  0x3c   : > { %s1101_s15 = sshll.u32 (%p1539_p8), %s962_s10, 2 }
  0x3d   : > { %s964_s4 = scalar_lea.vmem (%p1539_p8), %s1697_s1, %s1101_s15 }
  0x3e   : > { %v1102_v2 = vld [vmem:[%s964_s4 + $0x4] sm:$0xf] (%p1539_p8)  ;;  %v1103_v3 = vld [vmem:[%s964_s4 + $0x1c] sm:$0xf] (%p1539_p8) }
  0x3f   : > { %398 = vst [vmem:[%s372_s9] sm:$0xf] %v1102_v2  ;;  %400 = vst [vmem:[%s372_s9 + $0x4] sm:$0xf] %v1103_v3 }
  0x40 PF: > { %427 = sbr.rel (!%p1551_p11) target bundleno = 72 (0x48), region = 118  ;;  %s429_s21 = sand.u32 (%p1551_p11), 1, %s1354_s27  }
  0x41   : > { %s971_s20 = smul.u32 (%p1551_p11), 12, %s1386_s12  ;;  %s1104_s23 = sshll.u32 (%p1551_p11), %s429_s21, 3 }
  0x42   : > { %s431_s16 = scalar_lea.vmem (%p1551_p11), [#allocation8], %s1104_s23 }
  0x43   : > { %s972_s5 = sadd.s32 (%p1551_p11), %s971_s20, %s1506_s17 }
  0x44   : > { %s1105_s22 = sshll.u32 (%p1551_p11), %s972_s5, 2 }
  0x45   : > { %s974_s15 = scalar_lea.vmem (%p1551_p11), %s1698_s2, %s1105_s22 }
  0x46   : > { %v1106_v4 = vld [vmem:[%s974_s15 + $0x8] sm:$0xf] (%p1551_p11)  ;;  %v1107_v5 = vld [vmem:[%s974_s15 + $0x20] sm:$0xf] (%p1551_p11) }
  0x47   : > { %457 = vst [vmem:[%s431_s16] sm:$0xf] %v1106_v4  ;;  %459 = vst [vmem:[%s431_s16 + $0x4] sm:$0xf] %v1107_v5 }
  0x48 PF: > { %p1108_p3 = scmp.ge.s32.totalorder %s1390_s13, 1  ;;  %p485_p4 = scmp.lt.s32.totalorder %s1390_s13, 5 }
  0x4a   : > { %p486_p5 = pnand %p1108_p3, %p485_p4 }
  0x4b   : > { %s499_s17 = sand.u32 (!%p486_p5), 1, %s1358_s28   ;;  %s492_s18 = sand.u32 (!%p486_p5), 1, %s1366_s30   ;;  %v1392_v31 = vmov (!%p486_p5), 0.0   ;;  %vm1394_vm0 = vmmov (!%p486_p5), 0   ;;  %vm584_vm1 = vcmask (!%p486_p5), 7168   ;;  %vm724_vm2 = vcmask (!%p486_p5), 130048  }
  0x4c   : > { %489 = sbr.rel (%p486_p5) target bundleno = 1186 (0x4a2), region = 159  ;;  %s1110_s10 = sshll.u32 (!%p486_p5), %s499_s17, 3  ;;  %1143 = vmatprep.subr.bf16.mxu0 (!%p486_p5), %v1392_v31  ;;  %1149 = vmatprep.subr.bf16.mxu1 (!%p486_p5), %v1392_v31  ;;  %587 = vst.msk [vmem:[#allocation3] sm:$0xff] (!%p486_p5), %vm584_vm1, %v1392_v31  ;;  %588 = vst.msk [vmem:[#allocation3 + $0x8] sm:$0xff] (!%p486_p5), %vm584_vm1, %v1392_v31 }
  0x4d   : > { %s1109_s6 = sshll.u32 (!%p486_p5), %s492_s18, 3  ;;  %s501_s4 = scalar_lea.vmem (!%p486_p5), [#allocation7], %s1110_s10  ;;  %1145 = vmatprep.mubr.msk.bf16.mxu0 (!%p486_p5), %vm1394_vm0, %v1392_v31  ;;  %1151 = vmatprep.mubr.msk.bf16.mxu1 (!%p486_p5), %vm1394_vm0, %v1392_v31 }
  0x4e   : > { %v1131_v6 = vld [vmem:[%s501_s4] sm:$0xff] (!%p486_p5)   ;;  %s494_s9 = scalar_lea.vmem (!%p486_p5), [#allocation6], %s1109_s6  ;;  %s1726_s21 = sld [smem:[#allocation18_spill]] (!%p486_p5) }
  0x4f   : > { %v1127_v7 = vld [vmem:[%s494_s9] sm:$0xff] (!%p486_p5)   ;;  %v1132_v8 = vunpack.c.l.bf16 (!%p486_p5), %v1131_v6  ;;  %v1133_v9 = vunpack.c.h.bf16 (!%p486_p5), %v1131_v6  ;;  %s1393_s20 = smov (!%p486_p5), 64   ;;  %s1727_s22 = sld [smem:[#allocation17_spill]] (!%p486_p5) }
  0x50   : > { %v1128_v10 = vunpack.c.l.bf16 (!%p486_p5), %v1127_v7  ;;  %v1129_v11 = vunpack.c.h.bf16 (!%p486_p5), %v1127_v7  ;;  %s1728_s15 = sld [smem:[#allocation20_spill]] (!%p486_p5)  ;;  %s1729_s30 = sld [smem:[#allocation19_spill]] (!%p486_p5)  ;;  %v1395_v7 = vmov (!%p486_p5), -inf  }
  0x51   : > { %v641_v12 = vmul.f32 (!%p486_p5), %v1132_v8, %v1132_v8  ;;  %v642_v14 = vmul.f32 (!%p486_p5), %v1133_v9, %v1133_v9  ;;  %585 = vst.msk [vmem:[#allocation2] sm:$0xff] (!%p486_p5), %vm584_vm1, %v1395_v7  ;;  %586 = vst.msk [vmem:[#allocation2 + $0x8] sm:$0xff] (!%p486_p5), %vm584_vm1, %v1395_v7  ;;  %s506_s16 = sand.u32 (!%p486_p5), 1, %s1350_s26   ;;  %s553_s26 = sand.u32 (!%p486_p5), 1, %s1342_s24  }
  0x52   : > { %v595_v13 = vmul.f32 (!%p486_p5), %v1128_v10, %v1128_v10  ;;  %v596_v15 = vmul.f32 (!%p486_p5), %v1129_v11, %v1129_v11  ;;  %s1111_s17 = sshll.u32 (!%p486_p5), %s506_s16, 3  ;;  %s1112_s10 = sshll.u32 (!%p486_p5), %s553_s26, 3 }
  0x53   : > { %643 = vadd.xlane.f32.xlu0 %v641_v12  ;;  %s508_s18 = scalar_lea.vmem [#allocation8], %s1111_s17  ;;  %s555_s6 = scalar_lea.vmem [#allocation9], %s1112_s10 }
  0x54   : > { %597 = vadd.xlane.f32.xlu1 %v595_v13  ;;  %v1114_v29 = vld [vmem:[%s1726_s21] ss:$0 sm:$0xff]  ;;  %s1731_s4 = sld [smem:[#allocation11_spill]] (%p1566_p1)  ;;  %s1732_s9 = sld [smem:[#allocation10_spill]] (%p1566_p1) }
  0x55   : > { %v1113_v38 = vld [vmem:[%s1727_s22] ss:$0 sm:$0xff]  ;;  %s1733_s5 = sld [smem:[#allocation21_spill]] (%p1566_p1) }
  0x56   : > { %v667_v43 = vld [vmem:[%s1728_s15 + $0x8] sm:$0xff]  ;;  %v665_v45 = vld [vmem:[%s1728_s15] sm:$0xff]  ;;  %v666_v46 = vld [vmem:[%s1728_s15 + $0x10] sm:$0xff]  ;;  %s1730_s21 = smov %s1729_s30 }
  0x57   : > { %645 = vadd.xlane.f32.xlu0 %v642_v14  ;;  %v668_v47 = vld [vmem:[%s1728_s15 + $0x18] sm:$0xff]  ;;  %v621_v53 = vld [vmem:[%s1729_s30 + $0x8] sm:$0xff]  ;;  %v619_v56 = vld [vmem:[%s1730_s21] sm:$0xff]  ;;  %v1396_v14 = vmov 0  }
  0x58   : > { %599 = vadd.xlane.f32.xlu1 %v596_v15  ;;  %v620_v60 = vld [vmem:[%s1730_s21 + $0x10] sm:$0xff]  ;;  %v622_v61 = vld [vmem:[%s1730_s21 + $0x18] sm:$0xff]  ;;  %1265 = vset.pattern.permute.xlu0 %v1396_v14  ;;  %v722_v15 = vld [vmem:[#allocation2] sm:$0xff] }
  0x59   : > { %1266 = vset.pattern.permute.xlu1 %v1396_v14 }
  0x5a   : > { %s1120_s28 = sshll.u32 (%p1566_p1), %s1731_s4, 2 }
  0x5b   : > { %s885_s30 = sadd.s32 (%p1566_p1), %s1732_s9, %s1120_s28 }
  0x5c   : > { %s1121_s24 = sshll.u32 (%p1566_p1), %s885_s30, 2 }
  0x5d   : > { %s887_s22 = scalar_lea.vmem (%p1566_p1), %s1733_s5, %s1121_s24 }
  0xe0   : > { %v644_v16 = vpop.xlane.xlu0 %643 }
  0xe1   : > { %v598_v17 = vpop.xlane.xlu1 %597  ;;  %v648_v18 = vmul.f32 0.0078125, %v644_v16 }
  0xe2   : > { %v602_v19 = vmul.f32 0.0078125, %v598_v17  ;;  %v723_v17 = vld [vmem:[#allocation2 + $0x8] sm:$0xff] }
  0xe3   : > { %v650_v20 = vadd.f32 1e-06, %v648_v18 }
  0xe4   : > { %v604_v21 = vadd.f32 1e-06, %v602_v19  ;;  %v646_v22 = vpop.xlane.xlu0 %645 }
  0xe5   : > { %v600_v23 = vpop.xlane.xlu1 %599  ;;  %1268 = vrsqrt.f32 %v650_v20  ;;  %v649_v24 = vmul.f32 0.0078125, %v646_v22 }
  0xe6   : > { %v603_v25 = vmul.f32 0.0078125, %v600_v23  ;;  %1270 = vrsqrt.f32 %v604_v21  ;;  %v1267_v23 = vld [vmem:[%s508_s18] sm:$0xff]  }
  0xe7   : > { %v651_v26 = vadd.f32 1e-06, %v649_v24  ;;  %1150 = vmatpush3.bf16.msra.mxu1 %v1267_v23 }
  0xe8   : > { %v605_v27 = vadd.f32 1e-06, %v603_v25 }
  0xe9   : > { %1272 = vrsqrt.f32 %v651_v26 }
  0xea   : > { %1274 = vrsqrt.f32 %v605_v27 }
  0xef   : > { %v1269_v28 = vpop.eup %1268 }
  0xf0   : > { %v654_v30 = vmul.f32 %v1269_v28, %v1132_v8  ;;  %v1271_v32 = vpop.eup %1270 }
  0xf1   : > { %v608_v36 = vmul.f32 %v1271_v32, %v1128_v10 }
  0xf2   : > { %v663_v33 = vmul.f32 %v1114_v29, %v654_v30 }
  0xf3   : > { %v1273_v34 = vpop.eup %1272  ;;  %v617_v40 = vmul.f32 %v1113_v38, %v608_v36 }
  0xf4   : > { %671 = vrot.lane.b32.xlu0 %v663_v33, %s1393_s20  ;;  %v655_v35 = vmul.f32 %v1273_v34, %v1133_v9  ;;  %v1275_v37 = vpop.eup %1274  ;;  %v669_v50 = vmul.f32 %v665_v45, %v663_v33 }
  0xf5   : > { %v609_v41 = vmul.f32 %v1275_v37, %v1129_v11  ;;  %v623_v62 = vmul.f32 %v619_v56, %v617_v40 }
  0xf6   : > { %v664_v39 = vmul.f32 %v1114_v29, %v655_v35 }
  0xf7   : > { %v618_v42 = vmul.f32 %v1113_v38, %v609_v41  ;;  %v755_v38 = vld [vmem:[#allocation3] sm:$0xff] }
  0xf8   : > { %673 = vrot.lane.b32.xlu1 %v664_v39, %s1393_s20  ;;  %v670_v51 = vmul.f32 %v666_v46, %v664_v39 }
  0xf9   : > { %v624_v1 = vmul.f32 %v620_v60, %v618_v42 }
  0xfc   : > { %625 = vrot.lane.b32.xlu1 %v617_v40, %s1393_s20  ;;  %v756_v40 = vld [vmem:[#allocation3 + $0x8] sm:$0xff] }
 0x100   : > { %627 = vrot.lane.b32.xlu1 %v618_v42, %s1393_s20 }
 0x166   : > { %v672_v44 = vpop.permute.xlu0 %671 }
 0x167   : > { %v675_v48 = vmul.f32 %v672_v44, %v667_v43 }
 0x169   : > { %v677_v54 = vadd.f32 %v675_v48, %v669_v50 }
 0x16a   : > { %v674_v49 = vpop.permute.xlu1 %673 }
 0x16b   : > { %v676_v52 = vmul.f32 %v674_v49, %v668_v47 }
 0x16d   : > { %v678_v55 = vadd.f32 %v676_v52, %v670_v51 }
 0x16e   : > { %v626_v57 = vpop.permute.xlu1 %625 }
 0x16f   : > { %v629_v58 = vmul.f32 %v626_v57, %v621_v53  ;;  %v680_v59 = vpack.c.bf16 %v678_v55, %v677_v54 }
 0x171   : > { %1144 = vmatpush3.bf16.xpose.msra.mxu0 %v680_v59  ;;  %v631_v0 = vadd.f32 %v629_v58, %v623_v62 }
 0x172   : > { %v628_v63 = vpop.permute.xlu1 %627 }
 0x173   : > { %v630_v2 = vmul.f32 %v628_v63, %v622_v61  ;;  %v633_v4 = vmul.f32 0.088388346, %v631_v0 }
 0x175   : > { %v632_v3 = vadd.f32 %v630_v2, %v624_v1 }
 0x177   : > { %v634_v5 = vmul.f32 0.088388346, %v632_v3 }
 0x179   : > { %v635_v6 = vpack.c.bf16 %v634_v5, %v633_v4 }
 0x17b   : > { %1146 = vmatmul.mubr.bf16.vlgmr.msra.gmra.mrb[0].mxu0 %v635_v6 }
 0x24e   : > { %v715_v8 = vpop.f32.mrb[0].mxu0 }
 0x24f   : > { %v1147_v9 = vpop.f32.mrb[1].mxu0  ;;  %v725_v10 = vsel %vm724_vm2, %v715_v8, -inf }
 0x250   : > { %726 = vmax.xlane.f32.xlu0 %v725_v10  ;;  %v718_v11 = vpop.f32.mrb[2].mxu0 }
 0x251   : > { %v1148_v12 = vpop.f32.mrb[3].mxu0  ;;  %v728_v13 = vsel %vm724_vm2, %v718_v11, -inf }
 0x252   : > { %729 = vmax.xlane.f32.xlu1 %v728_v13 }
 0x2dd   : > { %v727_v16 = vpop.xlane.xlu0 %726 }
 0x2de   : > { %v731_v18 = vmax.f32 %v722_v15, %v727_v16 }
 0x2df   : > { %v730_v19 = vpop.xlane.xlu1 %729 }
 0x2e0   : > { %v733_v20 = vsub.f32 %v722_v15, %v731_v18  ;;  %841 = vst.msk [vmem:[#allocation2] sm:$0xff] %vm584_vm1, %v731_v18  ;;  %v732_v21 = vmax.f32 %v723_v17, %v730_v19  ;;  %741 = vperm.xlu0 %1265, %v731_v18  }
 0x2e2   : > { %v734_v22 = vsub.f32 %v723_v17, %v732_v21  ;;  %842 = vst.msk [vmem:[#allocation2 + $0x8] sm:$0xff] %vm584_vm1, %v732_v21  ;;  %746 = vperm.xlu1 %1266, %v732_v21   ;;  %v735_v35 = vmul.f32 1.442695, %v733_v20 }
 0x2e4   : > { %v737_v36 = vmul.f32 1.442695, %v734_v22 }
 0x35f   : > { %v742_v24 = vpop.permute.xlu0 %741 }
 0x360   : > { %v749_v25 = vsub.f32 %v715_v8, %v742_v24 }
 0x361   : > { %v747_v26 = vpop.permute.xlu1 %746 }
 0x362   : > { %v751_v27 = vmul.f32 1.442695, %v749_v25  ;;  %v750_v28 = vsub.f32 %v718_v11, %v747_v26 }
 0x364   : > { %1276 = vpow2.f32 %v751_v27  ;;  %v753_v29 = vmul.f32 1.442695, %v750_v28 }
 0x366   : > { %1278 = vpow2.f32 %v753_v29 }
 0x367   : > { %1280 = vpow2.f32 %v735_v35 }
 0x368   : > { %1282 = vpow2.f32 %v737_v36 }
 0x36e   : > { %v1277_v30 = vpop.eup %1276 }
 0x36f   : > { %v759_v31 = vsel %vm724_vm2, %v1277_v30, 0.0 }
 0x370   : > { %v1279_v32 = vpop.eup %1278  ;;  %760 = vadd.xlane.f32.xlu1 %v759_v31 }
 0x371   : > { %v762_v33 = vsel %vm724_vm2, %v1279_v32, 0.0  ;;  %v784_v34 = vpack.c.bf16 %v1279_v32, %v1277_v30  ;;  %v1281_v37 = vpop.eup %1280 }
 0x372   : > { %763 = vadd.xlane.f32.xlu0 %v762_v33  ;;  %v1283_v39 = vpop.eup %1282  ;;  %v757_v41 = vmul.f32 %v1281_v37, %v755_v38 }
 0x373   : > { %1152 = vmatmul.mubr.msk.bf16.vlgmr.msra.gmra.mrb[0].mxu1 %vm724_vm2, %v784_v34  ;;  %v758_v44 = vmul.f32 %v1283_v39, %v756_v40 }
 0x3fd   : > { %v761_v42 = vpop.xlane.xlu1 %760 }
 0x3fe   : > { %v765_v43 = vadd.f32 %v761_v42, %v757_v41 }
 0x3ff   : > { %v764_v45 = vpop.xlane.xlu0 %763 }
 0x400   : > { %768 = vst.msk [vmem:[#allocation3] sm:$0xff] %vm584_vm1, %v765_v43  ;;  %v766_v46 = vadd.f32 %v764_v45, %v758_v44 }
 0x402   : > { %769 = vst.msk [vmem:[#allocation3 + $0x8] sm:$0xff] %vm584_vm1, %v766_v46 }
 0x407   : > { %v848_v47 = vld [vmem:[#allocation3] sm:$0xff] }
 0x408   : > { %852 = vperm.xlu1 %1266, %v848_v47  }
 0x409   : > { %v849_v48 = vld [vmem:[#allocation3 + $0x8] sm:$0xff] }
 0x40a   : > { %857 = vperm.xlu0 %1265, %v849_v48  }
 0x40c   : > { %774 = vperm.xlu1 %1266, %v1281_v37  }
 0x410   : > { %779 = vperm.xlu1 %1266, %v1283_v39  }
 0x446   : > { %v830_v49 = vpop.f32.mrb[0].mxu1 }
 0x447   : > { %v1153_v50 = vpop.f32.mrb[1].mxu1 }
 0x448   : > { %v833_v51 = vpop.f32.mrb[2].mxu1 }
 0x449   : > { %v1154_v52 = vpop.f32.mrb[3].mxu1 }
 0x487   : > { %v853_v53 = vpop.permute.xlu1 %852 }
 0x488   : > { %1284 = vrcp.f32 %v853_v53 }
 0x489   : > { %v858_v54 = vpop.permute.xlu0 %857 }
 0x48a   : > { %1286 = vrcp.f32 %v858_v54 }
 0x48b   : > { %v775_v55 = vpop.permute.xlu1 %774 }
 0x48c   : > { %v782_v56 = vmul.f32 0.0, %v775_v55 }
 0x48e   : > { %v837_v61 = vadd.f32 %v830_v49, %v782_v56 }
 0x48f   : > { %v780_v57 = vpop.permute.xlu1 %779 }
 0x490   : > { %v783_v58 = vmul.f32 0.0, %v780_v57 }
 0x492   : > { %v1285_v59 = vpop.eup %1284  ;;  %v838_v60 = vadd.f32 %v833_v51, %v783_v58 }
 0x493   : > { %v861_v63 = vmul.f32 %v1285_v59, %v837_v61  ;;  %880 = sbr.rel (!%p1566_p1) target bundleno = 1186 (0x4a2), region = 183 }
 0x494   : > { %v1287_v62 = vpop.eup %1286 }
 0x495   : > { %v863_v0 = vmul.f32 %v1287_v62, %v838_v60 }
 0x497   : > { %v1137_v1 = vpack.c.bf16 %v863_v0, %v861_v63 }
 0x499   : > { %1138 = vst [vmem:[%s555_s6] sm:$0xff] %v1137_v1  }
 0x4a0   : > { %v903_v2 = vld [vmem:[%s555_s6] sm:$0xf]  ;;  %v905_v3 = vld [vmem:[%s555_s6 + $0x4] sm:$0xf] }
 0x4a1   : > { %904 = vst [vmem:[%s887_s22] sm:$0xf] %v903_v2  ;;  %906 = vst [vmem:[%s887_s22 + $0x8] sm:$0xf] %v905_v3 }
 0x4a2 PF: > { %s17_s13 = sadd.s32 1, %s1390_s13   ;;  %s1735_s14 = sld [smem:[#allocation16_spill]] }
 0x4a3   : > { %p1652_p6 = scmp.ge.s32.totalorder %s17_s13, 6   ;;  %s1736_s11 = sld [smem:[#allocation15_spill]] }
 0x4a4   : > { %s1737_s9 = sld [smem:[#allocation12_spill]]  ;;  %s1738_s16 = sld [smem:[#allocation13_spill]] }
 0x4a5   : > { %s1739_s17 = sld [smem:[#allocation14_spill]]  ;;  %s1740_s24 = smov %s1346_s25 }
 0x4a6   : > { %s1741_s25 = smov %s1564_s19  ;;  %s1742_s26 = smov %s1354_s27 }
 0x4a7   : > { %s1743_s27 = smov %s1557_s3  ;;  %s1744_s28 = smov %s1362_s29 }
 0x4a8   : > { %s1745_s29 = smov %s1735_s14  ;;  %s1746_s30 = smov %s1370_s8 }
 0x4a9   : > { %s1747_s8 = smov %s1736_s11  ;;  %s1748_s10 = smov %s1386_s12 }
 0x4aa   : > { %s1749_s11 = smov %s1738_s16  ;;  %16 = sbr.rel (!%p1652_p6) target bundleno = 13 (0xd), region = 277 }
 0x4ab   : > { %s1750_s12 = smov %s1739_s17 }

// kernel: step_video_block_forward.10
= control target key start
LH: loop header
LB: loop body
LE: loop exit
PB: predicated region body
PF: predicated region fallthrough
CT: control target
= control target key end

     0   :  { %s1068_s15 = smov 0   ;;  %s1070_s16 = smov 0   ;;  %s1212_s0 = inlined_call_operand.vmem [shape: bf16[2,16,256], index: 0, kind: input, shape index: {}]   ;;  %s1213_s1 = inlined_call_operand.vmem [shape: bf16[256,256], index: 1, kind: input, shape index: {}]   ;;  %s1214_s2 = inlined_call_operand.vmem [shape: f32[2,1,256], index: 2, kind: input, shape index: {}]   ;;  %s1215_s3 = inlined_call_operand.vmem [shape: f32[2,16,256], index: 3, kind: input, shape index: {}]   ;;  %s1216_s4 = inlined_call_operand.vmem [shape: f32[2,16,256], index: 4, kind: output, shape index: {}]  }
   0x1   :  { %s1072_s17 = smov 0  }
   0x2 LB: > { %s40_s18 = sadd.s32 1, %s1037_s16  ;;  %p897_p0 = scmp.ge.s32.totalorder %s1041_s17, 1  ;;  %s1041_s17 = sphi %s1072_s17, %s14_s17   ;;  %s1037_s16 = sphi %s1070_s16, %s1218_s16   ;;  %s1033_s15 = sphi %s1068_s15, %s1217_s15  }
   0x3   : > { %p42_p1 = scmp.ge.s32.totalorder %s40_s18, 2  ;;  %p267_p2 = scmp.lt.s32.totalorder %s1041_s17, 3 }
   0x5   : > { %s1220_s18 = smov (%p42_p1, %s40_s18), 0  ;;  %p268_p3 = pnand %p897_p0, %p267_p2 }
   0x6   : > { %v968_v0 = vld [vmem:[%s1213_s1 + $0x4] ss:$8 sps:$4 sm:$0xff] (!%p268_p3)   ;;  %v970_v1 = vld [vmem:[%s1213_s1] ss:$8 sps:$4 sm:$0xff] (!%p268_p3)   ;;  %v971_v2 = vld [vmem:[%s1213_s1 + $0x14] ss:$8 sps:$4 sm:$0xff] (!%p268_p3)   ;;  %v688_v34 = vlaneseq (!%p268_p3) }
   0x7   : > { %271 = sbr.rel (%p268_p3) target bundleno = 291 (0x123), region = 36  ;;  %628 = vmatprep.subr.bf16.mxu0 (!%p268_p3), %v968_v0  ;;  %v973_v3 = vld [vmem:[%s1213_s1 + $0x10] ss:$8 sps:$4 sm:$0xff] (!%p268_p3)   ;;  %v974_v4 = vld [vmem:[%s1213_s1 + $0x24] ss:$8 sps:$4 sm:$0xff] (!%p268_p3)   ;;  %p345_p4 = scmp.lt.s32.totalorder (!%p268_p3), %s1033_s15, 1 }
   0x8   : > { %629 = vmatpush1.bf16.msra.mxu0 (!%p268_p3), %v970_v1  ;;  %v976_v5 = vld [vmem:[%s1213_s1 + $0x20] ss:$8 sps:$4 sm:$0xff] (!%p268_p3)   ;;  %v977_v6 = vld [vmem:[%s1213_s1 + $0x34] ss:$8 sps:$4 sm:$0xff] (!%p268_p3)   ;;  %v979_v7 = vld [vmem:[%s1213_s1 + $0x30] ss:$8 sps:$4 sm:$0xff] (!%p268_p3)  }
   0x9   : > { %630 = vmatprep.subr.bf16.mxu0 (!%p268_p3), %v971_v2  ;;  %v980_v8 = vld [vmem:[%s1213_s1 + $0x44] ss:$8 sps:$4 sm:$0xff] (!%p268_p3)   ;;  %v982_v9 = vld [vmem:[%s1213_s1 + $0x40] ss:$8 sps:$4 sm:$0xff] (!%p268_p3)   ;;  %v983_v10 = vld [vmem:[%s1213_s1 + $0x54] ss:$8 sps:$4 sm:$0xff] (!%p268_p3)  }
   0xa   : > { %v985_v11 = vld [vmem:[%s1213_s1 + $0x50] ss:$8 sps:$4 sm:$0xff] (!%p268_p3)   ;;  %v986_v12 = vld [vmem:[%s1213_s1 + $0x64] ss:$8 sps:$4 sm:$0xff] (!%p268_p3)   ;;  %v988_v14 = vld [vmem:[%s1213_s1 + $0x60] ss:$8 sps:$4 sm:$0xff] (!%p268_p3)  }
   0xb   : > { %v989_v15 = vld [vmem:[%s1213_s1 + $0x74] ss:$8 sps:$4 sm:$0xff] (!%p268_p3)   ;;  %v991_v16 = vld [vmem:[%s1213_s1 + $0x70] ss:$8 sps:$4 sm:$0xff] (!%p268_p3)   ;;  %v992_v17 = vld [vmem:[%s1213_s1 + $0x84] ss:$8 sps:$4 sm:$0xff] (!%p268_p3)  }
   0xc   : > { %631 = vmatpush1.bf16.msra.mxu0 (!%p268_p3), %v973_v3  ;;  %v994_v18 = vld [vmem:[%s1213_s1 + $0x80] ss:$8 sps:$4 sm:$0xff] (!%p268_p3)   ;;  %v995_v19 = vld [vmem:[%s1213_s1 + $0x94] ss:$8 sps:$4 sm:$0xff] (!%p268_p3)   ;;  %v997_v20 = vld [vmem:[%s1213_s1 + $0x90] ss:$8 sps:$4 sm:$0xff] (!%p268_p3)  }
   0xd   : > { %632 = vmatprep.subr.bf16.mxu0 (!%p268_p3), %v974_v4  ;;  %v998_v21 = vld [vmem:[%s1213_s1 + $0xa4] ss:$8 sps:$4 sm:$0xff] (!%p268_p3)   ;;  %v1000_v22 = vld [vmem:[%s1213_s1 + $0xa0] ss:$8 sps:$4 sm:$0xff] (!%p268_p3)   ;;  %v1001_v23 = vld [vmem:[%s1213_s1 + $0xb4] ss:$8 sps:$4 sm:$0xff] (!%p268_p3)  }
   0xe   : > { %s1222_s15 = smov (!%p345_p4, %s1033_s15), 1  ;;  %v1003_v24 = vld [vmem:[%s1213_s1 + $0xb0] ss:$8 sps:$4 sm:$0xff]   ;;  %v1004_v25 = vld [vmem:[%s1213_s1 + $0xc4] ss:$8 sps:$4 sm:$0xff]   ;;  %v689_v35 = vshrl.u32 %v688_v34, 7 }
   0xf   : > { %s941_s19 = sshll.u32 %s1222_s15, 4  ;;  %v1006_v26 = vld [vmem:[%s1213_s1 + $0xc0] ss:$8 sps:$4 sm:$0xff]   ;;  %v1007_v27 = vld [vmem:[%s1213_s1 + $0xd4] ss:$8 sps:$4 sm:$0xff]   ;;  %s900_s22 = sshll.u32 %s1222_s15, 1 }
  0x10   : > { %633 = vmatpush1.bf16.msra.mxu0 %v976_v5  ;;  %s1128_s24 = scalar_lea.vmem %s1212_s0, %s941_s19  ;;  %v1009_v28 = vld [vmem:[%s1213_s1 + $0xd0] ss:$8 sps:$4 sm:$0xff]   ;;  %v1010_v29 = vld [vmem:[%s1213_s1 + $0xe4] ss:$8 sps:$4 sm:$0xff]   ;;  %v1012_v30 = vld [vmem:[%s1213_s1 + $0xe0] ss:$8 sps:$4 sm:$0xff]   ;;  %s378_s26 = scalar_lea.vmem %s1214_s2, %s900_s22 }
  0x11   : > { %634 = vmatprep.subr.bf16.mxu0 %v977_v6  ;;  %v1018_v13 = vld [vmem:[%s1128_s24 + $0x4] ss:$8 sps:$4 sm:$0xff]   ;;  %v1013_v31 = vld [vmem:[%s1213_s1 + $0xf4] ss:$8 sps:$4 sm:$0xff]   ;;  %v1015_v32 = vld [vmem:[%s1213_s1 + $0xf0] ss:$8 sps:$4 sm:$0xff]  }
  0x12   : > { %660 = vmatprep.mubr.bf16.mxu0 %v1018_v13  ;;  %v1016_v33 = vld [vmem:[%s1128_s24] ss:$8 sps:$4 sm:$0xff]   ;;  %v690_v36 = vsub.s32 0, %v689_v35  ;;  %s942_s27 = sshll.u32 %s1222_s15, 5  ;;  %v694_v38 = vsub.s32 1, %v689_v35 }
  0x13   : > { %v686_v37 = vld [vmem:[%s378_s26] sm:$0x3]  ;;  %s393_s30 = scalar_lea.vmem %s1215_s3, %s942_s27  ;;  %s409_s6 = scalar_lea.vmem %s1216_s4, %s942_s27 }
  0x14   : > { %635 = vmatpush1.bf16.msra.mxu0 %v979_v7  ;;  %v691_v39 = vrot.slane %v686_v37, %v690_v36  ;;  %v695_v40 = vrot.slane %v686_v37, %v694_v38  ;;  %v702_v42 = vld [vmem:[%s393_s30] sm:$0xff]  ;;  %v703_v45 = vld [vmem:[%s393_s30 + $0x8] sm:$0xff]  ;;  %v704_v48 = vld [vmem:[%s393_s30 + $0x10] sm:$0xff] }
  0x15   : > { %636 = vmatprep.subr.bf16.mxu0 %v980_v8  ;;  %v705_v52 = vld [vmem:[%s393_s30 + $0x18] sm:$0xff] }
  0x18   : > { %637 = vmatpush1.bf16.msra.mxu0 %v982_v9 }
  0x19   : > { %638 = vmatprep.subr.bf16.mxu0 %v983_v10 }
  0x1c   : > { %639 = vmatpush1.bf16.msra.mxu0 %v985_v11 }
  0x1d   : > { %640 = vmatprep.subr.bf16.mxu0 %v986_v12 }
  0x20   : > { %641 = vmatpush1.bf16.msra.mxu0 %v988_v14 }
  0x21   : > { %642 = vmatprep.subr.bf16.mxu0 %v989_v15 }
  0x24   : > { %643 = vmatpush1.bf16.msra.mxu0 %v991_v16 }
  0x25   : > { %644 = vmatprep.subr.bf16.mxu0 %v992_v17 }
  0x28   : > { %645 = vmatpush1.bf16.msra.mxu0 %v994_v18 }
  0x29   : > { %646 = vmatprep.subr.bf16.mxu0 %v995_v19 }
  0x2c   : > { %647 = vmatpush1.bf16.msra.mxu0 %v997_v20 }
  0x2d   : > { %648 = vmatprep.subr.bf16.mxu0 %v998_v21 }
  0x30   : > { %649 = vmatpush1.bf16.msra.mxu0 %v1000_v22 }
  0x31   : > { %650 = vmatprep.subr.bf16.mxu0 %v1001_v23 }
  0x34   : > { %651 = vmatpush1.bf16.msra.mxu0 %v1003_v24 }
  0x35   : > { %652 = vmatprep.subr.bf16.mxu0 %v1004_v25 }
  0x38   : > { %653 = vmatpush1.bf16.msra.mxu0 %v1006_v26 }
  0x39   : > { %654 = vmatprep.subr.bf16.mxu0 %v1007_v27 }
  0x3c   : > { %655 = vmatpush1.bf16.msra.mxu0 %v1009_v28 }
  0x3d   : > { %656 = vmatprep.subr.bf16.mxu0 %v1010_v29 }
  0x40   : > { %657 = vmatpush1.bf16.msra.mxu0 %v1012_v30 }
  0x41   : > { %658 = vmatprep.subr.bf16.mxu0 %v1013_v31 }
  0x44   : > { %659 = vmatpush1.bf16.msra.mxu0 %v1015_v32 }
  0x47   : > { %661 = vmatmul.mubr.bf16.vlgmr.msra.gmra.mrb[0].mxu0 %v1016_v33 }
 0x11a   : > { %v662_v41 = vpop.f32.mrb[0].mxu0 }
 0x11b   : > { %v698_v43 = vmul.f32 %v691_v39, %v662_v41  ;;  %v664_v44 = vpop.f32.mrb[1].mxu0 }
 0x11c   : > { %v699_v46 = vmul.f32 %v695_v40, %v664_v44  ;;  %v666_v47 = vpop.f32.mrb[2].mxu0 }
 0x11d   : > { %v706_v49 = vadd.f32 %v702_v42, %v698_v43  ;;  %v700_v50 = vmul.f32 %v691_v39, %v666_v47  ;;  %v668_v51 = vpop.f32.mrb[3].mxu0 }
 0x11e   : > { %v707_v53 = vadd.f32 %v703_v45, %v699_v46  ;;  %v701_v54 = vmul.f32 %v695_v40, %v668_v51 }
 0x11f   : > { %710 = vst [vmem:[%s409_s6] sm:$0xff] %v706_v49  ;;  %v708_v55 = vadd.f32 %v704_v48, %v700_v50 }
 0x120   : > { %711 = vst [vmem:[%s409_s6 + $0x8] sm:$0xff] %v707_v53  ;;  %v709_v56 = vadd.f32 %v705_v52, %v701_v54 }
 0x121   : > { %712 = vst [vmem:[%s409_s6 + $0x10] sm:$0xff] %v708_v55 }
 0x122   : > { %713 = vst [vmem:[%s409_s6 + $0x18] sm:$0xff] %v709_v56 }
 0x123 PF: > { %s14_s17 = sadd.s32 1, %s1041_s17   ;;  %s1217_s15 = smov %s1037_s16 }
 0x124   : > { %p11_p5 = scmp.ge.s32.totalorder %s14_s17, 4   ;;  %s1218_s16 = smov %s1220_s18 }
 0x126   :  { %13 = sbr.rel (!%p11_p5) target bundleno = 2 (0x2), region = 83 }

// kernel: step_video_block_forward.11
= control target key start
LH: loop header
LB: loop body
LE: loop exit
PB: predicated region body
PF: predicated region fallthrough
CT: control target
= control target key end

     0   :  { %s852_s9 = smov 0   ;;  %s854_s10 = smov 0   ;;  %s991_s0 = inlined_call_operand.vmem [shape: f32[2,16,256], index: 0, kind: input, shape index: {}]   ;;  %s992_s1 = inlined_call_operand.vmem [shape: bf16[256,256], index: 1, kind: input, shape index: {}]   ;;  %s993_s2 = inlined_call_operand.vmem [shape: bf16[2,16,256], index: 2, kind: output, shape index: {}]  }
   0x1   :  { %s856_s11 = smov 0  }
   0x2 LB: > { %s38_s12 = sadd.s32 1, %s831_s10  ;;  %p696_p0 = scmp.ge.s32.totalorder %s835_s11, 1  ;;  %s835_s11 = sphi %s856_s11, %s12_s11   ;;  %s831_s10 = sphi %s854_s10, %s995_s10   ;;  %s827_s9 = sphi %s852_s9, %s994_s9  }
   0x3   : > { %p40_p1 = scmp.ge.s32.totalorder %s38_s12, 2  ;;  %p176_p2 = scmp.lt.s32.totalorder %s835_s11, 3 }
   0x5   : > { %s997_s12 = smov (%p40_p1, %s38_s12), 0  ;;  %p177_p3 = pnand %p696_p0, %p176_p2 }
   0x6   : > { %v765_v0 = vld [vmem:[%s992_s1 + $0x4] ss:$8 sps:$4 sm:$0xff] (!%p177_p3)   ;;  %v767_v1 = vld [vmem:[%s992_s1] ss:$8 sps:$4 sm:$0xff] (!%p177_p3)   ;;  %v768_v2 = vld [vmem:[%s992_s1 + $0x14] ss:$8 sps:$4 sm:$0xff] (!%p177_p3)  }
   0x7   : > { %180 = sbr.rel (%p177_p3) target bundleno = 289 (0x121), region = 28  ;;  %480 = vmatprep.subr.bf16.mxu0 (!%p177_p3), %v765_v0  ;;  %v770_v3 = vld [vmem:[%s992_s1 + $0x10] ss:$8 sps:$4 sm:$0xff] (!%p177_p3)   ;;  %v771_v4 = vld [vmem:[%s992_s1 + $0x24] ss:$8 sps:$4 sm:$0xff] (!%p177_p3)   ;;  %p228_p4 = scmp.lt.s32.totalorder (!%p177_p3), %s827_s9, 1 }
   0x8   : > { %481 = vmatpush1.bf16.msra.mxu0 (!%p177_p3), %v767_v1  ;;  %v773_v5 = vld [vmem:[%s992_s1 + $0x20] ss:$8 sps:$4 sm:$0xff] (!%p177_p3)   ;;  %v774_v6 = vld [vmem:[%s992_s1 + $0x34] ss:$8 sps:$4 sm:$0xff] (!%p177_p3)   ;;  %v776_v7 = vld [vmem:[%s992_s1 + $0x30] ss:$8 sps:$4 sm:$0xff] (!%p177_p3)  }
   0x9   : > { %482 = vmatprep.subr.bf16.mxu0 (!%p177_p3), %v768_v2  ;;  %v777_v8 = vld [vmem:[%s992_s1 + $0x44] ss:$8 sps:$4 sm:$0xff] (!%p177_p3)   ;;  %v779_v9 = vld [vmem:[%s992_s1 + $0x40] ss:$8 sps:$4 sm:$0xff] (!%p177_p3)   ;;  %v780_v10 = vld [vmem:[%s992_s1 + $0x54] ss:$8 sps:$4 sm:$0xff] (!%p177_p3)  }
   0xa   : > { %v782_v11 = vld [vmem:[%s992_s1 + $0x50] ss:$8 sps:$4 sm:$0xff] (!%p177_p3)   ;;  %v783_v12 = vld [vmem:[%s992_s1 + $0x64] ss:$8 sps:$4 sm:$0xff] (!%p177_p3)   ;;  %v785_v16 = vld [vmem:[%s992_s1 + $0x60] ss:$8 sps:$4 sm:$0xff] (!%p177_p3)  }
   0xb   : > { %v786_v17 = vld [vmem:[%s992_s1 + $0x74] ss:$8 sps:$4 sm:$0xff] (!%p177_p3)   ;;  %v788_v18 = vld [vmem:[%s992_s1 + $0x70] ss:$8 sps:$4 sm:$0xff] (!%p177_p3)   ;;  %v789_v19 = vld [vmem:[%s992_s1 + $0x84] ss:$8 sps:$4 sm:$0xff] (!%p177_p3)  }
   0xc   : > { %483 = vmatpush1.bf16.msra.mxu0 (!%p177_p3), %v770_v3  ;;  %v791_v20 = vld [vmem:[%s992_s1 + $0x80] ss:$8 sps:$4 sm:$0xff] (!%p177_p3)   ;;  %v792_v21 = vld [vmem:[%s992_s1 + $0x94] ss:$8 sps:$4 sm:$0xff] (!%p177_p3)   ;;  %v794_v22 = vld [vmem:[%s992_s1 + $0x90] ss:$8 sps:$4 sm:$0xff] (!%p177_p3)  }
   0xd   : > { %484 = vmatprep.subr.bf16.mxu0 (!%p177_p3), %v771_v4  ;;  %v795_v23 = vld [vmem:[%s992_s1 + $0xa4] ss:$8 sps:$4 sm:$0xff] (!%p177_p3)   ;;  %v797_v24 = vld [vmem:[%s992_s1 + $0xa0] ss:$8 sps:$4 sm:$0xff] (!%p177_p3)   ;;  %v798_v25 = vld [vmem:[%s992_s1 + $0xb4] ss:$8 sps:$4 sm:$0xff] (!%p177_p3)  }
   0xe   : > { %s999_s9 = smov (!%p228_p4, %s827_s9), 1  ;;  %v800_v26 = vld [vmem:[%s992_s1 + $0xb0] ss:$8 sps:$4 sm:$0xff]   ;;  %v801_v27 = vld [vmem:[%s992_s1 + $0xc4] ss:$8 sps:$4 sm:$0xff]  }
   0xf   : > { %s737_s5 = sshll.u32 %s999_s9, 5  ;;  %v803_v28 = vld [vmem:[%s992_s1 + $0xc0] ss:$8 sps:$4 sm:$0xff]   ;;  %v804_v29 = vld [vmem:[%s992_s1 + $0xd4] ss:$8 sps:$4 sm:$0xff]   ;;  %s738_s6 = sshll.u32 %s999_s9, 4 }
  0x10   : > { %485 = vmatpush1.bf16.msra.mxu0 %v773_v5  ;;  %s909_s14 = scalar_lea.vmem %s991_s0, %s737_s5  ;;  %v806_v30 = vld [vmem:[%s992_s1 + $0xd0] ss:$8 sps:$4 sm:$0xff]   ;;  %v807_v31 = vld [vmem:[%s992_s1 + $0xe4] ss:$8 sps:$4 sm:$0xff]   ;;  %v809_v32 = vld [vmem:[%s992_s1 + $0xe0] ss:$8 sps:$4 sm:$0xff]   ;;  %s267_s13 = scalar_lea.vmem %s993_s2, %s738_s6 }
  0x11   : > { %486 = vmatprep.subr.bf16.mxu0 %v774_v6  ;;  %v279_v13 = vld [vmem:[%s909_s14 + $0x8] sm:$0xff]  ;;  %v281_v14 = vld [vmem:[%s909_s14 + $0x18] sm:$0xff]  ;;  %v278_v35 = vld [vmem:[%s909_s14] sm:$0xff] }
  0x12   : > { %v287_v15 = vpack.c.bf16 %v281_v14, %v279_v13  ;;  %v810_v33 = vld [vmem:[%s992_s1 + $0xf4] ss:$8 sps:$4 sm:$0xff]   ;;  %v812_v34 = vld [vmem:[%s992_s1 + $0xf0] ss:$8 sps:$4 sm:$0xff]  }
  0x13   : > { %v280_v36 = vld [vmem:[%s909_s14 + $0x10] sm:$0xff] }
  0x14   : > { %487 = vmatpush1.bf16.msra.mxu0 %v776_v7  ;;  %512 = vmatprep.mubr.bf16.mxu0 %v287_v15  ;;  %v286_v37 = vpack.c.bf16 %v280_v36, %v278_v35 }
  0x15   : > { %488 = vmatprep.subr.bf16.mxu0 %v777_v8 }
  0x18   : > { %489 = vmatpush1.bf16.msra.mxu0 %v779_v9 }
  0x19   : > { %490 = vmatprep.subr.bf16.mxu0 %v780_v10 }
  0x1c   : > { %491 = vmatpush1.bf16.msra.mxu0 %v782_v11 }
  0x1d   : > { %492 = vmatprep.subr.bf16.mxu0 %v783_v12 }
  0x20   : > { %493 = vmatpush1.bf16.msra.mxu0 %v785_v16 }
  0x21   : > { %494 = vmatprep.subr.bf16.mxu0 %v786_v17 }
  0x24   : > { %495 = vmatpush1.bf16.msra.mxu0 %v788_v18 }
  0x25   : > { %496 = vmatprep.subr.bf16.mxu0 %v789_v19 }
  0x28   : > { %497 = vmatpush1.bf16.msra.mxu0 %v791_v20 }
  0x29   : > { %498 = vmatprep.subr.bf16.mxu0 %v792_v21 }
  0x2c   : > { %499 = vmatpush1.bf16.msra.mxu0 %v794_v22 }
  0x2d   : > { %500 = vmatprep.subr.bf16.mxu0 %v795_v23 }
  0x30   : > { %501 = vmatpush1.bf16.msra.mxu0 %v797_v24 }
  0x31   : > { %502 = vmatprep.subr.bf16.mxu0 %v798_v25 }
  0x34   : > { %503 = vmatpush1.bf16.msra.mxu0 %v800_v26 }
  0x35   : > { %504 = vmatprep.subr.bf16.mxu0 %v801_v27 }
  0x38   : > { %505 = vmatpush1.bf16.msra.mxu0 %v803_v28 }
  0x39   : > { %506 = vmatprep.subr.bf16.mxu0 %v804_v29 }
  0x3c   : > { %507 = vmatpush1.bf16.msra.mxu0 %v806_v30 }
  0x3d   : > { %508 = vmatprep.subr.bf16.mxu0 %v807_v31 }
  0x40   : > { %509 = vmatpush1.bf16.msra.mxu0 %v809_v32 }
  0x41   : > { %510 = vmatprep.subr.bf16.mxu0 %v810_v33 }
  0x44   : > { %511 = vmatpush1.bf16.msra.mxu0 %v812_v34 }
  0x47   : > { %513 = vmatmul.mubr.bf16.vlgmr.msra.gmra.mrb[0].mxu0 %v286_v37 }
 0x11a   : > { %v514_v38 = vpop.f32.mrb[0].mxu0 }
 0x11b   : > { %v516_v39 = vpop.f32.mrb[1].mxu0 }
 0x11c   : > { %v739_v40 = vpack.c.bf16 %v516_v39, %v514_v38  ;;  %v518_v41 = vpop.f32.mrb[2].mxu0 }
 0x11d   : > { %v520_v42 = vpop.f32.mrb[3].mxu0 }
 0x11e   : > { %550 = vst [vmem:[%s267_s13] sm:$0xff] %v739_v40  ;;  %v740_v43 = vpack.c.bf16 %v520_v42, %v518_v41 }
 0x120   : > { %551 = vst [vmem:[%s267_s13 + $0x8] sm:$0xff] %v740_v43 }
 0x121 PF: > { %s12_s11 = sadd.s32 1, %s835_s11   ;;  %s994_s9 = smov %s831_s10 }
 0x122   : > { %p9_p5 = scmp.ge.s32.totalorder %s12_s11, 4   ;;  %s995_s10 = smov %s997_s12 }
 0x124   :  { %11 = sbr.rel (!%p9_p5) target bundleno = 2 (0x2), region = 69 }

// kernel: step_video_block_forward.13
= control target key start
LH: loop header
LB: loop body
LE: loop exit
PB: predicated region body
PF: predicated region fallthrough
CT: control target
= control target key end

     0   :  { %s1440_s0 = inlined_call_operand.vmem [shape: bf16[2,16,256], index: 0, kind: input, shape index: {}]   ;;  %s1441_s1 = inlined_call_operand.vmem [shape: bf16[2,16,512], index: 1, kind: input, shape index: {}, may-alias: {1,2}]   ;;  %s1442_s2 = inlined_call_operand.vmem [shape: bf16[2,16,512], index: 2, kind: input, shape index: {}, may-alias: {1,2}]   ;;  %s1443_s3 = inlined_call_operand.vmem [shape: f32[1,128], index: 3, kind: input, shape index: {}]   ;;  %s1444_s4 = inlined_call_operand.vmem [shape: f32[1,128], index: 4, kind: input, shape index: {}]   ;;  %s1445_s5 = inlined_call_operand.vmem [shape: bf16[2,16,256], index: 5, kind: output, shape index: {}]  }
   0x1   :  { %1449 = sst [smem:[#allocation15_spill]] %s1443_s3 }
   0x2   :  { %1450 = sst [smem:[#allocation16_spill]] %s1445_s5 }
   0x3   :  { %s1225_s18 = smov 0   ;;  %s1227_s19 = smov 0  }
   0x4   :  { %s1229_s20 = smov 0   ;;  %s1231_s21 = smov 0  }
   0x5   :  { %s1233_s22 = smov 0   ;;  %s1235_s23 = smov 0  }
   0x6   :  { %s1237_s24 = smov 0   ;;  %s1239_s25 = smov 0  }
   0x7   :  { %s1241_s26 = smov 0   ;;  %s1243_s27 = smov 0  }
   0x8   :  { %s1245_s28 = smov 0  }
   0x9 LB: > { %1451 = sst [smem:[#allocation10_spill]] %s1173_s24  ;;  %s37_s30 = sadd.s32 1, %s1181_s26  ;;  %s1189_s28 = sphi %s1245_s28, %s15_s28   ;;  %s1185_s27 = sphi %s1243_s27, %s1475_s27   ;;  %s1181_s26 = sphi %s1241_s26, %s1466_s26   ;;  %s1177_s25 = sphi %s1239_s25, %s1474_s25   ;;  %s1173_s24 = sphi %s1237_s24, %s1465_s24   ;;  %s1169_s23 = sphi %s1235_s23, %s1473_s23   ;;  %s1165_s22 = sphi %s1233_s22, %s1472_s22   ;;  %s1161_s21 = sphi %s1231_s21, %s1471_s21   ;;  %s1157_s20 = sphi %s1229_s20, %s1470_s20   ;;  %s1153_s19 = sphi %s1227_s19, %s1469_s19   ;;  %s1149_s18 = sphi %s1225_s18, %s1468_s18  }
   0xa   : > { %1452 = sst [smem:[#allocation11_spill]] %s1177_s25  ;;  %p39_p0 = scmp.ge.s32.totalorder %s37_s30, 2 }
   0xb   : > { %1453 = sst [smem:[#allocation12_spill]] %s1181_s26  ;;  %s41_s6 = sadd.s32 1, %s1185_s27 }
   0xc   : > { %s52_s7 = sadd.s32 1, %s1169_s23  ;;  %p59_p1 = scmp.ne.s32.totalorder %s1169_s23, %s1165_s22 }
   0xd   : > { %s1477_s30 = smov (%p39_p0, %s37_s30), 0  ;;  %s1479_s6 = smov (!%p39_p0, %s41_s6), %s1185_s27 }
   0xe   : > { %1454 = sst [smem:[#allocation13_spill]] %s1477_s30  ;;  %s48_s8 = ssub.s32 %s1181_s26, %s1477_s30 }
   0xf   : > { %p60_p2 = scmp.eq.s32.totalorder %s1189_s28, 0  ;;  %p43_p3 = scmp.ge.s32.totalorder %s1479_s6, 2 }
  0x10   : > { %s1293_s9 = sshll.u32 %s1181_s26, 1  ;;  %s923_s11 = sshll.u32 %s1477_s30, 1 }
  0x11   : > { %p1300_p4 = por %p60_p2, %p59_p1  ;;  %s1481_s6 = smov (%p43_p3, %s1479_s6), 0 }
  0x12   : > { %1456 = sst [smem:[#allocation14_spill]] %s1481_s6  ;;  %s80_s12 = ssub.s32 %s1293_s9, %s923_s11 }
  0x13   : > { %s84_s13 = sadd.s32 1, %s1161_s21  ;;  %s45_s14 = ssub.s32 %s1185_s27, %s1481_s6 }
  0x14   : > { %p91_p5 = scmp.ne.s32.totalorder %s1161_s21, %s1157_s20  ;;  %s49_s15 = sor.u32 %s48_s8, %s45_s14 }
  0x15   : > { %s81_s16 = sor.u32 %s80_s12, %s45_s14  ;;  %p50_p6 = scmp.eq.s32.totalorder %s49_s15, 0 }
  0x16   : > { %p82_p7 = scmp.eq.s32.totalorder %s81_s16, 0  ;;  %p1315_p8 = por %p91_p5, %p60_p2 }
  0x17   : > { %s108_s29 = sadd.s32 1, %s1293_s9  ;;  %s110_s6 = sadd.s32 1, %s923_s11 }
  0x18   : > { %s1321_s30 = scalar_select %p50_p6, %s1169_s23, %s52_s7  }
  0x19   : > { %s1324_s5 = scalar_select %p82_p7, %s1161_s21, %s84_s13  }
  0x1a   : > { %s118_s24 = sadd.s32 1, %s1153_s19  ;;  %s114_s25 = ssub.s32 %s108_s29, %s110_s6 }
  0x1b   : > { %p125_p9 = scmp.ne.s32.totalorder %s1153_s19, %s1149_s18  ;;  %s115_s8 = sor.u32 %s114_s25, %s45_s14 }
  0x1c   : > { %s1458_s3 = sadd.s32 4294967295, %s1189_s28   ;;  %p116_p11 = scmp.eq.s32.totalorder %s115_s8, 0 }
  0x1d   : > { %p201_p10 = scmp.eq.s32.totalorder %s1458_s3, 3  ;;  %p1333_p12 = por %p125_p9, %p60_p2 }
  0x1e   : > { %s1345_s7 = scalar_select %p116_p11, %s1153_s19, %s118_s24  }
  0x1f   : > { %p1340_p13 = por %p201_p10, %p59_p1  ;;  %p927_p0 = scmp.ge.s32.totalorder %s1189_s28, 4 }
  0x21   : > { %229 = sbr.rel (%p927_p0) target bundleno = 61 (0x3d), region = 24 }
  0x28   : > { %232 = sbr.rel (!%p1300_p4) target bundleno = 47 (0x2f), region = 28  ;;  %s234_s3 = sand.u32 (%p1300_p4), 1, %s1169_s23  }
  0x29   : > { %s929_s25 = sshll.u32 (%p1300_p4), %s1185_s27, 2  ;;  %s928_s29 = sshll.u32 (%p1300_p4), %s234_s3, 3 }
  0x2a   : > { %s241_s6 = sadd.s32 (%p1300_p4), %s1181_s26, %s929_s25  ;;  %s236_s24 = scalar_lea.vmem (%p1300_p4), [#allocation6], %s928_s29 }
  0x2b   : > { %s930_s11 = sshll.u32 (%p1300_p4), %s241_s6, 2 }
  0x2c   : > { %s243_s16 = scalar_lea.vmem (%p1300_p4), %s1440_s0, %s930_s11 }
  0x2d   : > { %v259_v0 = vld [vmem:[%s243_s16] sm:$0xf] (%p1300_p4)  ;;  %v261_v1 = vld [vmem:[%s243_s16 + $0x8] sm:$0xf] (%p1300_p4) }
  0x2e   : > { %260 = vst [vmem:[%s236_s24] sm:$0xf] (%p1300_p4), %v259_v0  ;;  %262 = vst [vmem:[%s236_s24 + $0x4] sm:$0xf] (%p1300_p4), %v261_v1 }
  0x2f PF: > { %289 = sbr.rel (!%p1315_p8) target bundleno = 54 (0x36), region = 69  ;;  %s291_s10 = sand.u32 (%p1315_p8), 1, %s1161_s21  }
  0x30   : > { %s933_s8 = sshll.u32 (%p1315_p8), %s1185_s27, 3  ;;  %s931_s3 = sshll.u32 (%p1315_p8), %s291_s10, 3 }
  0x31   : > { %s299_s25 = sadd.s32 (%p1315_p8), %s933_s8, %s1293_s9  ;;  %s293_s29 = scalar_lea.vmem (%p1315_p8), [#allocation7], %s931_s3 }
  0x32   : > { %s934_s6 = sshll.u32 (%p1315_p8), %s299_s25, 2 }
  0x33   : > { %s301_s11 = scalar_lea.vmem (%p1315_p8), %s1441_s1, %s934_s6 }
  0x34   : > { %v317_v2 = vld [vmem:[%s301_s11] sm:$0xf] (%p1315_p8)  ;;  %v319_v3 = vld [vmem:[%s301_s11 + $0x10] sm:$0xf] (%p1315_p8) }
  0x35   : > { %318 = vst [vmem:[%s293_s29] sm:$0xf] (%p1315_p8), %v317_v2  ;;  %320 = vst [vmem:[%s293_s29 + $0x4] sm:$0xf] (%p1315_p8), %v319_v3 }
  0x36 PF: > { %347 = sbr.rel (!%p1333_p12) target bundleno = 61 (0x3d), region = 110  ;;  %s349_s17 = sand.u32 (%p1333_p12), 1, %s1153_s19  }
  0x37   : > { %s937_s14 = sshll.u32 (%p1333_p12), %s1185_s27, 3  ;;  %s935_s16 = sshll.u32 (%p1333_p12), %s349_s17, 3 }
  0x38   : > { %s826_s24 = sadd.s32 (%p1333_p12), %s937_s14, %s1293_s9  ;;  %s351_s3 = scalar_lea.vmem (%p1333_p12), [#allocation8], %s935_s16 }
  0x39   : > { %s938_s10 = sshll.u32 (%p1333_p12), %s826_s24, 2 }
  0x3a   : > { %s828_s25 = scalar_lea.vmem (%p1333_p12), %s1442_s2, %s938_s10 }
  0x3b   : > { %v939_v4 = vld [vmem:[%s828_s25 + $0x4] sm:$0xf] (%p1333_p12)  ;;  %v940_v5 = vld [vmem:[%s828_s25 + $0x14] sm:$0xf] (%p1333_p12) }
  0x3c   : > { %377 = vst [vmem:[%s351_s3] sm:$0xf] (%p1333_p12), %v939_v4  ;;  %379 = vst [vmem:[%s351_s3 + $0x4] sm:$0xf] (%p1333_p12), %v940_v5 }
  0x3d PF: > { %p941_p1 = scmp.ge.s32.totalorder %s1189_s28, 1  ;;  %p405_p2 = scmp.lt.s32.totalorder %s1189_s28, 5 }
  0x3f   : > { %p406_p3 = pnand %p941_p1, %p405_p2 }
  0x40   : > { %s419_s9 = sand.u32 (!%p406_p3), 1, %s1157_s20   ;;  %s412_s12 = sand.u32 (!%p406_p3), 1, %s1165_s22   ;;  %v1191_v16 = vmov (!%p406_p3), 0.0   ;;  %vm1192_vm0 = vmmov (!%p406_p3), 0   ;;  %v947_v33 = vld [vmem:[%s1444_s4] ss:$0 sm:$0xff] (!%p406_p3) }
  0x41   : > { %409 = sbr.rel (%p406_p3) target bundleno = 1055 (0x41f), region = 151  ;;  %s943_s6 = sshll.u32 (!%p406_p3), %s419_s9, 3  ;;  %976 = vmatprep.subr.bf16.mxu0 (!%p406_p3), %v1191_v16  ;;  %982 = vmatprep.subr.bf16.mxu1 (!%p406_p3), %v1191_v16  ;;  %vm472_vm1 = vcmask (!%p406_p3), 7168   ;;  %v1193_v47 = vmov (!%p406_p3), -inf   ;;  %vm584_vm2 = vcmask (!%p406_p3), 130048   ;;  %v1194_v54 = vmov (!%p406_p3), 0  }
  0x42   : > { %s1376_s13 = sshll.u32 (!%p406_p3), %s412_s12, 3  ;;  %s421_s11 = scalar_lea.vmem (!%p406_p3), [#allocation7], %s943_s6  ;;  %978 = vmatprep.mubr.msk.bf16.mxu0 (!%p406_p3), %vm1192_vm0, %v1191_v16  ;;  %984 = vmatprep.mubr.msk.bf16.mxu1 (!%p406_p3), %vm1192_vm0, %v1191_v16  ;;  %473 = vst.msk [vmem:[#allocation2] sm:$0xff] (!%p406_p3), %vm472_vm1, %v1193_v47  ;;  %474 = vst.msk [vmem:[#allocation2 + $0x8] sm:$0xff] (!%p406_p3), %vm472_vm1, %v1193_v47 }
  0x43   : > { %v964_v6 = vld [vmem:[%s421_s11] sm:$0xff] (!%p406_p3)   ;;  %s414_s29 = scalar_lea.vmem (!%p406_p3), [#allocation6], %s1376_s13  ;;  %s1461_s16 = sld [smem:[#allocation15_spill]] (!%p406_p3)  ;;  %475 = vst.msk [vmem:[#allocation3] sm:$0xff] (!%p406_p3), %vm472_vm1, %v1191_v16  ;;  %476 = vst.msk [vmem:[#allocation3 + $0x8] sm:$0xff] (!%p406_p3), %vm472_vm1, %v1191_v16  ;;  %1080 = vset.pattern.permute.xlu0 (!%p406_p3), %v1194_v54  ;;  %1081 = vset.pattern.permute.xlu1 (!%p406_p3), %v1194_v54 }
  0x44   : > { %v960_v7 = vld [vmem:[%s414_s29] sm:$0xff] (!%p406_p3)   ;;  %v965_v8 = vunpack.c.l.bf16 (!%p406_p3), %v964_v6  ;;  %v966_v10 = vunpack.c.h.bf16 (!%p406_p3), %v964_v6  ;;  %s426_s24 = sand.u32 (!%p406_p3), 1, %s1149_s18   ;;  %s459_s18 = scalar_lea.vmem (!%p406_p3), [#allocation9], %s1376_s13 }
  0x45   : > { %v961_v9 = vunpack.c.l.bf16 (!%p406_p3), %v960_v7  ;;  %v962_v11 = vunpack.c.h.bf16 (!%p406_p3), %v960_v7  ;;  %s944_s10 = sshll.u32 (!%p406_p3), %s426_s24, 3 }
  0x46   : > { %v515_v12 = vmul.f32 (!%p406_p3), %v965_v8, %v965_v8  ;;  %v516_v14 = vmul.f32 (!%p406_p3), %v966_v10, %v966_v10  ;;  %s428_s8 = scalar_lea.vmem (!%p406_p3), [#allocation8], %s944_s10 }
  0x47   : > { %v483_v13 = vmul.f32 (!%p406_p3), %v961_v9, %v961_v9  ;;  %v484_v15 = vmul.f32 (!%p406_p3), %v962_v11, %v962_v11  ;;  %v1082_v63 = vld [vmem:[%s428_s8] sm:$0xff] (!%p406_p3)  }
  0x48   : > { %517 = vadd.xlane.f32.xlu0 %v515_v12  ;;  %983 = vmatpush3.bf16.msra.mxu1 %v1082_v63  ;;  %s1462_s26 = sld [smem:[#allocation11_spill]] (%p1340_p13)  ;;  %s1463_s25 = sld [smem:[#allocation10_spill]] (%p1340_p13) }
  0x49   : > { %485 = vadd.xlane.f32.xlu1 %v483_v13  ;;  %v946_v37 = vld [vmem:[%s1461_s16] ss:$0 sm:$0xff]  ;;  %v583_v57 = vld [vmem:[#allocation2 + $0x8] sm:$0xff]  ;;  %s1464_s29 = sld [smem:[#allocation16_spill]] (%p1340_p13) }
  0x4a   : > { %v582_v55 = vld [vmem:[#allocation2] sm:$0xff]  ;;  %v616_v16 = vld [vmem:[#allocation3 + $0x8] sm:$0xff] }
  0x4c   : > { %519 = vadd.xlane.f32.xlu0 %v516_v14 }
  0x4d   : > { %487 = vadd.xlane.f32.xlu1 %v484_v15  ;;  %v615_v15 = vld [vmem:[#allocation3] sm:$0xff] }
  0x4e   : > { %s953_s3 = sshll.u32 (%p1340_p13), %s1462_s26, 2 }
  0x4f   : > { %s745_s9 = sadd.s32 (%p1340_p13), %s1463_s25, %s953_s3 }
  0x50   : > { %s954_s12 = sshll.u32 (%p1340_p13), %s745_s9, 2 }
  0x51   : > { %s747_s20 = scalar_lea.vmem (%p1340_p13), %s1464_s29, %s954_s12 }
  0xd5   : > { %v518_v17 = vpop.xlane.xlu0 %517 }
  0xd6   : > { %v486_v18 = vpop.xlane.xlu1 %485  ;;  %v522_v19 = vmul.f32 0.0078125, %v518_v17 }
  0xd7   : > { %v490_v20 = vmul.f32 0.0078125, %v486_v18 }
  0xd8   : > { %v524_v21 = vadd.f32 1e-06, %v522_v19 }
  0xd9   : > { %v492_v22 = vadd.f32 1e-06, %v490_v20  ;;  %v520_v23 = vpop.xlane.xlu0 %519 }
  0xda   : > { %v488_v24 = vpop.xlane.xlu1 %487  ;;  %1083 = vrsqrt.f32 %v524_v21  ;;  %v523_v25 = vmul.f32 0.0078125, %v520_v23 }
  0xdb   : > { %v491_v26 = vmul.f32 0.0078125, %v488_v24  ;;  %1085 = vrsqrt.f32 %v492_v22 }
  0xdc   : > { %v525_v27 = vadd.f32 1e-06, %v523_v25 }
  0xdd   : > { %v493_v28 = vadd.f32 1e-06, %v491_v26 }
  0xde   : > { %1087 = vrsqrt.f32 %v525_v27 }
  0xdf   : > { %1089 = vrsqrt.f32 %v493_v28 }
  0xe4   : > { %v1084_v29 = vpop.eup %1083 }
  0xe5   : > { %v1086_v30 = vpop.eup %1085  ;;  %v528_v31 = vmul.f32 %v1084_v29, %v965_v8 }
  0xe6   : > { %v496_v34 = vmul.f32 %v1086_v30, %v961_v9 }
  0xe7   : > { %v537_v39 = vmul.f32 %v947_v33, %v528_v31 }
  0xe8   : > { %v1088_v32 = vpop.eup %1087  ;;  %v505_v41 = vmul.f32 %v946_v37, %v496_v34 }
  0xe9   : > { %v1090_v35 = vpop.eup %1089  ;;  %v529_v36 = vmul.f32 %v1088_v32, %v966_v10 }
  0xea   : > { %v497_v38 = vmul.f32 %v1090_v35, %v962_v11  ;;  %v507_v44 = vmul.f32 0.088388346, %v505_v41 }
  0xeb   : > { %v538_v40 = vmul.f32 %v947_v33, %v529_v36 }
  0xec   : > { %v506_v42 = vmul.f32 %v946_v37, %v497_v38 }
  0xed   : > { %v540_v43 = vpack.c.bf16 %v538_v40, %v537_v39 }
  0xee   : > { %v508_v45 = vmul.f32 0.088388346, %v506_v42 }
  0xef   : > { %977 = vmatpush3.bf16.xpose.msra.mxu0 %v540_v43 }
  0xf0   : > { %v509_v46 = vpack.c.bf16 %v508_v45, %v507_v44 }
  0xf6   : > { %979 = vmatmul.mubr.bf16.vlgmr.msra.gmra.mrb[0].mxu0 %v509_v46 }
 0x1c9   : > { %v575_v48 = vpop.f32.mrb[0].mxu0 }
 0x1ca   : > { %v980_v49 = vpop.f32.mrb[1].mxu0  ;;  %v585_v50 = vsel %vm584_vm2, %v575_v48, -inf }
 0x1cb   : > { %586 = vmax.xlane.f32.xlu0 %v585_v50  ;;  %v578_v51 = vpop.f32.mrb[2].mxu0 }
 0x1cc   : > { %v981_v52 = vpop.f32.mrb[3].mxu0  ;;  %v588_v53 = vsel %vm584_vm2, %v578_v51, -inf }
 0x1cd   : > { %589 = vmax.xlane.f32.xlu1 %v588_v53 }
 0x258   : > { %v587_v56 = vpop.xlane.xlu0 %586 }
 0x259   : > { %v591_v58 = vmax.f32 %v582_v55, %v587_v56 }
 0x25a   : > { %v590_v59 = vpop.xlane.xlu1 %589 }
 0x25b   : > { %v593_v60 = vsub.f32 %v582_v55, %v591_v58  ;;  %701 = vst.msk [vmem:[#allocation2] sm:$0xff] %vm472_vm1, %v591_v58  ;;  %v592_v61 = vmax.f32 %v583_v57, %v590_v59  ;;  %601 = vperm.xlu0 %1080, %v591_v58  }
 0x25d   : > { %v594_v62 = vsub.f32 %v583_v57, %v592_v61  ;;  %702 = vst.msk [vmem:[#allocation2 + $0x8] sm:$0xff] %vm472_vm1, %v592_v61  ;;  %606 = vperm.xlu1 %1081, %v592_v61   ;;  %v595_v13 = vmul.f32 1.442695, %v593_v60 }
 0x25f   : > { %v597_v11 = vmul.f32 1.442695, %v594_v62 }
 0x2da   : > { %v602_v0 = vpop.permute.xlu0 %601 }
 0x2db   : > { %v609_v1 = vsub.f32 %v575_v48, %v602_v0 }
 0x2dc   : > { %v607_v2 = vpop.permute.xlu1 %606 }
 0x2dd   : > { %v611_v3 = vmul.f32 1.442695, %v609_v1  ;;  %v610_v4 = vsub.f32 %v578_v51, %v607_v2 }
 0x2df   : > { %1091 = vpow2.f32 %v611_v3  ;;  %v613_v5 = vmul.f32 1.442695, %v610_v4 }
 0x2e1   : > { %1093 = vpow2.f32 %v613_v5 }
 0x2e2   : > { %1095 = vpow2.f32 %v597_v11 }
 0x2e3   : > { %1097 = vpow2.f32 %v595_v13 }
 0x2e9   : > { %v1092_v6 = vpop.eup %1091 }
 0x2ea   : > { %v619_v7 = vsel %vm584_vm2, %v1092_v6, 0.0 }
 0x2eb   : > { %v1094_v8 = vpop.eup %1093  ;;  %620 = vadd.xlane.f32.xlu1 %v619_v7 }
 0x2ec   : > { %v622_v9 = vsel %vm584_vm2, %v1094_v8, 0.0  ;;  %v644_v10 = vpack.c.bf16 %v1094_v8, %v1092_v6  ;;  %v1096_v12 = vpop.eup %1095 }
 0x2ed   : > { %623 = vadd.xlane.f32.xlu0 %v622_v9  ;;  %v1098_v14 = vpop.eup %1097  ;;  %v618_v20 = vmul.f32 %v1096_v12, %v616_v16 }
 0x2ee   : > { %985 = vmatmul.mubr.msk.bf16.vlgmr.msra.gmra.mrb[0].mxu1 %vm584_vm2, %v644_v10  ;;  %v617_v17 = vmul.f32 %v1098_v14, %v615_v15 }
 0x303   : > { %639 = vperm.xlu0 %1080, %v1096_v12  }
 0x378   : > { %v621_v18 = vpop.xlane.xlu1 %620 }
 0x379   : > { %v625_v19 = vadd.f32 %v621_v18, %v617_v17 }
 0x37a   : > { %v624_v21 = vpop.xlane.xlu0 %623 }
 0x37b   : > { %628 = vst.msk [vmem:[#allocation3] sm:$0xff] %vm472_vm1, %v625_v19  ;;  %v626_v22 = vadd.f32 %v624_v21, %v618_v20 }
 0x37d   : > { %629 = vst.msk [vmem:[#allocation3 + $0x8] sm:$0xff] %vm472_vm1, %v626_v22 }
 0x382   : > { %v708_v23 = vld [vmem:[#allocation3] sm:$0xff]  ;;  %v640_v32 = vpop.permute.xlu0 %639 }
 0x383   : > { %712 = vperm.xlu1 %1081, %v708_v23   ;;  %v643_v34 = vmul.f32 0.0, %v640_v32 }
 0x384   : > { %v709_v24 = vld [vmem:[#allocation3 + $0x8] sm:$0xff] }
 0x387   : > { %717 = vperm.xlu1 %1081, %v709_v24  }
 0x38b   : > { %634 = vperm.xlu1 %1081, %v1098_v14  }
 0x3c1   : > { %v690_v25 = vpop.f32.mrb[0].mxu1 }
 0x3c2   : > { %v986_v26 = vpop.f32.mrb[1].mxu1 }
 0x3c3   : > { %v693_v27 = vpop.f32.mrb[2].mxu1 }
 0x3c4   : > { %v987_v28 = vpop.f32.mrb[3].mxu1  ;;  %v698_v37 = vadd.f32 %v693_v27, %v643_v34 }
 0x402   : > { %v713_v29 = vpop.permute.xlu1 %712 }
 0x403   : > { %1099 = vrcp.f32 %v713_v29 }
 0x406   : > { %v718_v30 = vpop.permute.xlu1 %717 }
 0x407   : > { %1101 = vrcp.f32 %v718_v30 }
 0x40a   : > { %v635_v31 = vpop.permute.xlu1 %634 }
 0x40b   : > { %v642_v33 = vmul.f32 0.0, %v635_v31 }
 0x40d   : > { %v697_v35 = vadd.f32 %v690_v25, %v642_v33  ;;  %v1100_v36 = vpop.eup %1099 }
 0x40f   : > { %v721_v40 = vmul.f32 %v1100_v36, %v697_v35 }
 0x410   : > { %740 = sbr.rel (!%p1340_p13) target bundleno = 1055 (0x41f), region = 175 }
 0x411   : > { %v1102_v38 = vpop.eup %1101 }
 0x412   : > { %v723_v39 = vmul.f32 %v1102_v38, %v698_v37 }
 0x414   : > { %v970_v41 = vpack.c.bf16 %v723_v39, %v721_v40 }
 0x416   : > { %971 = vst [vmem:[%s459_s18] sm:$0xff] %v970_v41  }
 0x41d   : > { %v763_v42 = vld [vmem:[%s459_s18] sm:$0xf]  ;;  %v765_v43 = vld [vmem:[%s459_s18 + $0x4] sm:$0xf] }
 0x41e   : > { %764 = vst [vmem:[%s747_s20] sm:$0xf] %v763_v42  ;;  %766 = vst [vmem:[%s747_s20 + $0x8] sm:$0xf] %v765_v43 }
 0x41f PF: > { %s15_s28 = sadd.s32 1, %s1189_s28   ;;  %s1465_s24 = sld [smem:[#allocation12_spill]] }
 0x420   : > { %p12_p4 = scmp.ge.s32.totalorder %s15_s28, 6   ;;  %s1466_s26 = sld [smem:[#allocation13_spill]] }
 0x421   : > { %s1467_s15 = sld [smem:[#allocation14_spill]]  ;;  %s1468_s18 = smov %s1153_s19 }
 0x422   : > { %s1469_s19 = smov %s1345_s7  ;;  %s1470_s20 = smov %s1161_s21 }
 0x423   : > { %s1471_s21 = smov %s1324_s5  ;;  %s1472_s22 = smov %s1169_s23 }
 0x424   : > { %s1473_s23 = smov %s1321_s30  ;;  %s1474_s25 = smov %s1185_s27 }
 0x425   :  { %14 = sbr.rel (!%p12_p4) target bundleno = 9 (0x9), region = 263 }
 0x427   : > { %s1475_s27 = smov %s1467_s15 }

// kernel: step_video_block_forward.12
= control target key start
LH: loop header
LB: loop body
LE: loop exit
PB: predicated region body
PF: predicated region fallthrough
CT: control target
= control target key end

     0   :  { %s1205_s9 = smov 0   ;;  %s1207_s10 = smov 0   ;;  %s1447_s0 = inlined_call_operand.vmem [shape: f32[2,16,256], index: 0, kind: input, shape index: {}]   ;;  %s1448_s1 = inlined_call_operand.vmem [shape: bf16[256,512], index: 1, kind: input, shape index: {}]   ;;  %s1449_s2 = inlined_call_operand.vmem [shape: bf16[2,16,512], index: 2, kind: output, shape index: {}]  }
   0x1   :  { %s1209_s11 = smov 0  }
   0x2 LB: > { %s38_s12 = sadd.s32 1, %s1184_s10  ;;  %p965_p0 = scmp.ge.s32.totalorder %s1188_s11, 1  ;;  %s1188_s11 = sphi %s1209_s11, %s12_s11   ;;  %s1184_s10 = sphi %s1207_s10, %s1451_s10   ;;  %s1180_s9 = sphi %s1205_s9, %s1450_s9  }
   0x3   : > { %p40_p1 = scmp.ge.s32.totalorder %s38_s12, 2  ;;  %p176_p2 = scmp.lt.s32.totalorder %s1188_s11, 3 }
   0x5   : > { %s1453_s12 = smov (%p40_p1, %s38_s12), 0  ;;  %p177_p3 = pnand %p965_p0, %p176_p2 }
   0x6   : > { %v1070_v0 = vld [vmem:[%s1448_s1 + $0x4] ss:$16 sps:$4 sm:$0xff] (!%p177_p3)   ;;  %v1072_v1 = vld [vmem:[%s1448_s1 + $0xc] ss:$16 sps:$4 sm:$0xff] (!%p177_p3)   ;;  %v1074_v2 = vld [vmem:[%s1448_s1] ss:$16 sps:$4 sm:$0xff] (!%p177_p3)  }
   0x7   : > { %180 = sbr.rel (%p177_p3) target bundleno = 289 (0x121), region = 28  ;;  %680 = vmatprep.subr.bf16.mxu0 (!%p177_p3), %v1070_v0  ;;  %v1075_v3 = vld [vmem:[%s1448_s1 + $0x8] ss:$16 sps:$4 sm:$0xff] (!%p177_p3)   ;;  %723 = vmatprep.subr.bf16.mxu1 (!%p177_p3), %v1072_v1  ;;  %v1076_v4 = vld [vmem:[%s1448_s1 + $0x24] ss:$16 sps:$4 sm:$0xff] (!%p177_p3)   ;;  %p228_p4 = scmp.lt.s32.totalorder (!%p177_p3), %s1180_s9, 1 }
   0x8   : > { %681 = vmatpush1.bf16.msra.mxu0 (!%p177_p3), %v1074_v2  ;;  %724 = vmatpush1.bf16.msra.mxu1 (!%p177_p3), %v1075_v3  ;;  %v1078_v5 = vld [vmem:[%s1448_s1 + $0x2c] ss:$16 sps:$4 sm:$0xff] (!%p177_p3)   ;;  %v1080_v6 = vld [vmem:[%s1448_s1 + $0x20] ss:$16 sps:$4 sm:$0xff] (!%p177_p3)   ;;  %v1081_v7 = vld [vmem:[%s1448_s1 + $0x28] ss:$16 sps:$4 sm:$0xff] (!%p177_p3)  }
   0x9   : > { %682 = vmatprep.subr.bf16.mxu0 (!%p177_p3), %v1076_v4  ;;  %725 = vmatprep.subr.bf16.mxu1 (!%p177_p3), %v1078_v5  ;;  %v1082_v8 = vld [vmem:[%s1448_s1 + $0x44] ss:$16 sps:$4 sm:$0xff] (!%p177_p3)   ;;  %v1084_v9 = vld [vmem:[%s1448_s1 + $0x4c] ss:$16 sps:$4 sm:$0xff] (!%p177_p3)   ;;  %v1086_v10 = vld [vmem:[%s1448_s1 + $0x40] ss:$16 sps:$4 sm:$0xff] (!%p177_p3)  }
   0xa   : > { %v1087_v11 = vld [vmem:[%s1448_s1 + $0x48] ss:$16 sps:$4 sm:$0xff] (!%p177_p3)   ;;  %v1088_v12 = vld [vmem:[%s1448_s1 + $0x64] ss:$16 sps:$4 sm:$0xff] (!%p177_p3)   ;;  %v1090_v13 = vld [vmem:[%s1448_s1 + $0x6c] ss:$16 sps:$4 sm:$0xff] (!%p177_p3)  }
   0xb   : > { %v1092_v14 = vld [vmem:[%s1448_s1 + $0x60] ss:$16 sps:$4 sm:$0xff] (!%p177_p3)   ;;  %v1093_v15 = vld [vmem:[%s1448_s1 + $0x68] ss:$16 sps:$4 sm:$0xff] (!%p177_p3)   ;;  %v1094_v16 = vld [vmem:[%s1448_s1 + $0x84] ss:$16 sps:$4 sm:$0xff] (!%p177_p3)  }
   0xc   : > { %683 = vmatpush1.bf16.msra.mxu0 (!%p177_p3), %v1080_v6  ;;  %726 = vmatpush1.bf16.msra.mxu1 (!%p177_p3), %v1081_v7  ;;  %v1096_v17 = vld [vmem:[%s1448_s1 + $0x8c] ss:$16 sps:$4 sm:$0xff] (!%p177_p3)   ;;  %v1098_v18 = vld [vmem:[%s1448_s1 + $0x80] ss:$16 sps:$4 sm:$0xff] (!%p177_p3)   ;;  %v1099_v19 = vld [vmem:[%s1448_s1 + $0x88] ss:$16 sps:$4 sm:$0xff] (!%p177_p3)  }
   0xd   : > { %684 = vmatprep.subr.bf16.mxu0 (!%p177_p3), %v1082_v8  ;;  %727 = vmatprep.subr.bf16.mxu1 (!%p177_p3), %v1084_v9  ;;  %v1100_v20 = vld [vmem:[%s1448_s1 + $0xa4] ss:$16 sps:$4 sm:$0xff] (!%p177_p3)   ;;  %v1102_v21 = vld [vmem:[%s1448_s1 + $0xac] ss:$16 sps:$4 sm:$0xff] (!%p177_p3)   ;;  %v1104_v22 = vld [vmem:[%s1448_s1 + $0xa0] ss:$16 sps:$4 sm:$0xff] (!%p177_p3)  }
   0xe   : > { %v1105_v23 = vld [vmem:[%s1448_s1 + $0xa8] ss:$16 sps:$4 sm:$0xff]   ;;  %v1106_v24 = vld [vmem:[%s1448_s1 + $0xc4] ss:$16 sps:$4 sm:$0xff]   ;;  %v1108_v25 = vld [vmem:[%s1448_s1 + $0xcc] ss:$16 sps:$4 sm:$0xff]  }
   0xf   : > { %v1110_v26 = vld [vmem:[%s1448_s1 + $0xc0] ss:$16 sps:$4 sm:$0xff]   ;;  %v1111_v27 = vld [vmem:[%s1448_s1 + $0xc8] ss:$16 sps:$4 sm:$0xff]   ;;  %v1112_v28 = vld [vmem:[%s1448_s1 + $0xe4] ss:$16 sps:$4 sm:$0xff]  }
  0x10   : > { %685 = vmatpush1.bf16.msra.mxu0 %v1086_v10  ;;  %728 = vmatpush1.bf16.msra.mxu1 %v1087_v11  ;;  %v1114_v29 = vld [vmem:[%s1448_s1 + $0xec] ss:$16 sps:$4 sm:$0xff]   ;;  %v1116_v30 = vld [vmem:[%s1448_s1 + $0xe0] ss:$16 sps:$4 sm:$0xff]   ;;  %v1117_v31 = vld [vmem:[%s1448_s1 + $0xe8] ss:$16 sps:$4 sm:$0xff]  }
  0x11   : > { %686 = vmatprep.subr.bf16.mxu0 %v1088_v12  ;;  %729 = vmatprep.subr.bf16.mxu1 %v1090_v13  ;;  %v1118_v32 = vld [vmem:[%s1448_s1 + $0x104] ss:$16 sps:$4 sm:$0xff]   ;;  %v1120_v33 = vld [vmem:[%s1448_s1 + $0x10c] ss:$16 sps:$4 sm:$0xff]   ;;  %v1122_v34 = vld [vmem:[%s1448_s1 + $0x100] ss:$16 sps:$4 sm:$0xff]  }
  0x12   : > { %v1123_v35 = vld [vmem:[%s1448_s1 + $0x108] ss:$16 sps:$4 sm:$0xff]   ;;  %v1124_v36 = vld [vmem:[%s1448_s1 + $0x124] ss:$16 sps:$4 sm:$0xff]   ;;  %s1455_s9 = smov (!%p228_p4, %s1180_s9), 1 }
  0x13   : > { %v1126_v37 = vld [vmem:[%s1448_s1 + $0x12c] ss:$16 sps:$4 sm:$0xff]   ;;  %v1128_v38 = vld [vmem:[%s1448_s1 + $0x120] ss:$16 sps:$4 sm:$0xff]   ;;  %v1129_v39 = vld [vmem:[%s1448_s1 + $0x128] ss:$16 sps:$4 sm:$0xff]  }
  0x14   : > { %687 = vmatpush1.bf16.msra.mxu0 %v1092_v14  ;;  %730 = vmatpush1.bf16.msra.mxu1 %v1093_v15  ;;  %v1130_v40 = vld [vmem:[%s1448_s1 + $0x144] ss:$16 sps:$4 sm:$0xff]   ;;  %s1040_s23 = sshll.u32 %s1455_s9, 5  ;;  %v1132_v41 = vld [vmem:[%s1448_s1 + $0x14c] ss:$16 sps:$4 sm:$0xff]  }
  0x15   : > { %688 = vmatprep.subr.bf16.mxu0 %v1094_v16  ;;  %731 = vmatprep.subr.bf16.mxu1 %v1096_v17  ;;  %v1134_v42 = vld [vmem:[%s1448_s1 + $0x140] ss:$16 sps:$4 sm:$0xff]   ;;  %v1135_v43 = vld [vmem:[%s1448_s1 + $0x148] ss:$16 sps:$4 sm:$0xff]   ;;  %s1367_s4 = scalar_lea.vmem %s1447_s0, %s1040_s23  ;;  %v1136_v44 = vld [vmem:[%s1448_s1 + $0x164] ss:$16 sps:$4 sm:$0xff]   ;;  %s267_s30 = scalar_lea.vmem %s1449_s2, %s1040_s23 }
  0x16   : > { %v1138_v45 = vld [vmem:[%s1448_s1 + $0x16c] ss:$16 sps:$4 sm:$0xff]   ;;  %v1140_v48 = vld [vmem:[%s1448_s1 + $0x160] ss:$16 sps:$4 sm:$0xff]   ;;  %v1141_v49 = vld [vmem:[%s1448_s1 + $0x168] ss:$16 sps:$4 sm:$0xff]  }
  0x17   : > { %v283_v46 = vld [vmem:[%s1367_s4 + $0x8] sm:$0xff]  ;;  %v285_v47 = vld [vmem:[%s1367_s4 + $0x18] sm:$0xff]  ;;  %v1142_v51 = vld [vmem:[%s1448_s1 + $0x184] ss:$16 sps:$4 sm:$0xff]  }
  0x18   : > { %689 = vmatpush1.bf16.msra.mxu0 %v1098_v18  ;;  %732 = vmatpush1.bf16.msra.mxu1 %v1099_v19  ;;  %v295_v50 = vpack.c.bf16 %v285_v47, %v283_v46  ;;  %v1144_v52 = vld [vmem:[%s1448_s1 + $0x18c] ss:$16 sps:$4 sm:$0xff]   ;;  %v1146_v53 = vld [vmem:[%s1448_s1 + $0x180] ss:$16 sps:$4 sm:$0xff]   ;;  %v1147_v54 = vld [vmem:[%s1448_s1 + $0x188] ss:$16 sps:$4 sm:$0xff]  }
  0x19   : > { %690 = vmatprep.subr.bf16.mxu0 %v1100_v20  ;;  %733 = vmatprep.subr.bf16.mxu1 %v1102_v21  ;;  %v1148_v55 = vld [vmem:[%s1448_s1 + $0x1a4] ss:$16 sps:$4 sm:$0xff]   ;;  %v1150_v56 = vld [vmem:[%s1448_s1 + $0x1ac] ss:$16 sps:$4 sm:$0xff]   ;;  %v1152_v57 = vld [vmem:[%s1448_s1 + $0x1a0] ss:$16 sps:$4 sm:$0xff]  }
  0x1a   : > { %712 = vmatprep.mubr.bf16.mxu0 %v295_v50  ;;  %755 = vmatprep.mubr.bf16.mxu1 %v295_v50  ;;  %v1153_v58 = vld [vmem:[%s1448_s1 + $0x1a8] ss:$16 sps:$4 sm:$0xff]   ;;  %v1154_v59 = vld [vmem:[%s1448_s1 + $0x1c4] ss:$16 sps:$4 sm:$0xff]   ;;  %v1156_v60 = vld [vmem:[%s1448_s1 + $0x1cc] ss:$16 sps:$4 sm:$0xff]  }
  0x1b   : > { %v1158_v61 = vld [vmem:[%s1448_s1 + $0x1c0] ss:$16 sps:$4 sm:$0xff]   ;;  %v1159_v62 = vld [vmem:[%s1448_s1 + $0x1c8] ss:$16 sps:$4 sm:$0xff]   ;;  %v1160_v63 = vld [vmem:[%s1448_s1 + $0x1e4] ss:$16 sps:$4 sm:$0xff]  }
  0x1c   : > { %691 = vmatpush1.bf16.msra.mxu0 %v1104_v22  ;;  %734 = vmatpush1.bf16.msra.mxu1 %v1105_v23  ;;  %v1162_v0 = vld [vmem:[%s1448_s1 + $0x1ec] ss:$16 sps:$4 sm:$0xff]   ;;  %v1164_v1 = vld [vmem:[%s1448_s1 + $0x1e0] ss:$16 sps:$4 sm:$0xff]   ;;  %v1165_v2 = vld [vmem:[%s1448_s1 + $0x1e8] ss:$16 sps:$4 sm:$0xff]  }
  0x1d   : > { %692 = vmatprep.subr.bf16.mxu0 %v1106_v24  ;;  %735 = vmatprep.subr.bf16.mxu1 %v1108_v25  ;;  %v282_v3 = vld [vmem:[%s1367_s4] sm:$0xff]  ;;  %v284_v4 = vld [vmem:[%s1367_s4 + $0x10] sm:$0xff] }
  0x1e   : > { %v294_v5 = vpack.c.bf16 %v284_v4, %v282_v3 }
  0x20   : > { %693 = vmatpush1.bf16.msra.mxu0 %v1110_v26  ;;  %736 = vmatpush1.bf16.msra.mxu1 %v1111_v27 }
  0x21   : > { %694 = vmatprep.subr.bf16.mxu0 %v1112_v28  ;;  %737 = vmatprep.subr.bf16.mxu1 %v1114_v29 }
  0x24   : > { %695 = vmatpush1.bf16.msra.mxu0 %v1116_v30  ;;  %738 = vmatpush1.bf16.msra.mxu1 %v1117_v31 }
  0x25   : > { %696 = vmatprep.subr.bf16.mxu0 %v1118_v32  ;;  %739 = vmatprep.subr.bf16.mxu1 %v1120_v33 }
  0x28   : > { %697 = vmatpush1.bf16.msra.mxu0 %v1122_v34  ;;  %740 = vmatpush1.bf16.msra.mxu1 %v1123_v35 }
  0x29   : > { %698 = vmatprep.subr.bf16.mxu0 %v1124_v36  ;;  %741 = vmatprep.subr.bf16.mxu1 %v1126_v37 }
  0x2c   : > { %699 = vmatpush1.bf16.msra.mxu0 %v1128_v38  ;;  %742 = vmatpush1.bf16.msra.mxu1 %v1129_v39 }
  0x2d   : > { %700 = vmatprep.subr.bf16.mxu0 %v1130_v40  ;;  %743 = vmatprep.subr.bf16.mxu1 %v1132_v41 }
  0x30   : > { %701 = vmatpush1.bf16.msra.mxu0 %v1134_v42  ;;  %744 = vmatpush1.bf16.msra.mxu1 %v1135_v43 }
  0x31   : > { %702 = vmatprep.subr.bf16.mxu0 %v1136_v44  ;;  %745 = vmatprep.subr.bf16.mxu1 %v1138_v45 }
  0x34   : > { %703 = vmatpush1.bf16.msra.mxu0 %v1140_v48  ;;  %746 = vmatpush1.bf16.msra.mxu1 %v1141_v49 }
  0x35   : > { %704 = vmatprep.subr.bf16.mxu0 %v1142_v51  ;;  %747 = vmatprep.subr.bf16.mxu1 %v1144_v52 }
  0x38   : > { %705 = vmatpush1.bf16.msra.mxu0 %v1146_v53  ;;  %748 = vmatpush1.bf16.msra.mxu1 %v1147_v54 }
  0x39   : > { %706 = vmatprep.subr.bf16.mxu0 %v1148_v55  ;;  %749 = vmatprep.subr.bf16.mxu1 %v1150_v56 }
  0x3c   : > { %707 = vmatpush1.bf16.msra.mxu0 %v1152_v57  ;;  %750 = vmatpush1.bf16.msra.mxu1 %v1153_v58 }
  0x3d   : > { %708 = vmatprep.subr.bf16.mxu0 %v1154_v59  ;;  %751 = vmatprep.subr.bf16.mxu1 %v1156_v60 }
  0x40   : > { %709 = vmatpush1.bf16.msra.mxu0 %v1158_v61  ;;  %752 = vmatpush1.bf16.msra.mxu1 %v1159_v62 }
  0x41   : > { %710 = vmatprep.subr.bf16.mxu0 %v1160_v63  ;;  %753 = vmatprep.subr.bf16.mxu1 %v1162_v0 }
  0x44   : > { %711 = vmatpush1.bf16.msra.mxu0 %v1164_v1  ;;  %754 = vmatpush1.bf16.msra.mxu1 %v1165_v2 }
  0x47   : > { %713 = vmatmul.mubr.bf16.vlgmr.msra.gmra.mrb[0].mxu0 %v294_v5  ;;  %756 = vmatmul.mubr.bf16.vlgmr.msra.gmra.mrb[0].mxu1 %v294_v5 }
 0x11a   : > { %v714_v6 = vpop.f32.mrb[0].mxu0  ;;  %v757_v7 = vpop.f32.mrb[0].mxu1 }
 0x11b   : > { %v716_v8 = vpop.f32.mrb[1].mxu0  ;;  %v759_v9 = vpop.f32.mrb[1].mxu1 }
 0x11c   : > { %v1042_v10 = vpack.c.bf16 %v716_v8, %v714_v6  ;;  %v1043_v11 = vpack.c.bf16 %v759_v9, %v757_v7  ;;  %v718_v12 = vpop.f32.mrb[2].mxu0  ;;  %v761_v13 = vpop.f32.mrb[2].mxu1 }
 0x11d   : > { %v720_v14 = vpop.f32.mrb[3].mxu0  ;;  %v763_v15 = vpop.f32.mrb[3].mxu1 }
 0x11e   : > { %817 = vst [vmem:[%s267_s30] sm:$0xff] %v1042_v10  ;;  %818 = vst [vmem:[%s267_s30 + $0x8] sm:$0xff] %v1043_v11  ;;  %v1044_v16 = vpack.c.bf16 %v720_v14, %v718_v12  ;;  %v1045_v17 = vpack.c.bf16 %v763_v15, %v761_v13 }
 0x120   : > { %819 = vst [vmem:[%s267_s30 + $0x10] sm:$0xff] %v1044_v16  ;;  %820 = vst [vmem:[%s267_s30 + $0x18] sm:$0xff] %v1045_v17 }
 0x121 PF: > { %s12_s11 = sadd.s32 1, %s1188_s11   ;;  %s1450_s9 = smov %s1184_s10 }
 0x122   : > { %p9_p5 = scmp.ge.s32.totalorder %s12_s11, 4   ;;  %s1451_s10 = smov %s1453_s12 }
 0x124   :  { %11 = sbr.rel (!%p9_p5) target bundleno = 2 (0x2), region = 69 }

// kernel: step_video_block_forward.14
= control target key start
LH: loop header
LB: loop body
LE: loop exit
PB: predicated region body
PF: predicated region fallthrough
CT: control target
= control target key end

     0   :  { %s971_s12 = smov 0   ;;  %s973_s13 = smov 0   ;;  %s1111_s0 = inlined_call_operand.vmem [shape: bf16[2,16,256], index: 0, kind: input, shape index: {}]   ;;  %s1112_s1 = inlined_call_operand.vmem [shape: bf16[256,256], index: 1, kind: input, shape index: {}]   ;;  %s1113_s2 = inlined_call_operand.vmem [shape: f32[2,16,256], index: 2, kind: input, shape index: {}]   ;;  %s1114_s3 = inlined_call_operand.vmem [shape: f32[2,16,256], index: 3, kind: output, shape index: {}]  }
   0x1   :  { %s975_s14 = smov 0  }
   0x2 LB: > { %s39_s15 = sadd.s32 1, %s945_s13  ;;  %p806_p0 = scmp.ge.s32.totalorder %s949_s14, 1  ;;  %s949_s14 = sphi %s975_s14, %s13_s14   ;;  %s945_s13 = sphi %s973_s13, %s1116_s13   ;;  %s941_s12 = sphi %s971_s12, %s1115_s12  }
   0x3   : > { %p41_p1 = scmp.ge.s32.totalorder %s39_s15, 2  ;;  %p226_p2 = scmp.lt.s32.totalorder %s949_s14, 3 }
   0x5   : > { %s1118_s15 = smov (%p41_p1, %s39_s15), 0  ;;  %p227_p3 = pnand %p806_p0, %p226_p2 }
   0x6   : > { %v876_v0 = vld [vmem:[%s1112_s1 + $0x4] ss:$8 sps:$4 sm:$0xff] (!%p227_p3)   ;;  %v878_v1 = vld [vmem:[%s1112_s1] ss:$8 sps:$4 sm:$0xff] (!%p227_p3)   ;;  %v879_v2 = vld [vmem:[%s1112_s1 + $0x14] ss:$8 sps:$4 sm:$0xff] (!%p227_p3)  }
   0x7   : > { %230 = sbr.rel (%p227_p3) target bundleno = 289 (0x121), region = 32  ;;  %568 = vmatprep.subr.bf16.mxu0 (!%p227_p3), %v876_v0  ;;  %v881_v3 = vld [vmem:[%s1112_s1 + $0x10] ss:$8 sps:$4 sm:$0xff] (!%p227_p3)   ;;  %v882_v4 = vld [vmem:[%s1112_s1 + $0x24] ss:$8 sps:$4 sm:$0xff] (!%p227_p3)   ;;  %p294_p4 = scmp.lt.s32.totalorder (!%p227_p3), %s941_s12, 1 }
   0x8   : > { %569 = vmatpush1.bf16.msra.mxu0 (!%p227_p3), %v878_v1  ;;  %v884_v5 = vld [vmem:[%s1112_s1 + $0x20] ss:$8 sps:$4 sm:$0xff] (!%p227_p3)   ;;  %v885_v6 = vld [vmem:[%s1112_s1 + $0x34] ss:$8 sps:$4 sm:$0xff] (!%p227_p3)   ;;  %v887_v7 = vld [vmem:[%s1112_s1 + $0x30] ss:$8 sps:$4 sm:$0xff] (!%p227_p3)  }
   0x9   : > { %570 = vmatprep.subr.bf16.mxu0 (!%p227_p3), %v879_v2  ;;  %v888_v8 = vld [vmem:[%s1112_s1 + $0x44] ss:$8 sps:$4 sm:$0xff] (!%p227_p3)   ;;  %v890_v9 = vld [vmem:[%s1112_s1 + $0x40] ss:$8 sps:$4 sm:$0xff] (!%p227_p3)   ;;  %v891_v10 = vld [vmem:[%s1112_s1 + $0x54] ss:$8 sps:$4 sm:$0xff] (!%p227_p3)  }
   0xa   : > { %v893_v11 = vld [vmem:[%s1112_s1 + $0x50] ss:$8 sps:$4 sm:$0xff] (!%p227_p3)   ;;  %v894_v12 = vld [vmem:[%s1112_s1 + $0x64] ss:$8 sps:$4 sm:$0xff] (!%p227_p3)   ;;  %v896_v14 = vld [vmem:[%s1112_s1 + $0x60] ss:$8 sps:$4 sm:$0xff] (!%p227_p3)  }
   0xb   : > { %v897_v15 = vld [vmem:[%s1112_s1 + $0x74] ss:$8 sps:$4 sm:$0xff] (!%p227_p3)   ;;  %v899_v16 = vld [vmem:[%s1112_s1 + $0x70] ss:$8 sps:$4 sm:$0xff] (!%p227_p3)   ;;  %v900_v17 = vld [vmem:[%s1112_s1 + $0x84] ss:$8 sps:$4 sm:$0xff] (!%p227_p3)  }
   0xc   : > { %571 = vmatpush1.bf16.msra.mxu0 (!%p227_p3), %v881_v3  ;;  %v902_v18 = vld [vmem:[%s1112_s1 + $0x80] ss:$8 sps:$4 sm:$0xff] (!%p227_p3)   ;;  %v903_v19 = vld [vmem:[%s1112_s1 + $0x94] ss:$8 sps:$4 sm:$0xff] (!%p227_p3)   ;;  %v905_v20 = vld [vmem:[%s1112_s1 + $0x90] ss:$8 sps:$4 sm:$0xff] (!%p227_p3)  }
   0xd   : > { %572 = vmatprep.subr.bf16.mxu0 (!%p227_p3), %v882_v4  ;;  %v906_v21 = vld [vmem:[%s1112_s1 + $0xa4] ss:$8 sps:$4 sm:$0xff] (!%p227_p3)   ;;  %v908_v22 = vld [vmem:[%s1112_s1 + $0xa0] ss:$8 sps:$4 sm:$0xff] (!%p227_p3)   ;;  %v909_v23 = vld [vmem:[%s1112_s1 + $0xb4] ss:$8 sps:$4 sm:$0xff] (!%p227_p3)  }
   0xe   : > { %s1120_s12 = smov (!%p294_p4, %s941_s12), 1  ;;  %v911_v24 = vld [vmem:[%s1112_s1 + $0xb0] ss:$8 sps:$4 sm:$0xff]   ;;  %v912_v25 = vld [vmem:[%s1112_s1 + $0xc4] ss:$8 sps:$4 sm:$0xff]  }
   0xf   : > { %s849_s11 = sshll.u32 %s1120_s12, 4  ;;  %v914_v26 = vld [vmem:[%s1112_s1 + $0xc0] ss:$8 sps:$4 sm:$0xff]   ;;  %v915_v27 = vld [vmem:[%s1112_s1 + $0xd4] ss:$8 sps:$4 sm:$0xff]   ;;  %s850_s16 = sshll.u32 %s1120_s12, 5 }
  0x10   : > { %573 = vmatpush1.bf16.msra.mxu0 %v884_v5  ;;  %s1031_s20 = scalar_lea.vmem %s1111_s0, %s849_s11  ;;  %v917_v28 = vld [vmem:[%s1112_s1 + $0xd0] ss:$8 sps:$4 sm:$0xff]   ;;  %v918_v29 = vld [vmem:[%s1112_s1 + $0xe4] ss:$8 sps:$4 sm:$0xff]   ;;  %v920_v30 = vld [vmem:[%s1112_s1 + $0xe0] ss:$8 sps:$4 sm:$0xff]   ;;  %s333_s19 = scalar_lea.vmem %s1113_s2, %s850_s16 }
  0x11   : > { %574 = vmatprep.subr.bf16.mxu0 %v885_v6  ;;  %v926_v13 = vld [vmem:[%s1031_s20 + $0x4] ss:$8 sps:$4 sm:$0xff]   ;;  %v921_v31 = vld [vmem:[%s1112_s1 + $0xf4] ss:$8 sps:$4 sm:$0xff]   ;;  %v923_v32 = vld [vmem:[%s1112_s1 + $0xf0] ss:$8 sps:$4 sm:$0xff]   ;;  %s349_s23 = scalar_lea.vmem %s1114_s3, %s850_s16 }
  0x12   : > { %600 = vmatprep.mubr.bf16.mxu0 %v926_v13  ;;  %v924_v33 = vld [vmem:[%s1031_s20] ss:$8 sps:$4 sm:$0xff]   ;;  %v628_v37 = vld [vmem:[%s333_s19 + $0x10] sm:$0xff]  ;;  %v629_v40 = vld [vmem:[%s333_s19 + $0x18] sm:$0xff] }
  0x13   : > { %v626_v34 = vld [vmem:[%s333_s19] sm:$0xff]  ;;  %v627_v35 = vld [vmem:[%s333_s19 + $0x8] sm:$0xff] }
  0x14   : > { %575 = vmatpush1.bf16.msra.mxu0 %v887_v7 }
  0x15   : > { %576 = vmatprep.subr.bf16.mxu0 %v888_v8 }
  0x18   : > { %577 = vmatpush1.bf16.msra.mxu0 %v890_v9 }
  0x19   : > { %578 = vmatprep.subr.bf16.mxu0 %v891_v10 }
  0x1c   : > { %579 = vmatpush1.bf16.msra.mxu0 %v893_v11 }
  0x1d   : > { %580 = vmatprep.subr.bf16.mxu0 %v894_v12 }
  0x20   : > { %581 = vmatpush1.bf16.msra.mxu0 %v896_v14 }
  0x21   : > { %582 = vmatprep.subr.bf16.mxu0 %v897_v15 }
  0x24   : > { %583 = vmatpush1.bf16.msra.mxu0 %v899_v16 }
  0x25   : > { %584 = vmatprep.subr.bf16.mxu0 %v900_v17 }
  0x28   : > { %585 = vmatpush1.bf16.msra.mxu0 %v902_v18 }
  0x29   : > { %586 = vmatprep.subr.bf16.mxu0 %v903_v19 }
  0x2c   : > { %587 = vmatpush1.bf16.msra.mxu0 %v905_v20 }
  0x2d   : > { %588 = vmatprep.subr.bf16.mxu0 %v906_v21 }
  0x30   : > { %589 = vmatpush1.bf16.msra.mxu0 %v908_v22 }
  0x31   : > { %590 = vmatprep.subr.bf16.mxu0 %v909_v23 }
  0x34   : > { %591 = vmatpush1.bf16.msra.mxu0 %v911_v24 }
  0x35   : > { %592 = vmatprep.subr.bf16.mxu0 %v912_v25 }
  0x38   : > { %593 = vmatpush1.bf16.msra.mxu0 %v914_v26 }
  0x39   : > { %594 = vmatprep.subr.bf16.mxu0 %v915_v27 }
  0x3c   : > { %595 = vmatpush1.bf16.msra.mxu0 %v917_v28 }
  0x3d   : > { %596 = vmatprep.subr.bf16.mxu0 %v918_v29 }
  0x40   : > { %597 = vmatpush1.bf16.msra.mxu0 %v920_v30 }
  0x41   : > { %598 = vmatprep.subr.bf16.mxu0 %v921_v31 }
  0x44   : > { %599 = vmatpush1.bf16.msra.mxu0 %v923_v32 }
  0x47   : > { %601 = vmatmul.mubr.bf16.vlgmr.msra.gmra.mrb[0].mxu0 %v924_v33 }
 0x11a   : > { %v602_v36 = vpop.f32.mrb[0].mxu0 }
 0x11b   : > { %v630_v38 = vadd.f32 %v626_v34, %v602_v36  ;;  %v604_v39 = vpop.f32.mrb[1].mxu0 }
 0x11c   : > { %v631_v41 = vadd.f32 %v627_v35, %v604_v39  ;;  %v606_v42 = vpop.f32.mrb[2].mxu0 }
 0x11d   : > { %634 = vst [vmem:[%s349_s23] sm:$0xff] %v630_v38  ;;  %v632_v43 = vadd.f32 %v628_v37, %v606_v42  ;;  %v608_v44 = vpop.f32.mrb[3].mxu0 }
 0x11e   : > { %635 = vst [vmem:[%s349_s23 + $0x8] sm:$0xff] %v631_v41  ;;  %v633_v45 = vadd.f32 %v629_v40, %v608_v44 }
 0x11f   : > { %636 = vst [vmem:[%s349_s23 + $0x10] sm:$0xff] %v632_v43 }
 0x120   : > { %637 = vst [vmem:[%s349_s23 + $0x18] sm:$0xff] %v633_v45 }
 0x121 PF: > { %s13_s14 = sadd.s32 1, %s949_s14   ;;  %s1115_s12 = smov %s945_s13 }
 0x122   : > { %p10_p5 = scmp.ge.s32.totalorder %s13_s14, 4   ;;  %s1116_s13 = smov %s1118_s15 }
 0x124   :  { %12 = sbr.rel (!%p10_p5) target bundleno = 2 (0x2), region = 76 }

// kernel: step_video_block_forward.15
= control target key start
LH: loop header
LB: loop body
LE: loop exit
PB: predicated region body
PF: predicated region fallthrough
CT: control target
= control target key end

     0   :  { %s3080_s0 = inlined_call_operand.vmem [shape: f32[2,16,256], index: 0, kind: input, shape index: {}]   ;;  %s3081_s1 = inlined_call_operand.vmem [shape: f32[1,256], index: 1, kind: input, shape index: {}]   ;;  %s3082_s2 = inlined_call_operand.vmem [shape: f32[1,256], index: 2, kind: input, shape index: {}]   ;;  %s3083_s3 = inlined_call_operand.vmem [shape: f32[2,1,256], index: 3, kind: input, shape index: {}]   ;;  %s3084_s4 = inlined_call_operand.vmem [shape: f32[2,1,256], index: 4, kind: input, shape index: {}]   ;;  %s3085_s5 = inlined_call_operand.vmem [shape: bf16[256,1024], index: 5, kind: input, shape index: {}]   ;;  %s3086_s6 = inlined_call_operand.vmem [shape: bf16[1024,256], index: 6, kind: input, shape index: {}]   ;;  %s3087_s7 = inlined_call_operand.vmem [shape: f32[2,1,256], index: 7, kind: input, shape index: {}]   ;;  %s3088_s8 = inlined_call_operand.hbm [shape: f32[2,16,256], index: 8, kind: output, shape index: {}]  }
   0x1   :  { %3100 = sst [smem:[#allocation19_spill]] %s3080_s0 }
   0x2   :  { %3101 = sst [smem:[#allocation20_spill]] %s3085_s5 }
   0x3   :  { %13 = vsyncpa [#allocation6], 0 }
   0x4   :  { %15 = vsyncpa [#allocation6 + $0x1], 0  ;;  %s2567_s27 = smov 0   ;;  %s2569_s28 = smov 0  }
   0x5   :  { %s2571_s29 = smov 0   ;;  %s2573_s30 = smov 0  }
   0x6   :  { %s2575_s9 = smov 0   ;;  %s2577_s10 = smov 0  }
   0x7   :  { %s2579_s11 = smov 0   ;;  %s2581_s12 = smov 0  }
   0x8   :  { %s2583_s13 = smov 0   ;;  %s2585_s14 = smov 0  }
   0x9 LB: > { %3102 = sst [smem:[#allocation8_spill]] %s2480_s27  ;;  %s1943_s15 = sadd.s32 4294967295, %s2516_s14   ;;  %s2516_s14 = sphi %s2585_s14, %s21_s14   ;;  %s2512_s13 = sphi %s2583_s13, %s3129_s13   ;;  %s2508_s12 = sphi %s2581_s12, %s3132_s12   ;;  %s2504_s11 = sphi %s2579_s11, %s3127_s11   ;;  %s2500_s10 = sphi %s2577_s10, %s3126_s10   ;;  %s2496_s9 = sphi %s2575_s9, %s3125_s9   ;;  %s2492_s30 = sphi %s2573_s30, %s3124_s30   ;;  %s2488_s29 = sphi %s2571_s29, %s3123_s29   ;;  %s2484_s28 = sphi %s2569_s28, %s3131_s28   ;;  %s2480_s27 = sphi %s2567_s27, %s3130_s27  }
   0xa   : > { %3103 = sst [smem:[#allocation9_spill]] %s2488_s29  ;;  %s1944_s16 = sadd.s32 4294967294, %s2516_s14  }
   0xb   : > { %3104 = sst [smem:[#allocation10_spill]] %s2496_s9  ;;  %s33_s17 = sadd.s32 1, %s2508_s12 }
   0xc   : > { %3105 = sst [smem:[#allocation11_spill]] %s2508_s12  ;;  %s40_s18 = sadd.s32 1, %s2512_s13 }
   0xd   : > { %3106 = sst [smem:[#allocation12_spill]] %s2512_s13  ;;  %p34_p0 = scmp.ge.s32.totalorder %s33_s17, 2 }
   0xe   : > { %3107 = sst [smem:[#allocation13_spill]] %s2516_s14  ;;  %s169_s19 = sadd.s32 1, %s2496_s9 }
   0xf   : > { %p176_p1 = scmp.ne.s32.totalorder %s2496_s9, %s2492_s30  ;;  %p177_p2 = scmp.eq.s32.totalorder %s2516_s14, 0 }
  0x10   : > { %s3134_s17 = smov (%p34_p0, %s33_s17), 0  ;;  %s3136_s18 = smov (!%p34_p0, %s40_s18), %s2512_s13 }
  0x11   : > { %3108 = sst [smem:[#allocation14_spill]] %s3134_s17  ;;  %s166_s20 = ssub.s32 %s2508_s12, %s3134_s17 }
  0x12   : > { %p2630_p3 = por %p177_p2, %p176_p1  ;;  %p42_p4 = scmp.ge.s32.totalorder %s3136_s18, 2 }
  0x13   : > { %p167_p5 = scmp.eq.s32.totalorder %s166_s20, 0  ;;  %s249_s22 = sadd.s32 1, %s2488_s29 }
  0x14   : > { %p259_p6 = scmp.ne.s32.totalorder %s2488_s29, %s2484_s28  ;;  %s3138_s18 = smov (%p42_p4, %s3136_s18), 0 }
  0x15   : > { %3110 = sst [smem:[#allocation15_spill]] %s3138_s18  ;;  %s244_s24 = ssub.s32 %s2512_s13, %s3138_s18 }
  0x16   : > { %s2640_s23 = scalar_select %p167_p5, %s2496_s9, %s169_s19  }
  0x17   : > { %p260_p7 = scmp.eq.s32.totalorder %s1943_s15, 3  ;;  %p247_p8 = scmp.eq.s32.totalorder %s244_s24, 0 }
  0x18   : > { %3111 = sst [smem:[#allocation16_spill]] %s2640_s23  ;;  %p265_p9 = scmp.ne.s32.totalorder %s2484_s28, %s2480_s27 }
  0x19   : > { %p2646_p10 = por %p260_p7, %p259_p6  ;;  %p266_p11 = scmp.eq.s32.totalorder %s1944_s16, 3 }
  0x1a   : > { %s2651_s26 = scalar_select %p247_p8, %s2488_s29, %s249_s22  }
  0x1b   : > { %p2653_p12 = por %p266_p11, %p265_p9  ;;  %p1946_p13 = scmp.ge.s32.totalorder %s2516_s14, 4 }
  0x1c   : > { %3113 = sst [smem:[#allocation17_spill]] %s2651_s26 }
  0x1d   : > { %s3114_s20 = scalar_select %p2653_p12, 1, 0 }
  0x1e   : > { %288 = sbr.rel (%p1946_p13) target bundleno = 79 (0x4f), region = 24 }
  0x1f   : > { %3115 = sst [smem:[#allocation18_spill]] %s3114_s20 }
  0x25   : > { %319 = sbr.rel (!%p2630_p3) target bundleno = 79 (0x4f), region = 40  ;;  %s321_s15 = sand.u32 (%p2630_p3), 1, %s2496_s9  }
  0x26   : > { %s2096_s19 = sshll.u32 (%p2630_p3), %s2508_s12, 4  ;;  %s1947_s24 = sshll.u32 (%p2630_p3), %s321_s15, 9 }
  0x27   : > { %s3116_s5 = sld [smem:[#allocation20_spill]] (%p2630_p3)  ;;  %s2670_s21 = scalar_lea.vmem (%p2630_p3), [#allocation4], %s1947_s24 }
  0x2d   : > { %s2665_s16 = scalar_lea.vmem %s3116_s5, %s2096_s19 }
  0x2e   : > { %v339_v0 = vld [vmem:[%s2665_s16] sm:$0xff]  ;;  %v341_v1 = vld [vmem:[%s2665_s16 + $0x8] sm:$0xff] }
  0x2f   : > { %v343_v2 = vld [vmem:[%s2665_s16 + $0x20] sm:$0xff]  ;;  %340 = vst [vmem:[%s2670_s21] sm:$0xff] %v339_v0  ;;  %342 = vst [vmem:[%s2670_s21 + $0x8] sm:$0xff] %v341_v1  ;;  %v345_v3 = vld [vmem:[%s2665_s16 + $0x28] sm:$0xff] }
  0x30   : > { %344 = vst [vmem:[%s2670_s21 + $0x10] sm:$0xff] %v343_v2  ;;  %v347_v4 = vld [vmem:[%s2665_s16 + $0x40] sm:$0xff]  ;;  %v349_v5 = vld [vmem:[%s2665_s16 + $0x48] sm:$0xff]  ;;  %346 = vst [vmem:[%s2670_s21 + $0x18] sm:$0xff] %v345_v3 }
  0x31   : > { %348 = vst [vmem:[%s2670_s21 + $0x20] sm:$0xff] %v347_v4  ;;  %350 = vst [vmem:[%s2670_s21 + $0x28] sm:$0xff] %v349_v5  ;;  %v351_v6 = vld [vmem:[%s2665_s16 + $0x60] sm:$0xff]  ;;  %v353_v7 = vld [vmem:[%s2665_s16 + $0x68] sm:$0xff] }
  0x32   : > { %v355_v8 = vld [vmem:[%s2665_s16 + $0x80] sm:$0xff]  ;;  %352 = vst [vmem:[%s2670_s21 + $0x30] sm:$0xff] %v351_v6  ;;  %354 = vst [vmem:[%s2670_s21 + $0x38] sm:$0xff] %v353_v7  ;;  %v357_v9 = vld [vmem:[%s2665_s16 + $0x88] sm:$0xff] }
  0x33   : > { %356 = vst [vmem:[%s2670_s21 + $0x40] sm:$0xff] %v355_v8  ;;  %v359_v10 = vld [vmem:[%s2665_s16 + $0xa0] sm:$0xff]  ;;  %v361_v11 = vld [vmem:[%s2665_s16 + $0xa8] sm:$0xff]  ;;  %358 = vst [vmem:[%s2670_s21 + $0x48] sm:$0xff] %v357_v9 }
  0x34   : > { %360 = vst [vmem:[%s2670_s21 + $0x50] sm:$0xff] %v359_v10  ;;  %362 = vst [vmem:[%s2670_s21 + $0x58] sm:$0xff] %v361_v11  ;;  %v363_v12 = vld [vmem:[%s2665_s16 + $0xc0] sm:$0xff]  ;;  %v365_v13 = vld [vmem:[%s2665_s16 + $0xc8] sm:$0xff] }
  0x35   : > { %v367_v14 = vld [vmem:[%s2665_s16 + $0xe0] sm:$0xff]  ;;  %364 = vst [vmem:[%s2670_s21 + $0x60] sm:$0xff] %v363_v12  ;;  %366 = vst [vmem:[%s2670_s21 + $0x68] sm:$0xff] %v365_v13  ;;  %v369_v15 = vld [vmem:[%s2665_s16 + $0xe8] sm:$0xff] }
  0x36   : > { %368 = vst [vmem:[%s2670_s21 + $0x70] sm:$0xff] %v367_v14  ;;  %v371_v16 = vld [vmem:[%s2665_s16 + $0x100] sm:$0xff]  ;;  %v373_v17 = vld [vmem:[%s2665_s16 + $0x108] sm:$0xff]  ;;  %370 = vst [vmem:[%s2670_s21 + $0x78] sm:$0xff] %v369_v15 }
  0x37   : > { %372 = vst [vmem:[%s2670_s21 + $0x80] sm:$0xff] %v371_v16  ;;  %374 = vst [vmem:[%s2670_s21 + $0x88] sm:$0xff] %v373_v17  ;;  %v375_v18 = vld [vmem:[%s2665_s16 + $0x120] sm:$0xff]  ;;  %v377_v19 = vld [vmem:[%s2665_s16 + $0x128] sm:$0xff] }
  0x38   : > { %v379_v20 = vld [vmem:[%s2665_s16 + $0x140] sm:$0xff]  ;;  %376 = vst [vmem:[%s2670_s21 + $0x90] sm:$0xff] %v375_v18  ;;  %378 = vst [vmem:[%s2670_s21 + $0x98] sm:$0xff] %v377_v19  ;;  %v381_v21 = vld [vmem:[%s2665_s16 + $0x148] sm:$0xff] }
  0x39   : > { %380 = vst [vmem:[%s2670_s21 + $0xa0] sm:$0xff] %v379_v20  ;;  %v383_v22 = vld [vmem:[%s2665_s16 + $0x160] sm:$0xff]  ;;  %v385_v23 = vld [vmem:[%s2665_s16 + $0x168] sm:$0xff]  ;;  %382 = vst [vmem:[%s2670_s21 + $0xa8] sm:$0xff] %v381_v21 }
  0x3a   : > { %384 = vst [vmem:[%s2670_s21 + $0xb0] sm:$0xff] %v383_v22  ;;  %386 = vst [vmem:[%s2670_s21 + $0xb8] sm:$0xff] %v385_v23  ;;  %v387_v24 = vld [vmem:[%s2665_s16 + $0x180] sm:$0xff]  ;;  %v389_v25 = vld [vmem:[%s2665_s16 + $0x188] sm:$0xff] }
  0x3b   : > { %v391_v26 = vld [vmem:[%s2665_s16 + $0x1a0] sm:$0xff]  ;;  %388 = vst [vmem:[%s2670_s21 + $0xc0] sm:$0xff] %v387_v24  ;;  %390 = vst [vmem:[%s2670_s21 + $0xc8] sm:$0xff] %v389_v25  ;;  %v393_v27 = vld [vmem:[%s2665_s16 + $0x1a8] sm:$0xff] }
  0x3c   : > { %392 = vst [vmem:[%s2670_s21 + $0xd0] sm:$0xff] %v391_v26  ;;  %v395_v28 = vld [vmem:[%s2665_s16 + $0x1c0] sm:$0xff]  ;;  %v397_v29 = vld [vmem:[%s2665_s16 + $0x1c8] sm:$0xff]  ;;  %394 = vst [vmem:[%s2670_s21 + $0xd8] sm:$0xff] %v393_v27 }
  0x3d   : > { %396 = vst [vmem:[%s2670_s21 + $0xe0] sm:$0xff] %v395_v28  ;;  %398 = vst [vmem:[%s2670_s21 + $0xe8] sm:$0xff] %v397_v29  ;;  %v399_v30 = vld [vmem:[%s2665_s16 + $0x1e0] sm:$0xff]  ;;  %v401_v31 = vld [vmem:[%s2665_s16 + $0x1e8] sm:$0xff] }
  0x3e   : > { %v403_v32 = vld [vmem:[%s2665_s16 + $0x200] sm:$0xff]  ;;  %400 = vst [vmem:[%s2670_s21 + $0xf0] sm:$0xff] %v399_v30  ;;  %402 = vst [vmem:[%s2670_s21 + $0xf8] sm:$0xff] %v401_v31  ;;  %v405_v33 = vld [vmem:[%s2665_s16 + $0x208] sm:$0xff] }
  0x3f   : > { %404 = vst [vmem:[%s2670_s21 + $0x100] sm:$0xff] %v403_v32  ;;  %v407_v34 = vld [vmem:[%s2665_s16 + $0x220] sm:$0xff]  ;;  %v409_v35 = vld [vmem:[%s2665_s16 + $0x228] sm:$0xff]  ;;  %406 = vst [vmem:[%s2670_s21 + $0x108] sm:$0xff] %v405_v33 }
  0x40   : > { %408 = vst [vmem:[%s2670_s21 + $0x110] sm:$0xff] %v407_v34  ;;  %410 = vst [vmem:[%s2670_s21 + $0x118] sm:$0xff] %v409_v35  ;;  %v411_v36 = vld [vmem:[%s2665_s16 + $0x240] sm:$0xff]  ;;  %v413_v37 = vld [vmem:[%s2665_s16 + $0x248] sm:$0xff] }
  0x41   : > { %v415_v38 = vld [vmem:[%s2665_s16 + $0x260] sm:$0xff]  ;;  %412 = vst [vmem:[%s2670_s21 + $0x120] sm:$0xff] %v411_v36  ;;  %414 = vst [vmem:[%s2670_s21 + $0x128] sm:$0xff] %v413_v37  ;;  %v417_v39 = vld [vmem:[%s2665_s16 + $0x268] sm:$0xff] }
  0x42   : > { %416 = vst [vmem:[%s2670_s21 + $0x130] sm:$0xff] %v415_v38  ;;  %v419_v40 = vld [vmem:[%s2665_s16 + $0x280] sm:$0xff]  ;;  %v421_v41 = vld [vmem:[%s2665_s16 + $0x288] sm:$0xff]  ;;  %418 = vst [vmem:[%s2670_s21 + $0x138] sm:$0xff] %v417_v39 }
  0x43   : > { %420 = vst [vmem:[%s2670_s21 + $0x140] sm:$0xff] %v419_v40  ;;  %422 = vst [vmem:[%s2670_s21 + $0x148] sm:$0xff] %v421_v41  ;;  %v423_v42 = vld [vmem:[%s2665_s16 + $0x2a0] sm:$0xff]  ;;  %v425_v43 = vld [vmem:[%s2665_s16 + $0x2a8] sm:$0xff] }
  0x44   : > { %v427_v44 = vld [vmem:[%s2665_s16 + $0x2c0] sm:$0xff]  ;;  %424 = vst [vmem:[%s2670_s21 + $0x150] sm:$0xff] %v423_v42  ;;  %426 = vst [vmem:[%s2670_s21 + $0x158] sm:$0xff] %v425_v43  ;;  %v429_v45 = vld [vmem:[%s2665_s16 + $0x2c8] sm:$0xff] }
  0x45   : > { %428 = vst [vmem:[%s2670_s21 + $0x160] sm:$0xff] %v427_v44  ;;  %v431_v46 = vld [vmem:[%s2665_s16 + $0x2e0] sm:$0xff]  ;;  %v433_v47 = vld [vmem:[%s2665_s16 + $0x2e8] sm:$0xff]  ;;  %430 = vst [vmem:[%s2670_s21 + $0x168] sm:$0xff] %v429_v45 }
  0x46   : > { %432 = vst [vmem:[%s2670_s21 + $0x170] sm:$0xff] %v431_v46  ;;  %434 = vst [vmem:[%s2670_s21 + $0x178] sm:$0xff] %v433_v47  ;;  %v435_v48 = vld [vmem:[%s2665_s16 + $0x300] sm:$0xff]  ;;  %v437_v49 = vld [vmem:[%s2665_s16 + $0x308] sm:$0xff] }
  0x47   : > { %v439_v50 = vld [vmem:[%s2665_s16 + $0x320] sm:$0xff]  ;;  %436 = vst [vmem:[%s2670_s21 + $0x180] sm:$0xff] %v435_v48  ;;  %438 = vst [vmem:[%s2670_s21 + $0x188] sm:$0xff] %v437_v49  ;;  %v441_v51 = vld [vmem:[%s2665_s16 + $0x328] sm:$0xff] }
  0x48   : > { %440 = vst [vmem:[%s2670_s21 + $0x190] sm:$0xff] %v439_v50  ;;  %v443_v52 = vld [vmem:[%s2665_s16 + $0x340] sm:$0xff]  ;;  %v445_v53 = vld [vmem:[%s2665_s16 + $0x348] sm:$0xff]  ;;  %442 = vst [vmem:[%s2670_s21 + $0x198] sm:$0xff] %v441_v51 }
  0x49   : > { %444 = vst [vmem:[%s2670_s21 + $0x1a0] sm:$0xff] %v443_v52  ;;  %446 = vst [vmem:[%s2670_s21 + $0x1a8] sm:$0xff] %v445_v53  ;;  %v447_v54 = vld [vmem:[%s2665_s16 + $0x360] sm:$0xff]  ;;  %v449_v55 = vld [vmem:[%s2665_s16 + $0x368] sm:$0xff] }
  0x4a   : > { %v451_v56 = vld [vmem:[%s2665_s16 + $0x380] sm:$0xff]  ;;  %448 = vst [vmem:[%s2670_s21 + $0x1b0] sm:$0xff] %v447_v54  ;;  %450 = vst [vmem:[%s2670_s21 + $0x1b8] sm:$0xff] %v449_v55  ;;  %v453_v57 = vld [vmem:[%s2665_s16 + $0x388] sm:$0xff] }
  0x4b   : > { %452 = vst [vmem:[%s2670_s21 + $0x1c0] sm:$0xff] %v451_v56  ;;  %v455_v58 = vld [vmem:[%s2665_s16 + $0x3a0] sm:$0xff]  ;;  %v457_v59 = vld [vmem:[%s2665_s16 + $0x3a8] sm:$0xff]  ;;  %454 = vst [vmem:[%s2670_s21 + $0x1c8] sm:$0xff] %v453_v57 }
  0x4c   : > { %456 = vst [vmem:[%s2670_s21 + $0x1d0] sm:$0xff] %v455_v58  ;;  %458 = vst [vmem:[%s2670_s21 + $0x1d8] sm:$0xff] %v457_v59  ;;  %v459_v60 = vld [vmem:[%s2665_s16 + $0x3c0] sm:$0xff]  ;;  %v461_v61 = vld [vmem:[%s2665_s16 + $0x3c8] sm:$0xff] }
  0x4d   : > { %v463_v62 = vld [vmem:[%s2665_s16 + $0x3e0] sm:$0xff]  ;;  %460 = vst [vmem:[%s2670_s21 + $0x1e0] sm:$0xff] %v459_v60  ;;  %462 = vst [vmem:[%s2670_s21 + $0x1e8] sm:$0xff] %v461_v61  ;;  %v465_v63 = vld [vmem:[%s2665_s16 + $0x3e8] sm:$0xff] }
  0x4e   : > { %464 = vst [vmem:[%s2670_s21 + $0x1f0] sm:$0xff] %v463_v62  ;;  %466 = vst [vmem:[%s2670_s21 + $0x1f8] sm:$0xff] %v465_v63 }
  0x4f PF: > { %p1950_p0 = scmp.ge.s32.totalorder %s2516_s14, 1  ;;  %p488_p1 = scmp.lt.s32.totalorder %s2516_s14, 5 }
  0x51   : > { %p489_p2 = pnand %p1950_p0, %p488_p1 }
  0x52   : > { %s495_s17 = sand.u32 (!%p489_p2), 1, %s2492_s30   ;;  %s3093_s18 = sand.u32 (!%p489_p2), 1, %s2484_s28  }
  0x53   : > { %492 = sbr.rel (%p489_p2) target bundleno = 903 (0x387), region = 71  ;;  %s1951_s22 = sshll.u32 (!%p489_p2), %s495_s17, 9 }
  0x54   : > { %s1952_s15 = sshll.u32 (!%p489_p2), %s3093_s18, 5  ;;  %p557_p3 = scmp.lt.s32.totalorder (!%p489_p2), %s2504_s11, 1 }
  0x55   : > { %s1957_s19 = sshll.u32 (!%p489_p2), %s2500_s10, 6  ;;  %s3117_s0 = sld [smem:[#allocation19_spill]] (!%p489_p2) }
  0x56   : > { %p577_p4 = scmp.lt.s32.totalorder (!%p489_p2), %s1957_s19, 127  ;;  %p1961_p5 = scmp.ne.s32.totalorder (!%p489_p2), %s2500_s10, 0 }
  0x5a   : > { %s558_s24 = scalar_select %p557_p3, %s2504_s11, 1 }
  0x5b   : > { %s3140_s19 = smov (!%p577_p4, %s1957_s19), 127  ;;  %591 = sbr.rel (%p1961_p5) target bundleno = 275 (0x113), region = 79 }
  0x5c   : > { %s2097_s16 = sshll.u32 %s558_s24, 5  ;;  %s2806_s21 = sshll.u32 %s558_s24, 1  ;;  %v2518_v12 = vmov (!%p1961_p5), 0.0   ;;  %v635_v21 = vlaneseq (!%p1961_p5)  ;;  %v633_v31 = vld [vmem:[%s3081_s1] sm:$0x3] (!%p1961_p5) }
  0x5d   : > { %s2811_s12 = scalar_lea.vmem %s3117_s0, %s2097_s16  ;;  %s570_s18 = scalar_lea.vmem %s3083_s3, %s2806_s21  ;;  %702 = vst [vmem:[#allocation3] sm:$0xff] (!%p1961_p5), %v2518_v12  ;;  %703 = vst [vmem:[#allocation3 + $0x8] sm:$0xff] (!%p1961_p5), %v2518_v12  ;;  %v649_v37 = vld [vmem:[%s3082_s2] sm:$0x3] (!%p1961_p5) }
  0x5e   : > { %s574_s26 = scalar_lea.vmem %s3084_s4, %s2806_s21  ;;  %s2098_s29 = sshll.u32 %s3140_s19, 3  ;;  %v592_v0 = vld [vmem:[%s2811_s12] sm:$0xff] (!%p1961_p5)  ;;  %v593_v1 = vld [vmem:[%s2811_s12 + $0x8] sm:$0xff] (!%p1961_p5)  ;;  %v2838_v2 = vld [vmem:[%s2811_s12 + $0x10] sm:$0xff] (!%p1961_p5)  ;;  %704 = vst [vmem:[#allocation3 + $0x10] sm:$0xff] (!%p1961_p5), %v2518_v12  ;;  %v636_v26 = vshrl.u32 (!%p1961_p5), %v635_v21, 7 }
  0x5f   : > { %s2824_s27 = scalar_lea.vmem %s3086_s6, %s2098_s29  ;;  %s586_s14 = scalar_lea.vmem %s3087_s7, %s2806_s21  ;;  %v596_v3 = vadd.f32 (!%p1961_p5), %v593_v1, %v592_v0  ;;  %v605_v4 = vmul.f32 (!%p1961_p5), %v592_v0, %v592_v0  ;;  %v606_v5 = vmul.f32 (!%p1961_p5), %v593_v1, %v593_v1  ;;  %v595_v6 = vld [vmem:[%s2811_s12 + $0x18] sm:$0xff] (!%p1961_p5)  ;;  %v607_v7 = vmul.f32 (!%p1961_p5), %v2838_v2, %v2838_v2  ;;  %705 = vst [vmem:[#allocation3 + $0x18] sm:$0xff] (!%p1961_p5), %v2518_v12  ;;  %v665_v32 = vld [vmem:[%s570_s18] sm:$0x3] (!%p1961_p5) }
  0x60   : > { %s2830_s16 = scalar_lea.vmem [#allocation4], %s1951_s22  ;;  %s2832_s0 = scalar_lea.vmem [#allocation5], %s1952_s15  ;;  %v608_v8 = vmul.f32 (!%p1961_p5), %v595_v6, %v595_v6  ;;  %v599_v10 = vadd.f32 (!%p1961_p5), %v595_v6, %v2838_v2  ;;  %v637_v29 = vsub.s32 (!%p1961_p5), 0, %v636_v26  ;;  %v641_v30 = vsub.s32 (!%p1961_p5), 1, %v636_v26  ;;  %v682_v51 = vld [vmem:[%s574_s26] sm:$0x3] (!%p1961_p5) }
  0x61   : > { %597 = vadd.xlane.f32.xlu0 (!%p1961_p5), %v596_v3  ;;  %v609_v9 = vadd.f32 (!%p1961_p5), %v606_v5, %v605_v4  ;;  %v666_v39 = vadd.f32 (!%p1961_p5), 1.0, %v665_v32 }
  0x62   : > { %v612_v11 = vadd.f32 %v608_v8, %v607_v7  ;;  %v638_v35 = vrot.slane %v633_v31, %v637_v29  ;;  %v642_v36 = vrot.slane %v633_v31, %v641_v30  ;;  %v654_v42 = vrot.slane %v649_v37, %v637_v29 }
  0x63   : > { %610 = vadd.xlane.f32.xlu1 %v609_v9  ;;  %v658_v43 = vrot.slane %v649_v37, %v641_v30  ;;  %v671_v49 = vrot.slane %v666_v39, %v637_v29  ;;  %v675_v50 = vrot.slane %v666_v39, %v641_v30  ;;  %v687_v58 = vrot.slane %v682_v51, %v637_v29 }
  0x64   : > { %v691_v59 = vrot.slane %v682_v51, %v641_v30 }
  0x65   : > { %600 = vadd.xlane.f32.xlu0 %v599_v10 }
  0x67   : > { %613 = vadd.xlane.f32.xlu1 %v612_v11 }
  0xee   : > { %v598_v13 = vpop.xlane.xlu0 %597 }
  0xef   : > { %v603_v14 = vmul.f32 0.00390625, %v598_v13 }
  0xf0   : > { %v611_v15 = vpop.xlane.xlu1 %610 }
  0xf1   : > { %v615_v16 = vmul.f32 0.00390625, %v611_v15  ;;  %v617_v17 = vmul.f32 %v603_v14, %v603_v14  ;;  %v621_v33 = vsub.f32 %v592_v0, %v603_v14  ;;  %v622_v34 = vsub.f32 %v593_v1, %v603_v14 }
  0xf2   : > { %v601_v18 = vpop.xlane.xlu0 %600 }
  0xf3   : > { %v619_v19 = vsub.f32 %v615_v16, %v617_v17  ;;  %v604_v20 = vmul.f32 0.00390625, %v601_v18 }
  0xf4   : > { %v614_v22 = vpop.xlane.xlu1 %613 }
  0xf5   : > { %v625_v23 = vadd.f32 1e-05, %v619_v19  ;;  %v616_v24 = vmul.f32 0.00390625, %v614_v22  ;;  %v618_v25 = vmul.f32 %v604_v20, %v604_v20  ;;  %v623_v46 = vsub.f32 %v2838_v2, %v604_v20 }
  0xf6   : > { %v624_v47 = vsub.f32 %v595_v6, %v604_v20 }
  0xf7   : > { %2194 = vrsqrt.f32 %v625_v23  ;;  %v620_v27 = vsub.f32 %v616_v24, %v618_v25 }
  0xf9   : > { %v626_v28 = vadd.f32 1e-05, %v620_v27 }
  0xfb   : > { %2196 = vrsqrt.f32 %v626_v28 }
 0x101   : > { %v2195_v38 = vpop.eup %2194 }
 0x102   : > { %v629_v40 = vmul.f32 %v2195_v38, %v621_v33  ;;  %v630_v41 = vmul.f32 %v2195_v38, %v622_v34 }
 0x104   : > { %v645_v44 = vmul.f32 %v638_v35, %v629_v40  ;;  %v646_v45 = vmul.f32 %v642_v36, %v630_v41 }
 0x105   : > { %v2197_v48 = vpop.eup %2196 }
 0x106   : > { %v661_v52 = vadd.f32 %v654_v42, %v645_v44  ;;  %v662_v53 = vadd.f32 %v658_v43, %v646_v45  ;;  %v631_v54 = vmul.f32 %v2197_v48, %v623_v46  ;;  %v632_v55 = vmul.f32 %v2197_v48, %v624_v47 }
 0x108   : > { %v647_v56 = vmul.f32 %v638_v35, %v631_v54  ;;  %v648_v57 = vmul.f32 %v642_v36, %v632_v55  ;;  %v678_v60 = vmul.f32 %v671_v49, %v661_v52  ;;  %v679_v61 = vmul.f32 %v675_v50, %v662_v53 }
 0x10a   : > { %v663_v62 = vadd.f32 %v654_v42, %v647_v56  ;;  %v664_v63 = vadd.f32 %v658_v43, %v648_v57  ;;  %v694_v2 = vadd.f32 %v687_v58, %v678_v60  ;;  %v695_v3 = vadd.f32 %v691_v59, %v679_v61 }
 0x10c   : > { %v680_v0 = vmul.f32 %v671_v49, %v663_v62  ;;  %v681_v1 = vmul.f32 %v675_v50, %v664_v63 }
 0x10e   : > { %v696_v4 = vadd.f32 %v687_v58, %v680_v0  ;;  %v697_v5 = vadd.f32 %v691_v59, %v681_v1 }
 0x110   : > { %v698_v6 = vpack.c.bf16 %v696_v4, %v694_v2  ;;  %v699_v7 = vpack.c.bf16 %v697_v5, %v695_v3 }
 0x112   : > { %700 = vst [vmem:[#allocation2] sm:$0xff] %v698_v6  ;;  %701 = vst [vmem:[#allocation2 + $0x8] sm:$0xff] %v699_v7 }
 0x113 PF: > { %v2198_v8 = vld [vmem:[%s2830_s16 + $0x4] ss:$16 sps:$4 sm:$0xff]   ;;  %v2200_v9 = vld [vmem:[%s2830_s16] ss:$16 sps:$4 sm:$0xff]   ;;  %v2248_v51 = vld [vmem:[%s2830_s16 + $0xc] ss:$16 sps:$4 sm:$0xff]  }
 0x114   : > { %1092 = vmatprep.subr.bf16.mxu1 %v2198_v8  ;;  %v2201_v10 = vld [vmem:[%s2830_s16 + $0x24] ss:$16 sps:$4 sm:$0xff]   ;;  %v2203_v11 = vld [vmem:[%s2830_s16 + $0x20] ss:$16 sps:$4 sm:$0xff]   ;;  %v2246_v54 = vld [vmem:[%s2830_s16 + $0x8] ss:$16 sps:$4 sm:$0xff]  }
 0x115   : > { %1093 = vmatpush1.bf16.msra.mxu1 %v2200_v9  ;;  %v2204_v12 = vld [vmem:[%s2830_s16 + $0x44] ss:$16 sps:$4 sm:$0xff]   ;;  %v2206_v13 = vld [vmem:[%s2830_s16 + $0x40] ss:$16 sps:$4 sm:$0xff]   ;;  %v2251_v55 = vld [vmem:[%s2830_s16 + $0x2c] ss:$16 sps:$4 sm:$0xff]  }
 0x116   : > { %1094 = vmatprep.subr.bf16.mxu1 %v2201_v10  ;;  %v2207_v14 = vld [vmem:[%s2830_s16 + $0x64] ss:$16 sps:$4 sm:$0xff]   ;;  %v2209_v15 = vld [vmem:[%s2830_s16 + $0x60] ss:$16 sps:$4 sm:$0xff]   ;;  %v2249_v58 = vld [vmem:[%s2830_s16 + $0x28] ss:$16 sps:$4 sm:$0xff]  }
 0x117   : > { %v2210_v16 = vld [vmem:[%s2830_s16 + $0x84] ss:$16 sps:$4 sm:$0xff]   ;;  %v2212_v17 = vld [vmem:[%s2830_s16 + $0x80] ss:$16 sps:$4 sm:$0xff]   ;;  %v2254_v59 = vld [vmem:[%s2830_s16 + $0x4c] ss:$16 sps:$4 sm:$0xff]  }
 0x118   : > { %v2213_v18 = vld [vmem:[%s2830_s16 + $0xa4] ss:$16 sps:$4 sm:$0xff]   ;;  %v2215_v19 = vld [vmem:[%s2830_s16 + $0xa0] ss:$16 sps:$4 sm:$0xff]   ;;  %v2252_v62 = vld [vmem:[%s2830_s16 + $0x48] ss:$16 sps:$4 sm:$0xff]  }
 0x119   : > { %1095 = vmatpush1.bf16.msra.mxu1 %v2203_v11  ;;  %v2216_v20 = vld [vmem:[%s2830_s16 + $0xc4] ss:$16 sps:$4 sm:$0xff]   ;;  %v2874_v21 = vld [vmem:[#allocation2 + $0x8] sm:$0xff]  ;;  %v2218_v22 = vld [vmem:[%s2830_s16 + $0xc0] ss:$16 sps:$4 sm:$0xff]   ;;  %p2090_p6 = scmp.ne.s32.totalorder %s2500_s10, 1 }
 0x11a   : > { %1096 = vmatprep.subr.bf16.mxu1 %v2204_v12  ;;  %1124 = vmatprep.mubr.bf16.mxu1 %v2874_v21  ;;  %v2219_v23 = vld [vmem:[%s2830_s16 + $0xe4] ss:$16 sps:$4 sm:$0xff]   ;;  %v2221_v24 = vld [vmem:[%s2830_s16 + $0xe0] ss:$16 sps:$4 sm:$0xff]   ;;  %v2257_v63 = vld [vmem:[%s2830_s16 + $0x6c] ss:$16 sps:$4 sm:$0xff]  }
 0x11b   : > { %v2222_v25 = vld [vmem:[%s2830_s16 + $0x104] ss:$16 sps:$4 sm:$0xff]   ;;  %v2224_v26 = vld [vmem:[%s2830_s16 + $0x100] ss:$16 sps:$4 sm:$0xff]   ;;  %v2255_v1 = vld [vmem:[%s2830_s16 + $0x68] ss:$16 sps:$4 sm:$0xff]  }
 0x11c   : > { %v2225_v27 = vld [vmem:[%s2830_s16 + $0x124] ss:$16 sps:$4 sm:$0xff]   ;;  %v2227_v28 = vld [vmem:[%s2830_s16 + $0x120] ss:$16 sps:$4 sm:$0xff]   ;;  %v2260_v2 = vld [vmem:[%s2830_s16 + $0x8c] ss:$16 sps:$4 sm:$0xff]  }
 0x11d   : > { %1097 = vmatpush1.bf16.msra.mxu1 %v2206_v13  ;;  %v2228_v29 = vld [vmem:[%s2830_s16 + $0x144] ss:$16 sps:$4 sm:$0xff]   ;;  %v2230_v30 = vld [vmem:[%s2830_s16 + $0x140] ss:$16 sps:$4 sm:$0xff]   ;;  %v2258_v3 = vld [vmem:[%s2830_s16 + $0x88] ss:$16 sps:$4 sm:$0xff]  }
 0x11e   : > { %1098 = vmatprep.subr.bf16.mxu1 %v2207_v14  ;;  %v2231_v31 = vld [vmem:[%s2830_s16 + $0x164] ss:$16 sps:$4 sm:$0xff]   ;;  %v2233_v32 = vld [vmem:[%s2830_s16 + $0x160] ss:$16 sps:$4 sm:$0xff]   ;;  %v2263_v4 = vld [vmem:[%s2830_s16 + $0xac] ss:$16 sps:$4 sm:$0xff]  }
 0x11f   : > { %v2234_v33 = vld [vmem:[%s2830_s16 + $0x184] ss:$16 sps:$4 sm:$0xff]   ;;  %v2296_v35 = vld [vmem:[%s2824_s27] ss:$8 sps:$4 sm:$0xff]   ;;  %v2299_v38 = vld [vmem:[%s2824_s27 + $0x10] ss:$8 sps:$4 sm:$0xff]  }
 0x120   : > { %v2294_v34 = vld [vmem:[%s2824_s27 + $0x4] ss:$8 sps:$4 sm:$0xff]   ;;  %v2297_v36 = vld [vmem:[%s2824_s27 + $0x14] ss:$8 sps:$4 sm:$0xff]   ;;  %v2236_v37 = vld [vmem:[%s2830_s16 + $0x180] ss:$16 sps:$4 sm:$0xff]  }
 0x121   : > { %1099 = vmatpush1.bf16.msra.mxu1 %v2209_v15  ;;  %1642 = vmatprep.subr.bf16.mxu0 %v2294_v34  ;;  %v2237_v39 = vld [vmem:[%s2830_s16 + $0x1a4] ss:$16 sps:$4 sm:$0xff]   ;;  %v2239_v41 = vld [vmem:[%s2830_s16 + $0x1a0] ss:$16 sps:$4 sm:$0xff]   ;;  %v2261_v5 = vld [vmem:[%s2830_s16 + $0xa8] ss:$16 sps:$4 sm:$0xff]  }
 0x122   : > { %1100 = vmatprep.subr.bf16.mxu1 %v2210_v16  ;;  %1643 = vmatpush1.bf16.msra.mxu0 %v2296_v35  ;;  %v2300_v40 = vld [vmem:[%s2824_s27 + $0x24] ss:$8 sps:$4 sm:$0xff]   ;;  %v2302_v42 = vld [vmem:[%s2824_s27 + $0x20] ss:$8 sps:$4 sm:$0xff]   ;;  %v2303_v44 = vld [vmem:[%s2824_s27 + $0x34] ss:$8 sps:$4 sm:$0xff]  }
 0x123   : > { %1644 = vmatprep.subr.bf16.mxu0 %v2297_v36  ;;  %v2240_v43 = vld [vmem:[%s2830_s16 + $0x1c4] ss:$16 sps:$4 sm:$0xff]   ;;  %v2242_v45 = vld [vmem:[%s2830_s16 + $0x1c0] ss:$16 sps:$4 sm:$0xff]   ;;  %v2266_v6 = vld [vmem:[%s2830_s16 + $0xcc] ss:$16 sps:$4 sm:$0xff]  }
 0x124   : > { %v2305_v46 = vld [vmem:[%s2824_s27 + $0x30] ss:$8 sps:$4 sm:$0xff]   ;;  %v2243_v47 = vld [vmem:[%s2830_s16 + $0x1e4] ss:$16 sps:$4 sm:$0xff]   ;;  %v2308_v50 = vld [vmem:[%s2824_s27 + $0x40] ss:$8 sps:$4 sm:$0xff]  }
 0x125   : > { %1101 = vmatpush1.bf16.msra.mxu1 %v2212_v17  ;;  %v2306_v48 = vld [vmem:[%s2824_s27 + $0x44] ss:$8 sps:$4 sm:$0xff]   ;;  %v2245_v49 = vld [vmem:[%s2830_s16 + $0x1e0] ss:$16 sps:$4 sm:$0xff]   ;;  %v2309_v52 = vld [vmem:[%s2824_s27 + $0x54] ss:$8 sps:$4 sm:$0xff]  }
 0x126   : > { %1102 = vmatprep.subr.bf16.mxu1 %v2213_v18  ;;  %1645 = vmatpush1.bf16.msra.mxu0 %v2299_v38  ;;  %v2908_v53 = vld [vmem:[#allocation2] sm:$0xff]  ;;  %v2311_v56 = vld [vmem:[%s2824_s27 + $0x50] ss:$8 sps:$4 sm:$0xff]   ;;  %v2315_v61 = vld [vmem:[%s2824_s27 + $0x74] ss:$8 sps:$4 sm:$0xff]  }
 0x127   : > { %1646 = vmatprep.subr.bf16.mxu0 %v2300_v40  ;;  %v2312_v57 = vld [vmem:[%s2824_s27 + $0x64] ss:$8 sps:$4 sm:$0xff]   ;;  %v2314_v60 = vld [vmem:[%s2824_s27 + $0x60] ss:$8 sps:$4 sm:$0xff]   ;;  %v2317_v0 = vld [vmem:[%s2824_s27 + $0x70] ss:$8 sps:$4 sm:$0xff]  }
 0x128   : > { %v2264_v7 = vld [vmem:[%s2830_s16 + $0xc8] ss:$16 sps:$4 sm:$0xff]   ;;  %v2269_v8 = vld [vmem:[%s2830_s16 + $0xec] ss:$16 sps:$4 sm:$0xff]  }
 0x129   : > { %1103 = vmatpush1.bf16.msra.mxu1 %v2215_v19  ;;  %v2267_v9 = vld [vmem:[%s2830_s16 + $0xe8] ss:$16 sps:$4 sm:$0xff]   ;;  %v2272_v10 = vld [vmem:[%s2830_s16 + $0x10c] ss:$16 sps:$4 sm:$0xff]  }
 0x12a   : > { %1104 = vmatprep.subr.bf16.mxu1 %v2216_v20  ;;  %1647 = vmatpush1.bf16.msra.mxu0 %v2302_v42  ;;  %v2270_v11 = vld [vmem:[%s2830_s16 + $0x108] ss:$16 sps:$4 sm:$0xff]   ;;  %v2275_v12 = vld [vmem:[%s2830_s16 + $0x12c] ss:$16 sps:$4 sm:$0xff]  }
 0x12b   : > { %1648 = vmatprep.subr.bf16.mxu0 %v2303_v44  ;;  %v2273_v13 = vld [vmem:[%s2830_s16 + $0x128] ss:$16 sps:$4 sm:$0xff]   ;;  %v2278_v14 = vld [vmem:[%s2830_s16 + $0x14c] ss:$16 sps:$4 sm:$0xff]  }
 0x12c   : > { %v2276_v15 = vld [vmem:[%s2830_s16 + $0x148] ss:$16 sps:$4 sm:$0xff]   ;;  %v2281_v16 = vld [vmem:[%s2830_s16 + $0x16c] ss:$16 sps:$4 sm:$0xff]  }
 0x12d   : > { %1105 = vmatpush1.bf16.msra.mxu1 %v2218_v22  ;;  %v2279_v17 = vld [vmem:[%s2830_s16 + $0x168] ss:$16 sps:$4 sm:$0xff]   ;;  %v2284_v18 = vld [vmem:[%s2830_s16 + $0x18c] ss:$16 sps:$4 sm:$0xff]  }
 0x12e   : > { %1106 = vmatprep.subr.bf16.mxu1 %v2219_v23  ;;  %1649 = vmatpush1.bf16.msra.mxu0 %v2305_v46  ;;  %v2282_v19 = vld [vmem:[%s2830_s16 + $0x188] ss:$16 sps:$4 sm:$0xff]   ;;  %v2287_v20 = vld [vmem:[%s2830_s16 + $0x1ac] ss:$16 sps:$4 sm:$0xff]  }
 0x12f   : > { %1650 = vmatprep.subr.bf16.mxu0 %v2306_v48  ;;  %v2290_v22 = vld [vmem:[%s2830_s16 + $0x1cc] ss:$16 sps:$4 sm:$0xff]   ;;  %v2288_v23 = vld [vmem:[%s2830_s16 + $0x1c8] ss:$16 sps:$4 sm:$0xff]  }
 0x130   : > { %v2330_v34 = vld [vmem:[%s2824_s27 + $0xc4] ss:$8 sps:$4 sm:$0xff]   ;;  %v2332_v35 = vld [vmem:[%s2824_s27 + $0xc0] ss:$8 sps:$4 sm:$0xff]   ;;  %v2333_v36 = vld [vmem:[%s2824_s27 + $0xd4] ss:$8 sps:$4 sm:$0xff]  }
 0x131   : > { %1107 = vmatpush1.bf16.msra.mxu1 %v2221_v24  ;;  %v2293_v24 = vld [vmem:[%s2830_s16 + $0x1ec] ss:$16 sps:$4 sm:$0xff]  }
 0x132   : > { %1108 = vmatprep.subr.bf16.mxu1 %v2222_v25  ;;  %1651 = vmatpush1.bf16.msra.mxu0 %v2308_v50  ;;  %v2291_v25 = vld [vmem:[%s2830_s16 + $0x1e8] ss:$16 sps:$4 sm:$0xff]   ;;  %v2336_v38 = vld [vmem:[%s2824_s27 + $0xe4] ss:$8 sps:$4 sm:$0xff]   ;;  %v2339_v40 = vld [vmem:[%s2824_s27 + $0xf4] ss:$8 sps:$4 sm:$0xff]  }
 0x133   : > { %1652 = vmatprep.subr.bf16.mxu0 %v2309_v52  ;;  %v2344_v42 = vld [vmem:[%s2824_s27 + $0x104] ss:$8 sps:$4 sm:$0xff]  }
 0x135   : > { %1109 = vmatpush1.bf16.msra.mxu1 %v2224_v26  ;;  %v2318_v26 = vld [vmem:[%s2824_s27 + $0x84] ss:$8 sps:$4 sm:$0xff]  }
 0x136   : > { %1110 = vmatprep.subr.bf16.mxu1 %v2225_v27  ;;  %1653 = vmatpush1.bf16.msra.mxu0 %v2311_v56  ;;  %v2320_v27 = vld [vmem:[%s2824_s27 + $0x80] ss:$8 sps:$4 sm:$0xff]  }
 0x137   : > { %1654 = vmatprep.subr.bf16.mxu0 %v2312_v57 }
 0x139   : > { %1111 = vmatpush1.bf16.msra.mxu1 %v2227_v28  ;;  %v2321_v28 = vld [vmem:[%s2824_s27 + $0x94] ss:$8 sps:$4 sm:$0xff]  }
 0x13a   : > { %1112 = vmatprep.subr.bf16.mxu1 %v2228_v29  ;;  %1655 = vmatpush1.bf16.msra.mxu0 %v2314_v60  ;;  %v2323_v29 = vld [vmem:[%s2824_s27 + $0x90] ss:$8 sps:$4 sm:$0xff]  }
 0x13b   : > { %1656 = vmatprep.subr.bf16.mxu0 %v2315_v61 }
 0x13d   : > { %1113 = vmatpush1.bf16.msra.mxu1 %v2230_v30  ;;  %v2324_v30 = vld [vmem:[%s2824_s27 + $0xa4] ss:$8 sps:$4 sm:$0xff]  }
 0x13e   : > { %1114 = vmatprep.subr.bf16.mxu1 %v2231_v31  ;;  %1657 = vmatpush1.bf16.msra.mxu0 %v2317_v0  ;;  %v2326_v31 = vld [vmem:[%s2824_s27 + $0xa0] ss:$8 sps:$4 sm:$0xff]  }
 0x13f   : > { %1658 = vmatprep.subr.bf16.mxu0 %v2318_v26  ;;  %v2353_v26 = vld [vmem:[%s2824_s27 + $0x134] ss:$8 sps:$4 sm:$0xff]  }
 0x141   : > { %1115 = vmatpush1.bf16.msra.mxu1 %v2233_v32  ;;  %v2327_v32 = vld [vmem:[%s2824_s27 + $0xb4] ss:$8 sps:$4 sm:$0xff]  }
 0x142   : > { %1116 = vmatprep.subr.bf16.mxu1 %v2234_v33  ;;  %1659 = vmatpush1.bf16.msra.mxu0 %v2320_v27  ;;  %v2329_v33 = vld [vmem:[%s2824_s27 + $0xb0] ss:$8 sps:$4 sm:$0xff]  }
 0x143   : > { %1660 = vmatprep.subr.bf16.mxu0 %v2321_v28  ;;  %v2351_v27 = vld [vmem:[%s2824_s27 + $0x130] ss:$8 sps:$4 sm:$0xff]   ;;  %v2356_v28 = vld [vmem:[%s2824_s27 + $0x144] ss:$8 sps:$4 sm:$0xff]  }
 0x145   : > { %1117 = vmatpush1.bf16.msra.mxu1 %v2236_v37  ;;  %v2335_v37 = vld [vmem:[%s2824_s27 + $0xd0] ss:$8 sps:$4 sm:$0xff]  }
 0x146   : > { %1118 = vmatprep.subr.bf16.mxu1 %v2237_v39  ;;  %1661 = vmatpush1.bf16.msra.mxu0 %v2323_v29  ;;  %v2338_v39 = vld [vmem:[%s2824_s27 + $0xe0] ss:$8 sps:$4 sm:$0xff]  }
 0x147   : > { %1662 = vmatprep.subr.bf16.mxu0 %v2324_v30  ;;  %v2354_v29 = vld [vmem:[%s2824_s27 + $0x140] ss:$8 sps:$4 sm:$0xff]   ;;  %v2359_v30 = vld [vmem:[%s2824_s27 + $0x154] ss:$8 sps:$4 sm:$0xff]  }
 0x149   : > { %1119 = vmatpush1.bf16.msra.mxu1 %v2239_v41  ;;  %v2341_v41 = vld [vmem:[%s2824_s27 + $0xf0] ss:$8 sps:$4 sm:$0xff]  }
 0x14a   : > { %1120 = vmatprep.subr.bf16.mxu1 %v2240_v43  ;;  %1663 = vmatpush1.bf16.msra.mxu0 %v2326_v31  ;;  %v2357_v31 = vld [vmem:[%s2824_s27 + $0x150] ss:$8 sps:$4 sm:$0xff]  }
 0x14b   : > { %1664 = vmatprep.subr.bf16.mxu0 %v2327_v32  ;;  %v2362_v32 = vld [vmem:[%s2824_s27 + $0x164] ss:$8 sps:$4 sm:$0xff]  }
 0x14d   : > { %1121 = vmatpush1.bf16.msra.mxu1 %v2242_v45 }
 0x14e   : > { %1122 = vmatprep.subr.bf16.mxu1 %v2243_v47  ;;  %1665 = vmatpush1.bf16.msra.mxu0 %v2329_v33  ;;  %v2360_v33 = vld [vmem:[%s2824_s27 + $0x160] ss:$8 sps:$4 sm:$0xff]  }
 0x14f   : > { %1666 = vmatprep.subr.bf16.mxu0 %v2330_v34  ;;  %v2365_v34 = vld [vmem:[%s2824_s27 + $0x174] ss:$8 sps:$4 sm:$0xff]  }
 0x151   : > { %1123 = vmatpush1.bf16.msra.mxu1 %v2245_v49 }
 0x152   : > { %1135 = vmatprep.subr.bf16.mxu1 %v2248_v51  ;;  %1667 = vmatpush1.bf16.msra.mxu0 %v2332_v35  ;;  %v2363_v35 = vld [vmem:[%s2824_s27 + $0x170] ss:$8 sps:$4 sm:$0xff]  }
 0x153   : > { %1668 = vmatprep.subr.bf16.mxu0 %v2333_v36  ;;  %v2368_v36 = vld [vmem:[%s2824_s27 + $0x184] ss:$8 sps:$4 sm:$0xff]  }
 0x154   : > { %1125 = vmatmul.mubr.bf16.vlgmr.msra.gmra.mrb[0].mxu1 %v2908_v53 }
 0x155   : > { %1136 = vmatpush1.bf16.msra.mxu1 %v2246_v54  ;;  %1167 = vmatprep.mubr.bf16.mxu1 %v2874_v21  ;;  %v2285_v21 = vld [vmem:[%s2830_s16 + $0x1a8] ss:$16 sps:$4 sm:$0xff]  }
 0x156   : > { %1137 = vmatprep.subr.bf16.mxu1 %v2251_v55  ;;  %1669 = vmatpush1.bf16.msra.mxu0 %v2335_v37  ;;  %v2366_v37 = vld [vmem:[%s2824_s27 + $0x180] ss:$8 sps:$4 sm:$0xff]  }
 0x157   : > { %1670 = vmatprep.subr.bf16.mxu0 %v2336_v38  ;;  %v2371_v38 = vld [vmem:[%s2824_s27 + $0x194] ss:$8 sps:$4 sm:$0xff]  }
 0x159   : > { %1138 = vmatpush1.bf16.msra.mxu1 %v2249_v58 }
 0x15a   : > { %1139 = vmatprep.subr.bf16.mxu1 %v2254_v59  ;;  %1671 = vmatpush1.bf16.msra.mxu0 %v2338_v39 }
 0x15b   : > { %1672 = vmatprep.subr.bf16.mxu0 %v2339_v40 }
 0x15d   : > { %1140 = vmatpush1.bf16.msra.mxu1 %v2252_v62 }
 0x15e   : > { %1141 = vmatprep.subr.bf16.mxu1 %v2257_v63  ;;  %1673 = vmatpush1.bf16.msra.mxu0 %v2341_v41 }
 0x15f   : > { %1685 = vmatprep.subr.bf16.mxu0 %v2344_v42  ;;  %v2369_v42 = vld [vmem:[%s2824_s27 + $0x190] ss:$8 sps:$4 sm:$0xff]  }
 0x161   : > { %1142 = vmatpush1.bf16.msra.mxu1 %v2255_v1 }
 0x162   : > { %1143 = vmatprep.subr.bf16.mxu1 %v2260_v2 }
 0x165   : > { %1144 = vmatpush1.bf16.msra.mxu1 %v2258_v3 }
 0x166   : > { %1145 = vmatprep.subr.bf16.mxu1 %v2263_v4 }
 0x169   : > { %1146 = vmatpush1.bf16.msra.mxu1 %v2261_v5 }
 0x16a   : > { %1147 = vmatprep.subr.bf16.mxu1 %v2266_v6 }
 0x16d   : > { %1148 = vmatpush1.bf16.msra.mxu1 %v2264_v7 }
 0x16e   : > { %1149 = vmatprep.subr.bf16.mxu1 %v2269_v8 }
 0x171   : > { %1150 = vmatpush1.bf16.msra.mxu1 %v2267_v9 }
 0x172   : > { %1151 = vmatprep.subr.bf16.mxu1 %v2272_v10 }
 0x175   : > { %1152 = vmatpush1.bf16.msra.mxu1 %v2270_v11 }
 0x176   : > { %1153 = vmatprep.subr.bf16.mxu1 %v2275_v12 }
 0x179   : > { %1154 = vmatpush1.bf16.msra.mxu1 %v2273_v13 }
 0x17a   : > { %1155 = vmatprep.subr.bf16.mxu1 %v2278_v14 }
 0x17d   : > { %1156 = vmatpush1.bf16.msra.mxu1 %v2276_v15 }
 0x17e   : > { %1157 = vmatprep.subr.bf16.mxu1 %v2281_v16 }
 0x181   : > { %1158 = vmatpush1.bf16.msra.mxu1 %v2279_v17 }
 0x182   : > { %1159 = vmatprep.subr.bf16.mxu1 %v2284_v18 }
 0x185   : > { %1160 = vmatpush1.bf16.msra.mxu1 %v2282_v19 }
 0x186   : > { %1161 = vmatprep.subr.bf16.mxu1 %v2287_v20 }
 0x189   : > { %1162 = vmatpush1.bf16.msra.mxu1 %v2285_v21  ;;  %v2342_v21 = vld [vmem:[%s2824_s27 + $0x100] ss:$8 sps:$4 sm:$0xff]  }
 0x18a   : > { %1163 = vmatprep.subr.bf16.mxu1 %v2290_v22  ;;  %v2347_v22 = vld [vmem:[%s2824_s27 + $0x114] ss:$8 sps:$4 sm:$0xff]  }
 0x18d   : > { %1164 = vmatpush1.bf16.msra.mxu1 %v2288_v23  ;;  %v2345_v23 = vld [vmem:[%s2824_s27 + $0x110] ss:$8 sps:$4 sm:$0xff]  }
 0x18e   : > { %1165 = vmatprep.subr.bf16.mxu1 %v2293_v24  ;;  %v2350_v24 = vld [vmem:[%s2824_s27 + $0x124] ss:$8 sps:$4 sm:$0xff]  }
 0x191   : > { %1166 = vmatpush1.bf16.msra.mxu1 %v2291_v25  ;;  %v2348_v25 = vld [vmem:[%s2824_s27 + $0x120] ss:$8 sps:$4 sm:$0xff]  }
 0x194   : > { %1168 = vmatmul.mubr.bf16.vlgmr.msra.gmra.mrb[4].mxu1 %v2908_v53 }
 0x227   : > { %v1126_v43 = vpop.f32.mrb[0].mxu1 }
 0x228   : > { %v1186_v44 = vmul.f32 0.044715, %v1126_v43  ;;  %v1128_v45 = vpop.f32.mrb[1].mxu1  ;;  %v1178_v9 = vmul.f32 0.5, %v1126_v43 }
 0x229   : > { %v1187_v46 = vmul.f32 0.044715, %v1128_v45  ;;  %v1130_v47 = vpop.f32.mrb[2].mxu1  ;;  %v1179_v12 = vmul.f32 0.5, %v1128_v45 }
 0x22a   : > { %v1194_v48 = vmul.f32 %v1186_v44, %v1126_v43  ;;  %v1190_v49 = vmul.f32 0.044715, %v1130_v47  ;;  %v1132_v50 = vpop.f32.mrb[3].mxu1  ;;  %v1182_v10 = vmul.f32 0.5, %v1130_v47 }
 0x22b   : > { %v1195_v51 = vmul.f32 %v1187_v46, %v1128_v45  ;;  %v1191_v52 = vmul.f32 0.044715, %v1132_v50  ;;  %v1183_v13 = vmul.f32 0.5, %v1132_v50 }
 0x22c   : > { %v1202_v53 = vmul.f32 %v1194_v48, %v1126_v43  ;;  %v1198_v54 = vmul.f32 %v1190_v49, %v1130_v47 }
 0x22d   : > { %v1203_v55 = vmul.f32 %v1195_v51, %v1128_v45  ;;  %v1199_v56 = vmul.f32 %v1191_v52, %v1132_v50 }
 0x22e   : > { %v1210_v57 = vadd.f32 %v1202_v53, %v1126_v43  ;;  %v1206_v58 = vmul.f32 %v1198_v54, %v1130_v47  ;;  %v2372_v53 = vld [vmem:[%s2824_s27 + $0x1a0] ss:$8 sps:$4 sm:$0xff]  }
 0x22f   : > { %v1207_v59 = vmul.f32 %v1199_v56, %v1132_v50  ;;  %v1211_v60 = vadd.f32 %v1203_v55, %v1128_v45  ;;  %v2374_v45 = vld [vmem:[%s2824_s27 + $0x1a4] ss:$8 sps:$4 sm:$0xff]   ;;  %v2377_v56 = vld [vmem:[%s2824_s27 + $0x1b4] ss:$8 sps:$4 sm:$0xff]  }
 0x230   : > { %v1218_v61 = vmul.f32 0.7978846, %v1210_v57  ;;  %v1214_v62 = vadd.f32 %v1206_v58, %v1130_v47 }
 0x231   : > { %v1215_v63 = vadd.f32 %v1207_v59, %v1132_v50  ;;  %v1219_v0 = vmul.f32 0.7978846, %v1211_v60 }
 0x232   : > { %2390 = vtanh.f32 %v1218_v61  ;;  %v1222_v1 = vmul.f32 0.7978846, %v1214_v62 }
 0x233   : > { %v1223_v2 = vmul.f32 0.7978846, %v1215_v63  ;;  %2392 = vtanh.f32 %v1219_v0  ;;  %v2375_v63 = vld [vmem:[%s2824_s27 + $0x1b0] ss:$8 sps:$4 sm:$0xff]  }
 0x234   : > { %2394 = vtanh.f32 %v1222_v1 }
 0x235   : > { %2396 = vtanh.f32 %v1223_v2  ;;  %v2380_v2 = vld [vmem:[%s2824_s27 + $0x1c4] ss:$8 sps:$4 sm:$0xff]  }
 0x23c   : > { %v2391_v3 = vpop.eup %2390 }
 0x23d   : > { %v2393_v4 = vpop.eup %2392  ;;  %v1234_v5 = vadd.f32 1.0, %v2391_v3 }
 0x23e   : > { %v2395_v6 = vpop.eup %2394  ;;  %v1235_v7 = vadd.f32 1.0, %v2393_v4 }
 0x23f   : > { %v2397_v8 = vpop.eup %2396  ;;  %v1238_v11 = vadd.f32 1.0, %v2395_v6  ;;  %v1242_v15 = vmul.f32 %v1234_v5, %v1178_v9  ;;  %v2378_v5 = vld [vmem:[%s2824_s27 + $0x1c0] ss:$8 sps:$4 sm:$0xff]   ;;  %v2383_v6 = vld [vmem:[%s2824_s27 + $0x1d4] ss:$8 sps:$4 sm:$0xff]  }
 0x240   : > { %v1239_v14 = vadd.f32 1.0, %v2397_v8  ;;  %v1243_v17 = vmul.f32 %v1235_v7, %v1179_v12  ;;  %v2381_v7 = vld [vmem:[%s2824_s27 + $0x1d0] ss:$8 sps:$4 sm:$0xff]   ;;  %v2386_v8 = vld [vmem:[%s2824_s27 + $0x1e4] ss:$8 sps:$4 sm:$0xff]  }
 0x241   : > { %v1246_v16 = vmul.f32 %v1238_v11, %v1182_v10  ;;  %v2384_v10 = vld [vmem:[%s2824_s27 + $0x1e0] ss:$8 sps:$4 sm:$0xff]   ;;  %v2389_v12 = vld [vmem:[%s2824_s27 + $0x1f4] ss:$8 sps:$4 sm:$0xff]  }
 0x242   : > { %v1247_v18 = vmul.f32 %v1239_v14, %v1183_v13 }
 0x243   : > { %v1254_v19 = vpack.c.bf16 %v1246_v16, %v1242_v15 }
 0x244   : > { %v1255_v20 = vpack.c.bf16 %v1247_v18, %v1243_v17 }
 0x246   : > { %1674 = vmatprep.mubr.bf16.mxu0 %v1255_v20 }
 0x247   : > { %1675 = vmatmul.mubr.bf16.vlgmr.msra.gmra.mrb[0].mxu0 %v1254_v19 }
 0x248   : > { %1686 = vmatpush1.bf16.msra.mxu0 %v2342_v21  ;;  %v2387_v21 = vld [vmem:[%s2824_s27 + $0x1f0] ss:$8 sps:$4 sm:$0xff]  }
 0x249   : > { %1687 = vmatprep.subr.bf16.mxu0 %v2347_v22 }
 0x24c   : > { %1688 = vmatpush1.bf16.msra.mxu0 %v2345_v23 }
 0x24d   : > { %1689 = vmatprep.subr.bf16.mxu0 %v2350_v24 }
 0x250   : > { %1690 = vmatpush1.bf16.msra.mxu0 %v2348_v25 }
 0x251   : > { %1691 = vmatprep.subr.bf16.mxu0 %v2353_v26 }
 0x254   : > { %1692 = vmatpush1.bf16.msra.mxu0 %v2351_v27 }
 0x255   : > { %1693 = vmatprep.subr.bf16.mxu0 %v2356_v28 }
 0x258   : > { %1694 = vmatpush1.bf16.msra.mxu0 %v2354_v29 }
 0x259   : > { %1695 = vmatprep.subr.bf16.mxu0 %v2359_v30  ;;  %v1250_v30 = vld [vmem:[#allocation3] sm:$0xff] }
 0x25c   : > { %1696 = vmatpush1.bf16.msra.mxu0 %v2357_v31  ;;  %v1251_v31 = vld [vmem:[#allocation3 + $0x8] sm:$0xff] }
 0x25d   : > { %1697 = vmatprep.subr.bf16.mxu0 %v2362_v32 }
 0x260   : > { %1698 = vmatpush1.bf16.msra.mxu0 %v2360_v33  ;;  %v1252_v33 = vld [vmem:[#allocation3 + $0x10] sm:$0xff] }
 0x261   : > { %1699 = vmatprep.subr.bf16.mxu0 %v2365_v34 }
 0x264   : > { %1700 = vmatpush1.bf16.msra.mxu0 %v2363_v35 }
 0x265   : > { %1701 = vmatprep.subr.bf16.mxu0 %v2368_v36  ;;  %v1253_v36 = vld [vmem:[#allocation3 + $0x18] sm:$0xff] }
 0x267   : > { %v1169_v39 = vpop.f32.mrb[4].mxu1 }
 0x268   : > { %v1188_v40 = vmul.f32 0.044715, %v1169_v39  ;;  %v1171_v41 = vpop.f32.mrb[5].mxu1  ;;  %1702 = vmatpush1.bf16.msra.mxu0 %v2366_v37  ;;  %v1180_v17 = vmul.f32 0.5, %v1169_v39 }
 0x269   : > { %v1189_v43 = vmul.f32 0.044715, %v1171_v41  ;;  %v1173_v44 = vpop.f32.mrb[6].mxu1  ;;  %1703 = vmatprep.subr.bf16.mxu0 %v2371_v38  ;;  %v1181_v22 = vmul.f32 0.5, %v1171_v41 }
 0x26a   : > { %v1196_v46 = vmul.f32 %v1188_v40, %v1169_v39  ;;  %v1192_v47 = vmul.f32 0.044715, %v1173_v44  ;;  %v1175_v48 = vpop.f32.mrb[7].mxu1  ;;  %v1184_v18 = vmul.f32 0.5, %v1173_v44 }
 0x26b   : > { %v1197_v49 = vmul.f32 %v1189_v43, %v1171_v41  ;;  %v1193_v50 = vmul.f32 0.044715, %v1175_v48  ;;  %v1185_v20 = vmul.f32 0.5, %v1175_v48 }
 0x26c   : > { %v1204_v51 = vmul.f32 %v1196_v46, %v1169_v39  ;;  %v1200_v52 = vmul.f32 %v1192_v47, %v1173_v44  ;;  %1704 = vmatpush1.bf16.msra.mxu0 %v2369_v42  ;;  %v1746_v42 = vlaneseq (!%p2090_p6) }
 0x26d   : > { %v1205_v54 = vmul.f32 %v1197_v49, %v1171_v41  ;;  %v1201_v55 = vmul.f32 %v1193_v50, %v1175_v48  ;;  %1705 = vmatprep.subr.bf16.mxu0 %v2374_v45 }
 0x26e   : > { %v1212_v57 = vadd.f32 %v1204_v51, %v1169_v39  ;;  %v1208_v58 = vmul.f32 %v1200_v52, %v1173_v44  ;;  %v1747_v43 = vshrl.u32 (!%p2090_p6), %v1746_v42, 7  ;;  %v1760_v52 = vld [vmem:[%s2811_s12] sm:$0xff] (!%p2090_p6) }
 0x26f   : > { %v1213_v59 = vadd.f32 %v1205_v54, %v1171_v41  ;;  %v1209_v60 = vmul.f32 %v1201_v55, %v1175_v48  ;;  %v1761_v54 = vld [vmem:[%s2811_s12 + $0x8] sm:$0xff] (!%p2090_p6)  ;;  %v1762_v55 = vld [vmem:[%s2811_s12 + $0x10] sm:$0xff] (!%p2090_p6) }
 0x270   : > { %v1220_v61 = vmul.f32 0.7978846, %v1212_v57  ;;  %v1216_v62 = vadd.f32 %v1208_v58, %v1173_v44  ;;  %1706 = vmatpush1.bf16.msra.mxu0 %v2372_v53  ;;  %v1744_v44 = vld [vmem:[%s586_s14] sm:$0x3] (!%p2090_p6)  ;;  %v1748_v46 = vsub.s32 (!%p2090_p6), 0, %v1747_v43  ;;  %v1752_v47 = vsub.s32 (!%p2090_p6), 1, %v1747_v43 }
 0x271   : > { %v1221_v0 = vmul.f32 0.7978846, %v1213_v59  ;;  %v1217_v1 = vadd.f32 %v1209_v60, %v1175_v48  ;;  %1707 = vmatprep.subr.bf16.mxu0 %v2377_v56  ;;  %v1763_v56 = vld [vmem:[%s2811_s12 + $0x18] sm:$0xff] (!%p2090_p6) }
 0x272   : > { %2398 = vtanh.f32 %v1220_v61  ;;  %v1224_v3 = vmul.f32 0.7978846, %v1216_v62  ;;  %v1749_v51 = vrot.slane (!%p2090_p6), %v1744_v44, %v1748_v46  ;;  %v1753_v53 = vrot.slane (!%p2090_p6), %v1744_v44, %v1752_v47 }
 0x273   : > { %2400 = vtanh.f32 %v1221_v0  ;;  %v1225_v4 = vmul.f32 0.7978846, %v1217_v1 }
 0x274   : > { %2402 = vtanh.f32 %v1224_v3  ;;  %1708 = vmatpush1.bf16.msra.mxu0 %v2375_v63 }
 0x275   : > { %2404 = vtanh.f32 %v1225_v4  ;;  %1709 = vmatprep.subr.bf16.mxu0 %v2380_v2 }
 0x278   : > { %1710 = vmatpush1.bf16.msra.mxu0 %v2378_v5 }
 0x279   : > { %1711 = vmatprep.subr.bf16.mxu0 %v2383_v6 }
 0x27c   : > { %v2399_v9 = vpop.eup %2398  ;;  %1712 = vmatpush1.bf16.msra.mxu0 %v2381_v7 }
 0x27d   : > { %v2401_v11 = vpop.eup %2400  ;;  %1713 = vmatprep.subr.bf16.mxu0 %v2386_v8  ;;  %v1236_v13 = vadd.f32 1.0, %v2399_v9 }
 0x27e   : > { %v2403_v14 = vpop.eup %2402  ;;  %v1237_v15 = vadd.f32 1.0, %v2401_v11 }
 0x27f   : > { %v2405_v16 = vpop.eup %2404  ;;  %v1240_v19 = vadd.f32 1.0, %v2403_v14  ;;  %v1244_v24 = vmul.f32 %v1236_v13, %v1180_v17 }
 0x280   : > { %1714 = vmatpush1.bf16.msra.mxu0 %v2384_v10  ;;  %v1241_v23 = vadd.f32 1.0, %v2405_v16  ;;  %v1245_v26 = vmul.f32 %v1237_v15, %v1181_v22 }
 0x281   : > { %1715 = vmatprep.subr.bf16.mxu0 %v2389_v12  ;;  %v1248_v25 = vmul.f32 %v1240_v19, %v1184_v18 }
 0x282   : > { %v1249_v27 = vmul.f32 %v1241_v23, %v1185_v20 }
 0x283   : > { %v1256_v28 = vpack.c.bf16 %v1248_v25, %v1244_v24 }
 0x284   : > { %1716 = vmatpush1.bf16.msra.mxu0 %v2387_v21  ;;  %v1257_v29 = vpack.c.bf16 %v1249_v27, %v1245_v26 }
 0x286   : > { %1717 = vmatprep.mubr.bf16.mxu0 %v1257_v29 }
 0x287   : > { %1718 = vmatmul.mubr.bf16.vlgmr.msra.gmra.mrb[0].mxu0 %v1256_v28 }
 0x35a   : > { %v1719_v32 = vpop.f32.mrb[0].mxu0  ;;  %1739 = sbr.rel (%p2090_p6) target bundleno = 877 (0x36d), region = 83 }
 0x35b   : > { %v1728_v34 = vadd.f32 %v1719_v32, %v1250_v30  ;;  %v1721_v35 = vpop.f32.mrb[1].mxu0 }
 0x35c   : > { %v1729_v37 = vadd.f32 %v1721_v35, %v1251_v31  ;;  %v1723_v38 = vpop.f32.mrb[2].mxu0 }
 0x35d   : > { %1732 = vst [vmem:[#allocation3] sm:$0xff] %v1728_v34  ;;  %v1730_v39 = vadd.f32 %v1723_v38, %v1252_v33  ;;  %v1725_v40 = vpop.f32.mrb[3].mxu0 }
 0x35e   : > { %1733 = vst [vmem:[#allocation3 + $0x8] sm:$0xff] %v1729_v37  ;;  %v1731_v41 = vadd.f32 %v1725_v40, %v1253_v36 }
 0x35f   : > { %1734 = vst [vmem:[#allocation3 + $0x10] sm:$0xff] %v1730_v39 }
 0x360   : > { %1735 = vst [vmem:[#allocation3 + $0x18] sm:$0xff] %v1731_v41 }
 0x364   : > { %v1740_v45 = vld [vmem:[#allocation3] sm:$0xff] }
 0x365   : > { %v1741_v48 = vld [vmem:[#allocation3 + $0x8] sm:$0xff]  ;;  %v1756_v57 = vmul.f32 %v1749_v51, %v1740_v45 }
 0x366   : > { %v1742_v49 = vld [vmem:[#allocation3 + $0x10] sm:$0xff]  ;;  %v1757_v58 = vmul.f32 %v1753_v53, %v1741_v48 }
 0x367   : > { %v1743_v50 = vld [vmem:[#allocation3 + $0x18] sm:$0xff]  ;;  %v1758_v59 = vmul.f32 %v1749_v51, %v1742_v49  ;;  %v1764_v61 = vadd.f32 %v1760_v52, %v1756_v57 }
 0x368   : > { %v1759_v60 = vmul.f32 %v1753_v53, %v1743_v50  ;;  %v1765_v62 = vadd.f32 %v1761_v54, %v1757_v58 }
 0x369   : > { %v1766_v63 = vadd.f32 %v1762_v55, %v1758_v59  ;;  %1768 = vst [vmem:[%s2832_s0] sm:$0xff] %v1764_v61 }
 0x36a   : > { %v1767_v0 = vadd.f32 %v1763_v56, %v1759_v60  ;;  %1769 = vst [vmem:[%s2832_s0 + $0x8] sm:$0xff] %v1765_v62 }
 0x36b   : > { %1770 = vst [vmem:[%s2832_s0 + $0x10] sm:$0xff] %v1766_v63 }
 0x36c   : > { %1771 = vst [vmem:[%s2832_s0 + $0x18] sm:$0xff] %v1767_v0 }
 0x36d PF: > { %s2099_s10 = sshll.u32 %s2504_s11, 9  ;;  %s1789_s30 = sshll.u32 %s2832_s0, 4  ;;  %s3018_s30 = int_to_ptr.vmem [resolvable:$true] %s1789_s30 }
 0x36e   : > { %s3015_s21 = scalar_lea.hbm %s3088_s8, %s2099_s10  ;;  %s3118_s17 = sand.u32 1, %s2484_s28  }
 0x36f   : > { %s3022_s24 = scalar_lea.sflag [#allocation6], %s3118_s17  ;;  %s2406_s5 = scalar_lea.vmem %s3018_s30, 512 }
 0x370   : > { %p2407_p7 = scmp.ne.s32.totalorder %s3018_s30, %s2406_s5  ;;  %s2519_s11 = smov [#allocation5]  }
 0x371   : > { %s2410_s13 = sshll.u32 %s2519_s11, 4  ;;  %s2411_s13 = int_to_ptr.vmem [resolvable:$false] %s2410_s13 }
 0x372   : > { %p2408_p8 = pnand %p2407_p7, %p2646_p10  ;;  %s2412_s16 = scalar_lea.vmem %s2411_s13, 1024 }
 0x373   : > { %p2413_p11 = scmp.lt.s32.totalorder %s3018_s30, %s2411_s13  ;;  %p2414_p13 = scmp.lt.s32.totalorder %s2412_s16, %s2406_s5 }
 0x374   : > { %p2409_p9 = pneg %p2408_p8 }
 0x375   : > { %p2415_p0 = por %p2414_p13, %p2413_p11 }
 0x377   : > { %p2416_p1 = pnand %p2415_p0, %p2409_p9 }
 0x379   : > { %2419 = shalt.err (!%p2416_p1)
}
 0x37a   : > { %s2420_s0 = scalar_lea.hbm %s3015_s21, 512  ;;  %s2424_s23 = scalar_lea.hbm %s3088_s8, 1024 }
 0x37b   : > { %p2421_p2 = scmp.ne.s32.totalorder %s3015_s21, %s2420_s0  ;;  %p2425_p5 = scmp.lt.u32.totalorder %s3015_s21, %s3088_s8 }
 0x37c   : > { %p2426_p6 = scmp.lt.u32.totalorder %s2424_s23, %s2420_s0  ;;  %p2428_p8 = scmp.lt.u32.totalorder %s2420_s0, %s3015_s21 }
 0x37d   : > { %p2422_p3 = pnand %p2421_p2, %p2646_p10 }
 0x37e   : > { %p2427_p7 = por %p2426_p6, %p2425_p5 }
 0x37f   : > { %p2423_p4 = pneg %p2422_p3 }
 0x380   : > { %p2429_p9 = por %p2428_p8, %p2427_p7 }
 0x382   : > { %p2430_p11 = pnand %p2429_p9, %p2423_p4 }
 0x384   : > { %2433 = shalt.err (!%p2430_p11)
}
 0x385   : > { %s2520_s15 = smov 256   ;;  %s2521_s18 = smov 16  }
 0x386   : > { %2104 = dma.vmem_to_hbm [thread:$0]  (%p2646_p10), %s3018_s30, 512, %s3015_s21, %s3022_s24, %s2520_s15, %s2520_s15, %s2521_s18  }
 0x387 PF: > { %s3119_s19 = sld [smem:[#allocation13_spill]]  ;;  %s3120_s27 = sld [smem:[#allocation8_spill]] }
 0x38d   : > { %p2110_p13 = scmp.ge.s32.totalorder %s3119_s19, 2  ;;  %s1804_s10 = sand.u32 1, %s3120_s27  }
 0x38e   : > { %s1805_s14 = scalar_lea.sflag [#allocation6], %s1804_s10 }
 0x38f   : > { %p2107_p0 = pnand %p2110_p13, %p2653_p12 }
 0x391   : > { %2475 = dma.done.wait (!%p2107_p0), %s1805_s14, 512  }
 0x392   : > { %2477 = vsyncadd (!%p2107_p0), %s1805_s14, 4294966784  ;;  %s21_s14 = sadd.s32 1, %s3119_s19   ;;  %s3122_s12 = sld [smem:[#allocation9_spill]] }
 0x393   : > { %p18_p1 = scmp.ge.s32.totalorder %s21_s14, 6   ;;  %s3123_s29 = sld [smem:[#allocation17_spill]] }
 0x394   : > { %s3124_s30 = sld [smem:[#allocation10_spill]]  ;;  %s3125_s9 = sld [smem:[#allocation16_spill]] }
 0x395   : > { %s3126_s10 = sld [smem:[#allocation11_spill]]  ;;  %s3127_s11 = sld [smem:[#allocation12_spill]] }
 0x396   : > { %s3128_s25 = sld [smem:[#allocation14_spill]]  ;;  %s3129_s13 = sld [smem:[#allocation15_spill]] }
 0x397   : > { %s3130_s27 = smov %s2484_s28  ;;  %20 = sbr.rel (!%p18_p1) target bundleno = 9 (0x9), region = 138 }
 0x398   : > { %s3131_s28 = smov %s3122_s12 }
 0x39c   : > { %s3132_s12 = smov %s3128_s25 }
 0x39e   :  { %1810 = vsyncpa [#allocation6], 1 }
 0x39f   :  { %1812 = vsyncpa [#allocation6 + $0x1], 1 }

</bundles_post_ra>
